<compile_context>
chip_gen: v5e
topology: v5e:2x2
jax: 0.10.0
libtpu: 0.0.40
codegen_flags: <defaults>
</compile_context>

<pallas_src>
import math

import jax
import jax.numpy as jnp
from jax import lax
from jax.experimental import pallas as pl
from jax.experimental.pallas import tpu as pltpu

# ----------------------- config (consistent with the module) ----------------
WIDTH = 32
IMG_SIZE = (16, 16)
PATCH_SIZE = (4, 4)
N_CHANNELS = 3
N_LAYERS = 2
N_HEADS = 4
EMB_DIM = 16

HEAD_SIZE = WIDTH // N_HEADS                     # 8
N_PATCHES = (IMG_SIZE[0] // PATCH_SIZE[0]) * (IMG_SIZE[1] // PATCH_SIZE[1])  # 16
SEQ = N_PATCHES + 1                              # 17 real tokens (patches + cls)
SEQ_PAD = 24                                     # multiple of 8 -> aligned blocks
MLP_DIM = 4 * WIDTH                              # 128
PATCH_DIM = N_CHANNELS * PATCH_SIZE[0] * PATCH_SIZE[1]  # 48
LN_EPS = 1e-5
NEG_INF = -1e30

# bf16 MXU inputs (f32 accumulate).  Set to jnp.float32 for exact-f32 matmuls.
MXU_DTYPE = jnp.bfloat16

# Local token layout inside each SEQ_PAD block:
#   rows 0..15  -> patches 0..15   (pe[1..16])
#   row  16     -> cls token       (pe[0])
#   rows 17..23 -> zero padding    (masked as attention keys; never read out)

# ------------------ static layout of the packed weight slabs ----------------
# Weight slab (bf16), shape (WSLAB_ROWS, 128); every row offset is a multiple
# of 16 (bf16 sublane tile) so all slices are tile-aligned.
LAYER0_ROW = PATCH_DIM                                   # 48
LAYER_W_ROWS = 3 * WIDTH + MLP_DIM                       # wqkv(32)+wo(32)+w1(32)+w2(128)=224
PROJ_ROW = LAYER0_ROW + N_LAYERS * LAYER_W_ROWS          # 496
WSLAB_ROWS = PROJ_ROW + WIDTH                            # 528
WSLAB_COLS = 128

# f32 slab: base block + per-layer LN params / biases, 8 rows per layer.
FSLAB_LAYER_STRIDE = 8
FSLAB_ROWS = SEQ_PAD + N_LAYERS * FSLAB_LAYER_STRIDE     # 40
FSLAB_COLS = 128


# ----------------------------- fused Pallas kernel ---------------------------
def _layernorm(x, g, b):
    mu = jnp.mean(x, axis=-1, keepdims=True)
    var = jnp.mean((x - mu) ** 2, axis=-1, keepdims=True)
    # NOTE: LN_EPS also keeps the all-zero padded rows finite (0 * inf guard).
    return (x - mu) * lax.rsqrt(var + LN_EPS) * g + b


def _gelu_tanh(x):
    # tanh-approximate GELU: routes to the EUP instead of a long erf VPU chain.
    c = math.sqrt(2.0 / math.pi)
    return 0.5 * x * (1.0 + jnp.tanh(c * (x + 0.044715 * x * x * x)))


def vit_forward_kernel(patches_ref, w_ref, f_ref, o_ref):
    # patches_ref: (B*SEQ_PAD, PATCH_DIM) f32   (zero rows at cls/pad positions)
    # w_ref:       (WSLAB_ROWS, 128)      bf16  packed matmul weights
    # f_ref:       (FSLAB_ROWS, 128)      f32   base block + LN params + biases
    # o_ref:       (B, EMB_DIM)           f32
    batch = patches_ref.shape[0] // SEQ_PAD
    scale = 1.0 / math.sqrt(HEAD_SIZE)

    # --- fused patch embedding + cls token + positional embedding -----------
    w_patch = w_ref[0:PATCH_DIM, 0:WIDTH]                       # (48, 32) bf16
    base = f_ref[0:SEQ_PAD, 0:WIDTH]                            # (24, 32) f32
    x = jnp.dot(patches_ref[...].astype(MXU_DTYPE), w_patch,
                preferred_element_type=jnp.float32)
    x = x + jnp.concatenate([base] * batch, axis=0)             # (B*24, 32)

    # additive key mask: local key positions >= SEQ are padding -> -inf
    col = lax.broadcasted_iota(jnp.int32, (1, SEQ_PAD), 1)
    key_bias = jnp.where(col < SEQ, 0.0, NEG_INF).astype(jnp.float32)

    zeros_hs = jnp.zeros((SEQ_PAD, HEAD_SIZE), MXU_DTYPE)       # hoisted constant

    for l in range(N_LAYERS):
        # ------------------ per-layer weight / bias slices -------------------
        rw = LAYER0_ROW + l * LAYER_W_ROWS
        wqkv = w_ref[rw:rw + WIDTH, 0:3 * WIDTH]                         # (32, 96)
        wo = w_ref[rw + WIDTH:rw + 2 * WIDTH, 0:WIDTH]                   # (32, 32)
        w1 = w_ref[rw + 2 * WIDTH:rw + 3 * WIDTH, 0:MLP_DIM]             # (32, 128)
        w2 = w_ref[rw + 3 * WIDTH:rw + 3 * WIDTH + MLP_DIM, 0:WIDTH]     # (128, 32)

        fr = SEQ_PAD + l * FSLAB_LAYER_STRIDE
        fblk = f_ref[fr:fr + FSLAB_LAYER_STRIDE, 0:FSLAB_COLS]           # aligned read
        ln1_g = fblk[0:1, 0:WIDTH]
        ln1_b = fblk[0:1, WIDTH:2 * WIDTH]
        ln2_g = fblk[0:1, 2 * WIDTH:3 * WIDTH]
        ln2_b = fblk[0:1, 3 * WIDTH:4 * WIDTH]
        bqkv = fblk[1:2, 0:3 * WIDTH]
        bo = fblk[1:2, 3 * WIDTH:4 * WIDTH]
        b1 = fblk[2:3, 0:MLP_DIM]
        b2 = fblk[3:4, 0:WIDTH]

        # ------------------------ attention ----------------------------------
        xn = _layernorm(x, ln1_g, ln1_b)
        qkv = jnp.dot(xn.astype(MXU_DTYPE), wqkv,
                      preferred_element_type=jnp.float32) + bqkv         # (B*24, 96)

        score_blocks = []
        v_blkdiag = []                       # per batch: (H*24, 32) block-diag V
        for b in range(batch):
            qkv_b = qkv[b * SEQ_PAD:(b + 1) * SEQ_PAD, :]
            v_rows = []
            for h in range(N_HEADS):
                c0 = h * HEAD_SIZE
                q = qkv_b[:, c0:c0 + HEAD_SIZE].astype(MXU_DTYPE)
                k = qkv_b[:, WIDTH + c0:WIDTH + c0 + HEAD_SIZE].astype(MXU_DTYPE)
                v = qkv_b[:, 2 * WIDTH + c0:2 * WIDTH + c0 + HEAD_SIZE].astype(MXU_DTYPE)
                s = lax.dot_general(q, k, (((1,), (1,)), ((), ())),
                                    preferred_element_type=jnp.float32)
                score_blocks.append(s * scale + key_bias)                # (24, 24)
                # head h's V at lane offset h*HEAD_SIZE -> block-diagonal V
                v_rows.append(jnp.concatenate(
                    [v if j == h else zeros_hs for j in range(N_HEADS)], axis=1))
            v_blkdiag.append(jnp.concatenate(v_rows, axis=0))            # (96, 32)

        # one batched softmax over all (batch, head) blocks: (B*H*24, 24)
        s_all = jnp.concatenate(score_blocks, axis=0)
        s_all = s_all - jnp.max(s_all, axis=-1, keepdims=True)           # keep stabilization
        p_all = jnp.exp(s_all)
        p_all = p_all * pl.reciprocal(
            jnp.sum(p_all, axis=-1, keepdims=True), approx=True)
        p_all = p_all.astype(MXU_DTYPE)

        # one P @ block-diag(V) matmul per batch -> lane-concatenated heads
        av_rows = []
        for b in range(batch):
            p_b = jnp.concatenate(
                [p_all[(b * N_HEADS + h) * SEQ_PAD:(b * N_HEADS + h + 1) * SEQ_PAD, :]
                 for h in range(N_HEADS)], axis=1)                       # (24, 96)
            av_rows.append(jnp.dot(p_b, v_blkdiag[b],
                                   preferred_element_type=jnp.float32))  # (24, 32)
        av = jnp.concatenate(av_rows, axis=0)                            # (B*24, 32)

        # single fused output projection for the whole (B*SEQ_PAD) slab
        x = x + jnp.dot(av.astype(MXU_DTYPE), wo,
                        preferred_element_type=jnp.float32) + bo

        # --------------------------- MLP --------------------------------------
        xn2 = _layernorm(x, ln2_g, ln2_b)
        h1 = jnp.dot(xn2.astype(MXU_DTYPE), w1,
                     preferred_element_type=jnp.float32) + b1            # (B*24, 128)
        h1 = _gelu_tanh(h1)
        x = x + jnp.dot(h1.astype(MXU_DTYPE), w2,
                        preferred_element_type=jnp.float32) + b2

    # ------------- head: static cls-row reads, project, L2 normalize ---------
    proj = w_ref[PROJ_ROW:PROJ_ROW + WIDTH, 0:EMB_DIM]                   # (32, 16)
    cls = jnp.concatenate(
        [x[b * SEQ_PAD + N_PATCHES:b * SEQ_PAD + N_PATCHES + 1, :]       # rows 16, 40
         for b in range(batch)], axis=0)                                 # (B, 32)
    y = jnp.dot(cls.astype(MXU_DTYPE), proj, preferred_element_type=jnp.float32)
    inv = lax.rsqrt(jnp.sum(y * y, axis=-1, keepdims=True) + 1e-12)
    o_ref[...] = y * inv


# ------------------------- one-time parameter packing -------------------------
def pack_params(params):
    """Pack all parameters into the two kernel slabs. Done ONCE at init."""

    def heads_to_cols(w):   # (H, WIDTH, hs) -> (WIDTH, WIDTH), head h at cols h*hs
        return jnp.transpose(w, (1, 0, 2)).reshape(WIDTH, WIDTH)

    def bias_cols(bv):      # (H, 1, hs) -> (1, WIDTH)
        return bv.reshape(1, WIDTH)

    # ---- bf16 weight slab -----------------------------------------------------
    wslab = jnp.zeros((WSLAB_ROWS, WSLAB_COLS), jnp.float32)
    wslab = wslab.at[0:PATCH_DIM, 0:WIDTH].set(params["w_patch"])
    for l, lp in enumerate(params["layers"]):
        rw = LAYER0_ROW + l * LAYER_W_ROWS
        wqkv = jnp.concatenate(
            [heads_to_cols(lp["wq"]), heads_to_cols(lp["wk"]), heads_to_cols(lp["wv"])],
            axis=1)                                                      # (32, 96)
        wslab = wslab.at[rw:rw + WIDTH, 0:3 * WIDTH].set(wqkv)
        wslab = wslab.at[rw + WIDTH:rw + 2 * WIDTH, 0:WIDTH].set(lp["wo"])
        wslab = wslab.at[rw + 2 * WIDTH:rw + 3 * WIDTH, 0:MLP_DIM].set(lp["w1"])
        wslab = wslab.at[rw + 3 * WIDTH:rw + 3 * WIDTH + MLP_DIM, 0:WIDTH].set(lp["w2"])
    wslab = wslab.at[PROJ_ROW:PROJ_ROW + WIDTH, 0:EMB_DIM].set(params["projection"])
    wslab = wslab.astype(MXU_DTYPE)

    # ---- f32 slab: base block + LN params + biases ------------------------------
    pe = params["pe"]
    base = jnp.zeros((SEQ_PAD, WIDTH), jnp.float32)
    base = base.at[0:N_PATCHES].set(params["b_patch"] + pe[1:])
    base = base.at[N_PATCHES].set(params["cls_token"][0] + pe[0])

    fslab = jnp.zeros((FSLAB_ROWS, FSLAB_COLS), jnp.float32)
    fslab = fslab.at[0:SEQ_PAD, 0:WIDTH].set(base)
    for l, lp in enumerate(params["layers"]):
        fr = SEQ_PAD + l * FSLAB_LAYER_STRIDE
        fslab = fslab.at[fr, 0:WIDTH].set(lp["ln1_g"][0])
        fslab = fslab.at[fr, WIDTH:2 * WIDTH].set(lp["ln1_b"][0])
        fslab = fslab.at[fr, 2 * WIDTH:3 * WIDTH].set(lp["ln2_g"][0])
        fslab = fslab.at[fr, 3 * WIDTH:4 * WIDTH].set(lp["ln2_b"][0])
        bqkv = jnp.concatenate(
            [bias_cols(lp["bq"]), bias_cols(lp["bk"]), bias_cols(lp["bv"])], axis=1)
        fslab = fslab.at[fr + 1, 0:3 * WIDTH].set(bqkv[0])
        fslab = fslab.at[fr + 1, 3 * WIDTH:4 * WIDTH].set(lp["bo"][0])
        fslab = fslab.at[fr + 2, 0:MLP_DIM].set(lp["b1"][0])
        fslab = fslab.at[fr + 3, 0:WIDTH].set(lp["b2"][0])

    return jax.device_put(wslab), jax.device_put(fslab)


# ------------------------------ forward wrapper -------------------------------
def extract_patches(x):
    """NCHW image -> (B, P, C*ph*pw) patch matrix (row-major patch order)."""
    b, c, h, w = x.shape
    ph, pw = PATCH_SIZE
    hp, wp = h // ph, w // pw
    x = x.reshape(b, c, hp, ph, wp, pw)
    x = x.transpose(0, 2, 4, 1, 3, 5)          # (B, Hp, Wp, C, ph, pw)
    return x.reshape(b, hp * wp, c * ph * pw)


@jax.jit
def image_encoder_forward(x, wslab, fslab):
    b = x.shape[0]
    # per-call prep is ONLY patch extraction + padding (weights packed at init)
    patches = extract_patches(x).astype(jnp.float32)                 # (B, 16, 48)
    patches = jnp.pad(patches, ((0, 0), (0, SEQ_PAD - N_PATCHES), (0, 0)))
    patches = patches.reshape(b * SEQ_PAD, PATCH_DIM)                # cls/pad rows = 0

    vmem = pltpu.MemorySpace.VMEM
    # TODO(synk): for larger batches on v7x add a leading "parallel" batch grid
    # axis to use both TensorCores; at B=2 single-core is the right call.
    return pl.pallas_call(
        vit_forward_kernel,
        out_shape=jax.ShapeDtypeStruct((b, EMB_DIM), jnp.float32),
        in_specs=[pl.BlockSpec(memory_space=vmem)] * 3,
        out_specs=pl.BlockSpec(memory_space=vmem),
    )(patches, wslab, fslab)


# ------------------------- pure-JAX reference (for checking) -----------------
def _ref_layer(z, lp):
    def ln(v, g, b):
        mu = jnp.mean(v, axis=-1, keepdims=True)
        var = jnp.mean((v - mu) ** 2, axis=-1, keepdims=True)
        return (v - mu) / jnp.sqrt(var + LN_EPS) * g + b

    xn = ln(z, lp["ln1_g"], lp["ln1_b"])
    scale = 1.0 / math.sqrt(HEAD_SIZE)
    heads = []
    for h in range(N_HEADS):
        q = xn @ lp["wq"][h] + lp["bq"][h]
        k = xn @ lp["wk"][h] + lp["bk"][h]
        v = xn @ lp["wv"][h] + lp["bv"][h]
        att = jnp.einsum("bqd,bkd->bqk", q, k) * scale
        att = jax.nn.softmax(att, axis=-1)
        heads.append(jnp.einsum("bqk,bkd->bqd", att, v))
    attn = jnp.concatenate(heads, axis=-1) @ lp["wo"] + lp["bo"]
    z = z + attn
    xn2 = ln(z, lp["ln2_g"], lp["ln2_b"])
    h1 = xn2 @ lp["w1"] + lp["b1"]
    h1 = 0.5 * h1 * (1.0 + jax.lax.erf(h1 / math.sqrt(2.0)))   # exact GELU (PyTorch default)
    return z + h1 @ lp["w2"] + lp["b2"]


def reference_forward(x, params):
    b = x.shape[0]
    patches = extract_patches(x)
    emb = patches @ params["w_patch"] + params["b_patch"]
    cls = jnp.broadcast_to(params["cls_token"], (b, 1, WIDTH))
    z = jnp.concatenate([cls, emb], axis=1) + params["pe"][None]
    for lp in params["layers"]:
        z = _ref_layer(z, lp)
    y = z[:, 0] @ params["projection"]
    return y / jnp.linalg.norm(y, axis=-1, keepdims=True)


# ------------------------------ params (deterministic) ------------------------
def make_positional_embedding(width, max_seq):
    """Even i -> sin(pos/10000^(i/w)), odd i -> cos(pos/10000^((i-1)/w))."""
    i = jnp.arange(width, dtype=jnp.float32)
    pos = jnp.arange(max_seq, dtype=jnp.float32)[:, None]
    exponent = jnp.where(i % 2 == 0, i, i - 1) / width
    angle = pos / (10000.0 ** exponent)
    return jnp.where(i % 2 == 0, jnp.sin(angle), jnp.cos(angle))  # (max_seq, width)


def init_params(key):
    keys = iter(jax.random.split(key, 256))

    def nk():
        return next(keys)

    def linear(fan_in, w_shape, b_shape):
        s = 1.0 / math.sqrt(fan_in)
        w = jax.random.uniform(nk(), w_shape, jnp.float32, -s, s)
        b = jax.random.uniform(nk(), b_shape, jnp.float32, -s, s)
        return w, b

    w_patch, b_patch = linear(PATCH_DIM, (PATCH_DIM, WIDTH), (1, WIDTH))
    cls_token = jax.random.normal(nk(), (1, WIDTH), jnp.float32)
    pe = make_positional_embedding(WIDTH, SEQ)

    layers = []
    for _ in range(N_LAYERS):
        lp = {
            "ln1_g": jnp.ones((1, WIDTH), jnp.float32),
            "ln1_b": jnp.zeros((1, WIDTH), jnp.float32),
            "ln2_g": jnp.ones((1, WIDTH), jnp.float32),
            "ln2_b": jnp.zeros((1, WIDTH), jnp.float32),
        }

        def stack_heads():
            ws, bs = [], []
            for _ in range(N_HEADS):
                w, b = linear(WIDTH, (WIDTH, HEAD_SIZE), (1, HEAD_SIZE))
                ws.append(w)
                bs.append(b)
            return jnp.stack(ws), jnp.stack(bs)  # (H, W, hs), (H, 1, hs)

        lp["wq"], lp["bq"] = stack_heads()
        lp["wk"], lp["bk"] = stack_heads()
        lp["wv"], lp["bv"] = stack_heads()
        lp["wo"], lp["bo"] = linear(WIDTH, (WIDTH, WIDTH), (1, WIDTH))
        lp["w1"], lp["b1"] = linear(WIDTH, (WIDTH, MLP_DIM), (1, MLP_DIM))
        lp["w2"], lp["b2"] = linear(MLP_DIM, (MLP_DIM, WIDTH), (1, WIDTH))
        layers.append(lp)

    projection = jax.random.normal(nk(), (WIDTH, EMB_DIM), jnp.float32)
    return {
        "w_patch": w_patch,
        "b_patch": b_patch,
        "cls_token": cls_token,
        "pe": pe,
        "layers": layers,
        "projection": projection,
    }


# ----------------------------------- main -------------------------------------
if __name__ == "__main__":
    root = jax.random.PRNGKey(0)
    pkey, xkey = jax.random.split(root)
    params = init_params(pkey)

    # one-time packing, hoisted out of the per-call path
    wslab, fslab = pack_params(params)

    x = jax.random.normal(
        xkey, (2, N_CHANNELS, IMG_SIZE[0], IMG_SIZE[1]), jnp.float32
    )  # NCHW, like PyTorch

    out = jax.block_until_ready(image_encoder_forward(x, wslab, fslab))
    assert out.shape == (2, EMB_DIM)

    ref = jax.block_until_ready(reference_forward(x, params))
    max_err = float(jnp.max(jnp.abs(out - ref)))
    # bf16 MXU inputs + tanh-GELU + approx reciprocal vs. the exact-f32/erf
    # reference: expected max |err| ~1e-2 on the L2-normalized output.
    assert max_err < 3e-2, f"kernel/reference mismatch: max |err| = {max_err}"

    print("KERNEL_OK")
</pallas_src>

<mosaic_0001>
module attributes {stable_mosaic.version = 11 : i64} {
  func.func @vit_forward_kernel(%arg0: memref<48x48xf32, #tpu.memory_space<vmem>>, %arg1: memref<528x128xbf16, #tpu.memory_space<vmem>>, %arg2: memref<40x128xf32, #tpu.memory_space<vmem>>, %arg3: memref<2x16xf32, #tpu.memory_space<vmem>>) attributes {dimension_semantics = [], scalar_prefetch = 0 : i64, scratch_operands = 0 : i64, tpu.core_type = #tpu.core_type<tc>} {
    %c0 = arith.constant 0 : index
    %c0_0 = arith.constant 0 : index
    %0 = vector.load %arg1[%c0, %c0_0] : memref<528x128xbf16, #tpu.memory_space<vmem>>, vector<48x32xbf16>
    %c0_1 = arith.constant 0 : index
    %c0_2 = arith.constant 0 : index
    %1 = vector.load %arg2[%c0_1, %c0_2] : memref<40x128xf32, #tpu.memory_space<vmem>>, vector<24x32xf32>
    %c0_3 = arith.constant 0 : index
    %c0_4 = arith.constant 0 : index
    %2 = vector.load %arg0[%c0_3, %c0_4] : memref<48x48xf32, #tpu.memory_space<vmem>>, vector<48x48xf32>
    %3 = arith.truncf %2 : vector<48x48xf32> to vector<48x48xbf16>
    %cst = arith.constant dense<0.000000e+00> : vector<48x32xf32>
    %4 = tpu.matmul %3, %0, %cst {dimension_numbers = #tpu.dot_dimension_numbers<[1], [0], [0], [1], [0, 0, 1, 1], [], []>} : vector<48x48xbf16>, vector<48x32xbf16>, vector<48x32xf32> -> vector<48x32xf32>
    %5 = tpu.concatenate %1, %1 in 0 : vector<24x32xf32>, vector<24x32xf32> -> vector<48x32xf32>
    %6 = arith.addf %4, %5 : vector<48x32xf32>
    %7 = tpu.iota {dimensions = array<i32: 1>} : vector<1x24xi32>
    %c17_i32 = arith.constant 17 : i32
    %8 = vector.broadcast %c17_i32 : i32 to vector<1x24xi32>
    %9 = arith.cmpi slt, %7, %8 : vector<1x24xi32>
    %cst_5 = arith.constant 0.000000e+00 : f32
    %cst_6 = arith.constant -1.000000e+30 : f32
    %10 = vector.broadcast %cst_5 : f32 to vector<1x24xf32>
    %11 = vector.broadcast %cst_6 : f32 to vector<1x24xf32>
    %12 = arith.select %9, %10, %11 : vector<1x24xi1>, vector<1x24xf32>
    %cst_7 = arith.constant 0.000000e+00 : bf16
    %13 = vector.broadcast %cst_7 : bf16 to vector<24x8xbf16>
    %c48 = arith.constant 48 : index
    %c0_8 = arith.constant 0 : index
    %14 = vector.load %arg1[%c48, %c0_8] : memref<528x128xbf16, #tpu.memory_space<vmem>>, vector<32x96xbf16>
    %c80 = arith.constant 80 : index
    %c0_9 = arith.constant 0 : index
    %15 = vector.load %arg1[%c80, %c0_9] : memref<528x128xbf16, #tpu.memory_space<vmem>>, vector<32x32xbf16>
    %c112 = arith.constant 112 : index
    %c0_10 = arith.constant 0 : index
    %16 = vector.load %arg1[%c112, %c0_10] : memref<528x128xbf16, #tpu.memory_space<vmem>>, vector<32x128xbf16>
    %c144 = arith.constant 144 : index
    %c0_11 = arith.constant 0 : index
    %17 = vector.load %arg1[%c144, %c0_11] : memref<528x128xbf16, #tpu.memory_space<vmem>>, vector<128x32xbf16>
    %c24 = arith.constant 24 : index
    %c0_12 = arith.constant 0 : index
    %18 = vector.load %arg2[%c24, %c0_12] : memref<40x128xf32, #tpu.memory_space<vmem>>, vector<8x128xf32>
    %19 = vector.extract_strided_slice %18 {offsets = [0, 0], sizes = [1, 32], strides = [1, 1]} : vector<8x128xf32> to vector<1x32xf32>
    %20 = vector.extract_strided_slice %18 {offsets = [0, 32], sizes = [1, 32], strides = [1, 1]} : vector<8x128xf32> to vector<1x32xf32>
    %21 = vector.extract_strided_slice %18 {offsets = [0, 64], sizes = [1, 32], strides = [1, 1]} : vector<8x128xf32> to vector<1x32xf32>
    %22 = vector.extract_strided_slice %18 {offsets = [0, 96], sizes = [1, 32], strides = [1, 1]} : vector<8x128xf32> to vector<1x32xf32>
    %23 = vector.extract_strided_slice %18 {offsets = [1, 0], sizes = [1, 96], strides = [1, 1]} : vector<8x128xf32> to vector<1x96xf32>
    %24 = vector.extract_strided_slice %18 {offsets = [1, 96], sizes = [1, 32], strides = [1, 1]} : vector<8x128xf32> to vector<1x32xf32>
    %25 = vector.extract_strided_slice %18 {offsets = [2, 0], sizes = [1, 128], strides = [1, 1]} : vector<8x128xf32> to vector<1x128xf32>
    %26 = vector.extract_strided_slice %18 {offsets = [3, 0], sizes = [1, 32], strides = [1, 1]} : vector<8x128xf32> to vector<1x32xf32>
    %cst_13 = arith.constant dense<0.000000e+00> : vector<48xf32>
    %27 = vector.multi_reduction <add>, %6, %cst_13 [1] : vector<48x32xf32> to vector<48xf32>
    %28 = vector.shape_cast %27 : vector<48xf32> to vector<48x1xf32>
    %cst_14 = arith.constant 3.200000e+01 : f32
    %29 = vector.broadcast %cst_14 : f32 to vector<48x1xf32>
    %30 = arith.divf %28, %29 : vector<48x1xf32>
    %31 = vector.broadcast %30 : vector<48x1xf32> to vector<48x32xf32>
    %32 = arith.subf %6, %31 : vector<48x32xf32>
    %33 = arith.mulf %32, %32 : vector<48x32xf32>
    %cst_15 = arith.constant dense<0.000000e+00> : vector<48xf32>
    %34 = vector.multi_reduction <add>, %33, %cst_15 [1] : vector<48x32xf32> to vector<48xf32>
    %35 = vector.shape_cast %34 : vector<48xf32> to vector<48x1xf32>
    %cst_16 = arith.constant 3.200000e+01 : f32
    %36 = vector.broadcast %cst_16 : f32 to vector<48x1xf32>
    %37 = arith.divf %35, %36 : vector<48x1xf32>
    %38 = vector.broadcast %30 : vector<48x1xf32> to vector<48x32xf32>
    %39 = arith.subf %6, %38 : vector<48x32xf32>
    %cst_17 = arith.constant 9.99999974E-6 : f32
    %40 = vector.broadcast %cst_17 : f32 to vector<48x1xf32>
    %41 = arith.addf %37, %40 : vector<48x1xf32>
    %42 = math.rsqrt %41 : vector<48x1xf32>
    %43 = vector.broadcast %42 : vector<48x1xf32> to vector<48x32xf32>
    %44 = arith.mulf %39, %43 : vector<48x32xf32>
    %45 = vector.broadcast %19 : vector<1x32xf32> to vector<48x32xf32>
    %46 = arith.mulf %44, %45 : vector<48x32xf32>
    %47 = vector.broadcast %20 : vector<1x32xf32> to vector<48x32xf32>
    %48 = arith.addf %46, %47 : vector<48x32xf32>
    %49 = arith.truncf %48 : vector<48x32xf32> to vector<48x32xbf16>
    %cst_18 = arith.constant dense<0.000000e+00> : vector<48x96xf32>
    %50 = tpu.matmul %49, %14, %cst_18 {dimension_numbers = #tpu.dot_dimension_numbers<[1], [0], [0], [1], [0, 0, 1, 1], [], []>} : vector<48x32xbf16>, vector<32x96xbf16>, vector<48x96xf32> -> vector<48x96xf32>
    %51 = vector.broadcast %23 : vector<1x96xf32> to vector<48x96xf32>
    %52 = arith.addf %50, %51 : vector<48x96xf32>
    %53 = vector.extract_strided_slice %52 {offsets = [0, 0], sizes = [24, 96], strides = [1, 1]} : vector<48x96xf32> to vector<24x96xf32>
    %54 = vector.extract_strided_slice %53 {offsets = [0, 0], sizes = [24, 8], strides = [1, 1]} : vector<24x96xf32> to vector<24x8xf32>
    %55 = arith.truncf %54 : vector<24x8xf32> to vector<24x8xbf16>
    %56 = vector.extract_strided_slice %53 {offsets = [0, 32], sizes = [24, 8], strides = [1, 1]} : vector<24x96xf32> to vector<24x8xf32>
    %57 = arith.truncf %56 : vector<24x8xf32> to vector<24x8xbf16>
    %58 = vector.extract_strided_slice %53 {offsets = [0, 64], sizes = [24, 8], strides = [1, 1]} : vector<24x96xf32> to vector<24x8xf32>
    %59 = arith.truncf %58 : vector<24x8xf32> to vector<24x8xbf16>
    %cst_19 = arith.constant dense<0.000000e+00> : vector<24x24xf32>
    %60 = tpu.matmul %55, %57, %cst_19 {dimension_numbers = #tpu.dot_dimension_numbers<[1], [1], [0], [0], [0, 0, 1, 0], [], []>} : vector<24x8xbf16>, vector<24x8xbf16>, vector<24x24xf32> -> vector<24x24xf32>
    %cst_20 = arith.constant 0.353553385 : f32
    %61 = vector.broadcast %cst_20 : f32 to vector<24x24xf32>
    %62 = arith.mulf %60, %61 : vector<24x24xf32>
    %63 = vector.broadcast %12 : vector<1x24xf32> to vector<24x24xf32>
    %64 = arith.addf %62, %63 : vector<24x24xf32>
    %65 = tpu.concatenate %59, %13, %13, %13 in 1 : vector<24x8xbf16>, vector<24x8xbf16>, vector<24x8xbf16>, vector<24x8xbf16> -> vector<24x32xbf16>
    %66 = vector.extract_strided_slice %53 {offsets = [0, 8], sizes = [24, 8], strides = [1, 1]} : vector<24x96xf32> to vector<24x8xf32>
    %67 = arith.truncf %66 : vector<24x8xf32> to vector<24x8xbf16>
    %68 = vector.extract_strided_slice %53 {offsets = [0, 40], sizes = [24, 8], strides = [1, 1]} : vector<24x96xf32> to vector<24x8xf32>
    %69 = arith.truncf %68 : vector<24x8xf32> to vector<24x8xbf16>
    %70 = vector.extract_strided_slice %53 {offsets = [0, 72], sizes = [24, 8], strides = [1, 1]} : vector<24x96xf32> to vector<24x8xf32>
    %71 = arith.truncf %70 : vector<24x8xf32> to vector<24x8xbf16>
    %cst_21 = arith.constant dense<0.000000e+00> : vector<24x24xf32>
    %72 = tpu.matmul %67, %69, %cst_21 {dimension_numbers = #tpu.dot_dimension_numbers<[1], [1], [0], [0], [0, 0, 1, 0], [], []>} : vector<24x8xbf16>, vector<24x8xbf16>, vector<24x24xf32> -> vector<24x24xf32>
    %cst_22 = arith.constant 0.353553385 : f32
    %73 = vector.broadcast %cst_22 : f32 to vector<24x24xf32>
    %74 = arith.mulf %72, %73 : vector<24x24xf32>
    %75 = vector.broadcast %12 : vector<1x24xf32> to vector<24x24xf32>
    %76 = arith.addf %74, %75 : vector<24x24xf32>
    %77 = tpu.concatenate %13, %71, %13, %13 in 1 : vector<24x8xbf16>, vector<24x8xbf16>, vector<24x8xbf16>, vector<24x8xbf16> -> vector<24x32xbf16>
    %78 = vector.extract_strided_slice %53 {offsets = [0, 16], sizes = [24, 8], strides = [1, 1]} : vector<24x96xf32> to vector<24x8xf32>
    %79 = arith.truncf %78 : vector<24x8xf32> to vector<24x8xbf16>
    %80 = vector.extract_strided_slice %53 {offsets = [0, 48], sizes = [24, 8], strides = [1, 1]} : vector<24x96xf32> to vector<24x8xf32>
    %81 = arith.truncf %80 : vector<24x8xf32> to vector<24x8xbf16>
    %82 = vector.extract_strided_slice %53 {offsets = [0, 80], sizes = [24, 8], strides = [1, 1]} : vector<24x96xf32> to vector<24x8xf32>
    %83 = arith.truncf %82 : vector<24x8xf32> to vector<24x8xbf16>
    %cst_23 = arith.constant dense<0.000000e+00> : vector<24x24xf32>
    %84 = tpu.matmul %79, %81, %cst_23 {dimension_numbers = #tpu.dot_dimension_numbers<[1], [1], [0], [0], [0, 0, 1, 0], [], []>} : vector<24x8xbf16>, vector<24x8xbf16>, vector<24x24xf32> -> vector<24x24xf32>
    %cst_24 = arith.constant 0.353553385 : f32
    %85 = vector.broadcast %cst_24 : f32 to vector<24x24xf32>
    %86 = arith.mulf %84, %85 : vector<24x24xf32>
    %87 = vector.broadcast %12 : vector<1x24xf32> to vector<24x24xf32>
    %88 = arith.addf %86, %87 : vector<24x24xf32>
    %89 = tpu.concatenate %13, %13, %83, %13 in 1 : vector<24x8xbf16>, vector<24x8xbf16>, vector<24x8xbf16>, vector<24x8xbf16> -> vector<24x32xbf16>
    %90 = vector.extract_strided_slice %53 {offsets = [0, 24], sizes = [24, 8], strides = [1, 1]} : vector<24x96xf32> to vector<24x8xf32>
    %91 = arith.truncf %90 : vector<24x8xf32> to vector<24x8xbf16>
    %92 = vector.extract_strided_slice %53 {offsets = [0, 56], sizes = [24, 8], strides = [1, 1]} : vector<24x96xf32> to vector<24x8xf32>
    %93 = arith.truncf %92 : vector<24x8xf32> to vector<24x8xbf16>
    %94 = vector.extract_strided_slice %53 {offsets = [0, 88], sizes = [24, 8], strides = [1, 1]} : vector<24x96xf32> to vector<24x8xf32>
    %95 = arith.truncf %94 : vector<24x8xf32> to vector<24x8xbf16>
    %cst_25 = arith.constant dense<0.000000e+00> : vector<24x24xf32>
    %96 = tpu.matmul %91, %93, %cst_25 {dimension_numbers = #tpu.dot_dimension_numbers<[1], [1], [0], [0], [0, 0, 1, 0], [], []>} : vector<24x8xbf16>, vector<24x8xbf16>, vector<24x24xf32> -> vector<24x24xf32>
    %cst_26 = arith.constant 0.353553385 : f32
    %97 = vector.broadcast %cst_26 : f32 to vector<24x24xf32>
    %98 = arith.mulf %96, %97 : vector<24x24xf32>
    %99 = vector.broadcast %12 : vector<1x24xf32> to vector<24x24xf32>
    %100 = arith.addf %98, %99 : vector<24x24xf32>
    %101 = tpu.concatenate %13, %13, %13, %95 in 1 : vector<24x8xbf16>, vector<24x8xbf16>, vector<24x8xbf16>, vector<24x8xbf16> -> vector<24x32xbf16>
    %102 = tpu.concatenate %65, %77, %89, %101 in 0 : vector<24x32xbf16>, vector<24x32xbf16>, vector<24x32xbf16>, vector<24x32xbf16> -> vector<96x32xbf16>
    %103 = vector.extract_strided_slice %52 {offsets = [24, 0], sizes = [24, 96], strides = [1, 1]} : vector<48x96xf32> to vector<24x96xf32>
    %104 = vector.extract_strided_slice %103 {offsets = [0, 0], sizes = [24, 8], strides = [1, 1]} : vector<24x96xf32> to vector<24x8xf32>
    %105 = arith.truncf %104 : vector<24x8xf32> to vector<24x8xbf16>
    %106 = vector.extract_strided_slice %103 {offsets = [0, 32], sizes = [24, 8], strides = [1, 1]} : vector<24x96xf32> to vector<24x8xf32>
    %107 = arith.truncf %106 : vector<24x8xf32> to vector<24x8xbf16>
    %108 = vector.extract_strided_slice %103 {offsets = [0, 64], sizes = [24, 8], strides = [1, 1]} : vector<24x96xf32> to vector<24x8xf32>
    %109 = arith.truncf %108 : vector<24x8xf32> to vector<24x8xbf16>
    %cst_27 = arith.constant dense<0.000000e+00> : vector<24x24xf32>
    %110 = tpu.matmul %105, %107, %cst_27 {dimension_numbers = #tpu.dot_dimension_numbers<[1], [1], [0], [0], [0, 0, 1, 0], [], []>} : vector<24x8xbf16>, vector<24x8xbf16>, vector<24x24xf32> -> vector<24x24xf32>
    %cst_28 = arith.constant 0.353553385 : f32
    %111 = vector.broadcast %cst_28 : f32 to vector<24x24xf32>
    %112 = arith.mulf %110, %111 : vector<24x24xf32>
    %113 = vector.broadcast %12 : vector<1x24xf32> to vector<24x24xf32>
    %114 = arith.addf %112, %113 : vector<24x24xf32>
    %115 = tpu.concatenate %109, %13, %13, %13 in 1 : vector<24x8xbf16>, vector<24x8xbf16>, vector<24x8xbf16>, vector<24x8xbf16> -> vector<24x32xbf16>
    %116 = vector.extract_strided_slice %103 {offsets = [0, 8], sizes = [24, 8], strides = [1, 1]} : vector<24x96xf32> to vector<24x8xf32>
    %117 = arith.truncf %116 : vector<24x8xf32> to vector<24x8xbf16>
    %118 = vector.extract_strided_slice %103 {offsets = [0, 40], sizes = [24, 8], strides = [1, 1]} : vector<24x96xf32> to vector<24x8xf32>
    %119 = arith.truncf %118 : vector<24x8xf32> to vector<24x8xbf16>
    %120 = vector.extract_strided_slice %103 {offsets = [0, 72], sizes = [24, 8], strides = [1, 1]} : vector<24x96xf32> to vector<24x8xf32>
    %121 = arith.truncf %120 : vector<24x8xf32> to vector<24x8xbf16>
    %cst_29 = arith.constant dense<0.000000e+00> : vector<24x24xf32>
    %122 = tpu.matmul %117, %119, %cst_29 {dimension_numbers = #tpu.dot_dimension_numbers<[1], [1], [0], [0], [0, 0, 1, 0], [], []>} : vector<24x8xbf16>, vector<24x8xbf16>, vector<24x24xf32> -> vector<24x24xf32>
    %cst_30 = arith.constant 0.353553385 : f32
    %123 = vector.broadcast %cst_30 : f32 to vector<24x24xf32>
    %124 = arith.mulf %122, %123 : vector<24x24xf32>
    %125 = vector.broadcast %12 : vector<1x24xf32> to vector<24x24xf32>
    %126 = arith.addf %124, %125 : vector<24x24xf32>
    %127 = tpu.concatenate %13, %121, %13, %13 in 1 : vector<24x8xbf16>, vector<24x8xbf16>, vector<24x8xbf16>, vector<24x8xbf16> -> vector<24x32xbf16>
    %128 = vector.extract_strided_slice %103 {offsets = [0, 16], sizes = [24, 8], strides = [1, 1]} : vector<24x96xf32> to vector<24x8xf32>
    %129 = arith.truncf %128 : vector<24x8xf32> to vector<24x8xbf16>
    %130 = vector.extract_strided_slice %103 {offsets = [0, 48], sizes = [24, 8], strides = [1, 1]} : vector<24x96xf32> to vector<24x8xf32>
    %131 = arith.truncf %130 : vector<24x8xf32> to vector<24x8xbf16>
    %132 = vector.extract_strided_slice %103 {offsets = [0, 80], sizes = [24, 8], strides = [1, 1]} : vector<24x96xf32> to vector<24x8xf32>
    %133 = arith.truncf %132 : vector<24x8xf32> to vector<24x8xbf16>
    %cst_31 = arith.constant dense<0.000000e+00> : vector<24x24xf32>
    %134 = tpu.matmul %129, %131, %cst_31 {dimension_numbers = #tpu.dot_dimension_numbers<[1], [1], [0], [0], [0, 0, 1, 0], [], []>} : vector<24x8xbf16>, vector<24x8xbf16>, vector<24x24xf32> -> vector<24x24xf32>
    %cst_32 = arith.constant 0.353553385 : f32
    %135 = vector.broadcast %cst_32 : f32 to vector<24x24xf32>
    %136 = arith.mulf %134, %135 : vector<24x24xf32>
    %137 = vector.broadcast %12 : vector<1x24xf32> to vector<24x24xf32>
    %138 = arith.addf %136, %137 : vector<24x24xf32>
    %139 = tpu.concatenate %13, %13, %133, %13 in 1 : vector<24x8xbf16>, vector<24x8xbf16>, vector<24x8xbf16>, vector<24x8xbf16> -> vector<24x32xbf16>
    %140 = vector.extract_strided_slice %103 {offsets = [0, 24], sizes = [24, 8], strides = [1, 1]} : vector<24x96xf32> to vector<24x8xf32>
    %141 = arith.truncf %140 : vector<24x8xf32> to vector<24x8xbf16>
    %142 = vector.extract_strided_slice %103 {offsets = [0, 56], sizes = [24, 8], strides = [1, 1]} : vector<24x96xf32> to vector<24x8xf32>
    %143 = arith.truncf %142 : vector<24x8xf32> to vector<24x8xbf16>
    %144 = vector.extract_strided_slice %103 {offsets = [0, 88], sizes = [24, 8], strides = [1, 1]} : vector<24x96xf32> to vector<24x8xf32>
    %145 = arith.truncf %144 : vector<24x8xf32> to vector<24x8xbf16>
    %cst_33 = arith.constant dense<0.000000e+00> : vector<24x24xf32>
    %146 = tpu.matmul %141, %143, %cst_33 {dimension_numbers = #tpu.dot_dimension_numbers<[1], [1], [0], [0], [0, 0, 1, 0], [], []>} : vector<24x8xbf16>, vector<24x8xbf16>, vector<24x24xf32> -> vector<24x24xf32>
    %cst_34 = arith.constant 0.353553385 : f32
    %147 = vector.broadcast %cst_34 : f32 to vector<24x24xf32>
    %148 = arith.mulf %146, %147 : vector<24x24xf32>
    %149 = vector.broadcast %12 : vector<1x24xf32> to vector<24x24xf32>
    %150 = arith.addf %148, %149 : vector<24x24xf32>
    %151 = tpu.concatenate %13, %13, %13, %145 in 1 : vector<24x8xbf16>, vector<24x8xbf16>, vector<24x8xbf16>, vector<24x8xbf16> -> vector<24x32xbf16>
    %152 = tpu.concatenate %115, %127, %139, %151 in 0 : vector<24x32xbf16>, vector<24x32xbf16>, vector<24x32xbf16>, vector<24x32xbf16> -> vector<96x32xbf16>
    %153 = tpu.concatenate %64, %76, %88, %100, %114, %126, %138, %150 in 0 : vector<24x24xf32>, vector<24x24xf32>, vector<24x24xf32>, vector<24x24xf32>, vector<24x24xf32>, vector<24x24xf32>, vector<24x24xf32>, vector<24x24xf32> -> vector<192x24xf32>
    %cst_35 = arith.constant dense<0xFF800000> : vector<192xf32>
    %154 = vector.multi_reduction <maximumf>, %153, %cst_35 [1] : vector<192x24xf32> to vector<192xf32>
    %155 = vector.shape_cast %154 : vector<192xf32> to vector<192x1xf32>
    %156 = vector.broadcast %155 : vector<192x1xf32> to vector<192x24xf32>
    %157 = arith.subf %153, %156 : vector<192x24xf32>
    %158 = math.exp %157 : vector<192x24xf32>
    %cst_36 = arith.constant dense<0.000000e+00> : vector<192xf32>
    %159 = vector.multi_reduction <add>, %158, %cst_36 [1] : vector<192x24xf32> to vector<192xf32>
    %160 = vector.shape_cast %159 : vector<192xf32> to vector<192x1xf32>
    %161 = tpu.reciprocal %160 {approx = true} : vector<192x1xf32> -> vector<192x1xf32>
    %162 = vector.broadcast %161 : vector<192x1xf32> to vector<192x24xf32>
    %163 = arith.mulf %158, %162 : vector<192x24xf32>
    %164 = arith.truncf %163 : vector<192x24xf32> to vector<192x24xbf16>
    %165 = vector.extract_strided_slice %164 {offsets = [0, 0], sizes = [24, 24], strides = [1, 1]} : vector<192x24xbf16> to vector<24x24xbf16>
    %166 = vector.extract_strided_slice %164 {offsets = [24, 0], sizes = [24, 24], strides = [1, 1]} : vector<192x24xbf16> to vector<24x24xbf16>
    %167 = vector.extract_strided_slice %164 {offsets = [48, 0], sizes = [24, 24], strides = [1, 1]} : vector<192x24xbf16> to vector<24x24xbf16>
    %168 = vector.extract_strided_slice %164 {offsets = [72, 0], sizes = [24, 24], strides = [1, 1]} : vector<192x24xbf16> to vector<24x24xbf16>
    %169 = tpu.concatenate %165, %166, %167, %168 in 1 : vector<24x24xbf16>, vector<24x24xbf16>, vector<24x24xbf16>, vector<24x24xbf16> -> vector<24x96xbf16>
    %cst_37 = arith.constant dense<0.000000e+00> : vector<24x32xf32>
    %170 = tpu.matmul %169, %102, %cst_37 {dimension_numbers = #tpu.dot_dimension_numbers<[1], [0], [0], [1], [0, 0, 1, 1], [], []>} : vector<24x96xbf16>, vector<96x32xbf16>, vector<24x32xf32> -> vector<24x32xf32>
    %171 = vector.extract_strided_slice %164 {offsets = [96, 0], sizes = [24, 24], strides = [1, 1]} : vector<192x24xbf16> to vector<24x24xbf16>
    %172 = vector.extract_strided_slice %164 {offsets = [120, 0], sizes = [24, 24], strides = [1, 1]} : vector<192x24xbf16> to vector<24x24xbf16>
    %173 = vector.extract_strided_slice %164 {offsets = [144, 0], sizes = [24, 24], strides = [1, 1]} : vector<192x24xbf16> to vector<24x24xbf16>
    %174 = vector.extract_strided_slice %164 {offsets = [168, 0], sizes = [24, 24], strides = [1, 1]} : vector<192x24xbf16> to vector<24x24xbf16>
    %175 = tpu.concatenate %171, %172, %173, %174 in 1 : vector<24x24xbf16>, vector<24x24xbf16>, vector<24x24xbf16>, vector<24x24xbf16> -> vector<24x96xbf16>
    %cst_38 = arith.constant dense<0.000000e+00> : vector<24x32xf32>
    %176 = tpu.matmul %175, %152, %cst_38 {dimension_numbers = #tpu.dot_dimension_numbers<[1], [0], [0], [1], [0, 0, 1, 1], [], []>} : vector<24x96xbf16>, vector<96x32xbf16>, vector<24x32xf32> -> vector<24x32xf32>
    %177 = tpu.concatenate %170, %176 in 0 : vector<24x32xf32>, vector<24x32xf32> -> vector<48x32xf32>
    %178 = arith.truncf %177 : vector<48x32xf32> to vector<48x32xbf16>
    %cst_39 = arith.constant dense<0.000000e+00> : vector<48x32xf32>
    %179 = tpu.matmul %178, %15, %cst_39 {dimension_numbers = #tpu.dot_dimension_numbers<[1], [0], [0], [1], [0, 0, 1, 1], [], []>} : vector<48x32xbf16>, vector<32x32xbf16>, vector<48x32xf32> -> vector<48x32xf32>
    %180 = arith.addf %6, %179 : vector<48x32xf32>
    %181 = vector.broadcast %24 : vector<1x32xf32> to vector<48x32xf32>
    %182 = arith.addf %180, %181 : vector<48x32xf32>
    %cst_40 = arith.constant dense<0.000000e+00> : vector<48xf32>
    %183 = vector.multi_reduction <add>, %182, %cst_40 [1] : vector<48x32xf32> to vector<48xf32>
    %184 = vector.shape_cast %183 : vector<48xf32> to vector<48x1xf32>
    %cst_41 = arith.constant 3.200000e+01 : f32
    %185 = vector.broadcast %cst_41 : f32 to vector<48x1xf32>
    %186 = arith.divf %184, %185 : vector<48x1xf32>
    %187 = vector.broadcast %186 : vector<48x1xf32> to vector<48x32xf32>
    %188 = arith.subf %182, %187 : vector<48x32xf32>
    %189 = arith.mulf %188, %188 : vector<48x32xf32>
    %cst_42 = arith.constant dense<0.000000e+00> : vector<48xf32>
    %190 = vector.multi_reduction <add>, %189, %cst_42 [1] : vector<48x32xf32> to vector<48xf32>
    %191 = vector.shape_cast %190 : vector<48xf32> to vector<48x1xf32>
    %cst_43 = arith.constant 3.200000e+01 : f32
    %192 = vector.broadcast %cst_43 : f32 to vector<48x1xf32>
    %193 = arith.divf %191, %192 : vector<48x1xf32>
    %194 = vector.broadcast %186 : vector<48x1xf32> to vector<48x32xf32>
    %195 = arith.subf %182, %194 : vector<48x32xf32>
    %cst_44 = arith.constant 9.99999974E-6 : f32
    %196 = vector.broadcast %cst_44 : f32 to vector<48x1xf32>
    %197 = arith.addf %193, %196 : vector<48x1xf32>
    %198 = math.rsqrt %197 : vector<48x1xf32>
    %199 = vector.broadcast %198 : vector<48x1xf32> to vector<48x32xf32>
    %200 = arith.mulf %195, %199 : vector<48x32xf32>
    %201 = vector.broadcast %21 : vector<1x32xf32> to vector<48x32xf32>
    %202 = arith.mulf %200, %201 : vector<48x32xf32>
    %203 = vector.broadcast %22 : vector<1x32xf32> to vector<48x32xf32>
    %204 = arith.addf %202, %203 : vector<48x32xf32>
    %205 = arith.truncf %204 : vector<48x32xf32> to vector<48x32xbf16>
    %cst_45 = arith.constant dense<0.000000e+00> : vector<48x128xf32>
    %206 = tpu.matmul %205, %16, %cst_45 {dimension_numbers = #tpu.dot_dimension_numbers<[1], [0], [0], [1], [0, 0, 1, 1], [], []>} : vector<48x32xbf16>, vector<32x128xbf16>, vector<48x128xf32> -> vector<48x128xf32>
    %207 = vector.broadcast %25 : vector<1x128xf32> to vector<48x128xf32>
    %208 = arith.addf %206, %207 : vector<48x128xf32>
    %cst_46 = arith.constant 5.000000e-01 : f32
    %209 = vector.broadcast %cst_46 : f32 to vector<48x128xf32>
    %210 = arith.mulf %209, %208 : vector<48x128xf32>
    %cst_47 = arith.constant 4.471500e-02 : f32
    %211 = vector.broadcast %cst_47 : f32 to vector<48x128xf32>
    %212 = arith.mulf %211, %208 : vector<48x128xf32>
    %213 = arith.mulf %212, %208 : vector<48x128xf32>
    %214 = arith.mulf %213, %208 : vector<48x128xf32>
    %215 = arith.addf %208, %214 : vector<48x128xf32>
    %cst_48 = arith.constant 0.797884583 : f32
    %216 = vector.broadcast %cst_48 : f32 to vector<48x128xf32>
    %217 = arith.mulf %216, %215 : vector<48x128xf32>
    %218 = math.tanh %217 : vector<48x128xf32>
    %cst_49 = arith.constant 1.000000e+00 : f32
    %219 = vector.broadcast %cst_49 : f32 to vector<48x128xf32>
    %220 = arith.addf %219, %218 : vector<48x128xf32>
    %221 = arith.mulf %210, %220 : vector<48x128xf32>
    %222 = arith.truncf %221 : vector<48x128xf32> to vector<48x128xbf16>
    %cst_50 = arith.constant dense<0.000000e+00> : vector<48x32xf32>
    %223 = tpu.matmul %222, %17, %cst_50 {dimension_numbers = #tpu.dot_dimension_numbers<[1], [0], [0], [1], [0, 0, 1, 1], [], []>} : vector<48x128xbf16>, vector<128x32xbf16>, vector<48x32xf32> -> vector<48x32xf32>
    %224 = arith.addf %182, %223 : vector<48x32xf32>
    %225 = vector.broadcast %26 : vector<1x32xf32> to vector<48x32xf32>
    %226 = arith.addf %224, %225 : vector<48x32xf32>
    %c272 = arith.constant 272 : index
    %c0_51 = arith.constant 0 : index
    %227 = vector.load %arg1[%c272, %c0_51] : memref<528x128xbf16, #tpu.memory_space<vmem>>, vector<32x96xbf16>
    %c304 = arith.constant 304 : index
    %c0_52 = arith.constant 0 : index
    %228 = vector.load %arg1[%c304, %c0_52] : memref<528x128xbf16, #tpu.memory_space<vmem>>, vector<32x32xbf16>
    %c336 = arith.constant 336 : index
    %c0_53 = arith.constant 0 : index
    %229 = vector.load %arg1[%c336, %c0_53] : memref<528x128xbf16, #tpu.memory_space<vmem>>, vector<32x128xbf16>
    %c368 = arith.constant 368 : index
    %c0_54 = arith.constant 0 : index
    %230 = vector.load %arg1[%c368, %c0_54] : memref<528x128xbf16, #tpu.memory_space<vmem>>, vector<128x32xbf16>
    %c32 = arith.constant 32 : index
    %c0_55 = arith.constant 0 : index
    %231 = vector.load %arg2[%c32, %c0_55] : memref<40x128xf32, #tpu.memory_space<vmem>>, vector<8x128xf32>
    %232 = vector.extract_strided_slice %231 {offsets = [0, 0], sizes = [1, 32], strides = [1, 1]} : vector<8x128xf32> to vector<1x32xf32>
    %233 = vector.extract_strided_slice %231 {offsets = [0, 32], sizes = [1, 32], strides = [1, 1]} : vector<8x128xf32> to vector<1x32xf32>
    %234 = vector.extract_strided_slice %231 {offsets = [0, 64], sizes = [1, 32], strides = [1, 1]} : vector<8x128xf32> to vector<1x32xf32>
    %235 = vector.extract_strided_slice %231 {offsets = [0, 96], sizes = [1, 32], strides = [1, 1]} : vector<8x128xf32> to vector<1x32xf32>
    %236 = vector.extract_strided_slice %231 {offsets = [1, 0], sizes = [1, 96], strides = [1, 1]} : vector<8x128xf32> to vector<1x96xf32>
    %237 = vector.extract_strided_slice %231 {offsets = [1, 96], sizes = [1, 32], strides = [1, 1]} : vector<8x128xf32> to vector<1x32xf32>
    %238 = vector.extract_strided_slice %231 {offsets = [2, 0], sizes = [1, 128], strides = [1, 1]} : vector<8x128xf32> to vector<1x128xf32>
    %239 = vector.extract_strided_slice %231 {offsets = [3, 0], sizes = [1, 32], strides = [1, 1]} : vector<8x128xf32> to vector<1x32xf32>
    %cst_56 = arith.constant dense<0.000000e+00> : vector<48xf32>
    %240 = vector.multi_reduction <add>, %226, %cst_56 [1] : vector<48x32xf32> to vector<48xf32>
    %241 = vector.shape_cast %240 : vector<48xf32> to vector<48x1xf32>
    %cst_57 = arith.constant 3.200000e+01 : f32
    %242 = vector.broadcast %cst_57 : f32 to vector<48x1xf32>
    %243 = arith.divf %241, %242 : vector<48x1xf32>
    %244 = vector.broadcast %243 : vector<48x1xf32> to vector<48x32xf32>
    %245 = arith.subf %226, %244 : vector<48x32xf32>
    %246 = arith.mulf %245, %245 : vector<48x32xf32>
    %cst_58 = arith.constant dense<0.000000e+00> : vector<48xf32>
    %247 = vector.multi_reduction <add>, %246, %cst_58 [1] : vector<48x32xf32> to vector<48xf32>
    %248 = vector.shape_cast %247 : vector<48xf32> to vector<48x1xf32>
    %cst_59 = arith.constant 3.200000e+01 : f32
    %249 = vector.broadcast %cst_59 : f32 to vector<48x1xf32>
    %250 = arith.divf %248, %249 : vector<48x1xf32>
    %251 = vector.broadcast %243 : vector<48x1xf32> to vector<48x32xf32>
    %252 = arith.subf %226, %251 : vector<48x32xf32>
    %cst_60 = arith.constant 9.99999974E-6 : f32
    %253 = vector.broadcast %cst_60 : f32 to vector<48x1xf32>
    %254 = arith.addf %250, %253 : vector<48x1xf32>
    %255 = math.rsqrt %254 : vector<48x1xf32>
    %256 = vector.broadcast %255 : vector<48x1xf32> to vector<48x32xf32>
    %257 = arith.mulf %252, %256 : vector<48x32xf32>
    %258 = vector.broadcast %232 : vector<1x32xf32> to vector<48x32xf32>
    %259 = arith.mulf %257, %258 : vector<48x32xf32>
    %260 = vector.broadcast %233 : vector<1x32xf32> to vector<48x32xf32>
    %261 = arith.addf %259, %260 : vector<48x32xf32>
    %262 = arith.truncf %261 : vector<48x32xf32> to vector<48x32xbf16>
    %cst_61 = arith.constant dense<0.000000e+00> : vector<48x96xf32>
    %263 = tpu.matmul %262, %227, %cst_61 {dimension_numbers = #tpu.dot_dimension_numbers<[1], [0], [0], [1], [0, 0, 1, 1], [], []>} : vector<48x32xbf16>, vector<32x96xbf16>, vector<48x96xf32> -> vector<48x96xf32>
    %264 = vector.broadcast %236 : vector<1x96xf32> to vector<48x96xf32>
    %265 = arith.addf %263, %264 : vector<48x96xf32>
    %266 = vector.extract_strided_slice %265 {offsets = [0, 0], sizes = [24, 96], strides = [1, 1]} : vector<48x96xf32> to vector<24x96xf32>
    %267 = vector.extract_strided_slice %266 {offsets = [0, 0], sizes = [24, 8], strides = [1, 1]} : vector<24x96xf32> to vector<24x8xf32>
    %268 = arith.truncf %267 : vector<24x8xf32> to vector<24x8xbf16>
    %269 = vector.extract_strided_slice %266 {offsets = [0, 32], sizes = [24, 8], strides = [1, 1]} : vector<24x96xf32> to vector<24x8xf32>
    %270 = arith.truncf %269 : vector<24x8xf32> to vector<24x8xbf16>
    %271 = vector.extract_strided_slice %266 {offsets = [0, 64], sizes = [24, 8], strides = [1, 1]} : vector<24x96xf32> to vector<24x8xf32>
    %272 = arith.truncf %271 : vector<24x8xf32> to vector<24x8xbf16>
    %cst_62 = arith.constant dense<0.000000e+00> : vector<24x24xf32>
    %273 = tpu.matmul %268, %270, %cst_62 {dimension_numbers = #tpu.dot_dimension_numbers<[1], [1], [0], [0], [0, 0, 1, 0], [], []>} : vector<24x8xbf16>, vector<24x8xbf16>, vector<24x24xf32> -> vector<24x24xf32>
    %cst_63 = arith.constant 0.353553385 : f32
    %274 = vector.broadcast %cst_63 : f32 to vector<24x24xf32>
    %275 = arith.mulf %273, %274 : vector<24x24xf32>
    %276 = vector.broadcast %12 : vector<1x24xf32> to vector<24x24xf32>
    %277 = arith.addf %275, %276 : vector<24x24xf32>
    %278 = tpu.concatenate %272, %13, %13, %13 in 1 : vector<24x8xbf16>, vector<24x8xbf16>, vector<24x8xbf16>, vector<24x8xbf16> -> vector<24x32xbf16>
    %279 = vector.extract_strided_slice %266 {offsets = [0, 8], sizes = [24, 8], strides = [1, 1]} : vector<24x96xf32> to vector<24x8xf32>
    %280 = arith.truncf %279 : vector<24x8xf32> to vector<24x8xbf16>
    %281 = vector.extract_strided_slice %266 {offsets = [0, 40], sizes = [24, 8], strides = [1, 1]} : vector<24x96xf32> to vector<24x8xf32>
    %282 = arith.truncf %281 : vector<24x8xf32> to vector<24x8xbf16>
    %283 = vector.extract_strided_slice %266 {offsets = [0, 72], sizes = [24, 8], strides = [1, 1]} : vector<24x96xf32> to vector<24x8xf32>
    %284 = arith.truncf %283 : vector<24x8xf32> to vector<24x8xbf16>
    %cst_64 = arith.constant dense<0.000000e+00> : vector<24x24xf32>
    %285 = tpu.matmul %280, %282, %cst_64 {dimension_numbers = #tpu.dot_dimension_numbers<[1], [1], [0], [0], [0, 0, 1, 0], [], []>} : vector<24x8xbf16>, vector<24x8xbf16>, vector<24x24xf32> -> vector<24x24xf32>
    %cst_65 = arith.constant 0.353553385 : f32
    %286 = vector.broadcast %cst_65 : f32 to vector<24x24xf32>
    %287 = arith.mulf %285, %286 : vector<24x24xf32>
    %288 = vector.broadcast %12 : vector<1x24xf32> to vector<24x24xf32>
    %289 = arith.addf %287, %288 : vector<24x24xf32>
    %290 = tpu.concatenate %13, %284, %13, %13 in 1 : vector<24x8xbf16>, vector<24x8xbf16>, vector<24x8xbf16>, vector<24x8xbf16> -> vector<24x32xbf16>
    %291 = vector.extract_strided_slice %266 {offsets = [0, 16], sizes = [24, 8], strides = [1, 1]} : vector<24x96xf32> to vector<24x8xf32>
    %292 = arith.truncf %291 : vector<24x8xf32> to vector<24x8xbf16>
    %293 = vector.extract_strided_slice %266 {offsets = [0, 48], sizes = [24, 8], strides = [1, 1]} : vector<24x96xf32> to vector<24x8xf32>
    %294 = arith.truncf %293 : vector<24x8xf32> to vector<24x8xbf16>
    %295 = vector.extract_strided_slice %266 {offsets = [0, 80], sizes = [24, 8], strides = [1, 1]} : vector<24x96xf32> to vector<24x8xf32>
    %296 = arith.truncf %295 : vector<24x8xf32> to vector<24x8xbf16>
    %cst_66 = arith.constant dense<0.000000e+00> : vector<24x24xf32>
    %297 = tpu.matmul %292, %294, %cst_66 {dimension_numbers = #tpu.dot_dimension_numbers<[1], [1], [0], [0], [0, 0, 1, 0], [], []>} : vector<24x8xbf16>, vector<24x8xbf16>, vector<24x24xf32> -> vector<24x24xf32>
    %cst_67 = arith.constant 0.353553385 : f32
    %298 = vector.broadcast %cst_67 : f32 to vector<24x24xf32>
    %299 = arith.mulf %297, %298 : vector<24x24xf32>
    %300 = vector.broadcast %12 : vector<1x24xf32> to vector<24x24xf32>
    %301 = arith.addf %299, %300 : vector<24x24xf32>
    %302 = tpu.concatenate %13, %13, %296, %13 in 1 : vector<24x8xbf16>, vector<24x8xbf16>, vector<24x8xbf16>, vector<24x8xbf16> -> vector<24x32xbf16>
    %303 = vector.extract_strided_slice %266 {offsets = [0, 24], sizes = [24, 8], strides = [1, 1]} : vector<24x96xf32> to vector<24x8xf32>
    %304 = arith.truncf %303 : vector<24x8xf32> to vector<24x8xbf16>
    %305 = vector.extract_strided_slice %266 {offsets = [0, 56], sizes = [24, 8], strides = [1, 1]} : vector<24x96xf32> to vector<24x8xf32>
    %306 = arith.truncf %305 : vector<24x8xf32> to vector<24x8xbf16>
    %307 = vector.extract_strided_slice %266 {offsets = [0, 88], sizes = [24, 8], strides = [1, 1]} : vector<24x96xf32> to vector<24x8xf32>
    %308 = arith.truncf %307 : vector<24x8xf32> to vector<24x8xbf16>
    %cst_68 = arith.constant dense<0.000000e+00> : vector<24x24xf32>
    %309 = tpu.matmul %304, %306, %cst_68 {dimension_numbers = #tpu.dot_dimension_numbers<[1], [1], [0], [0], [0, 0, 1, 0], [], []>} : vector<24x8xbf16>, vector<24x8xbf16>, vector<24x24xf32> -> vector<24x24xf32>
    %cst_69 = arith.constant 0.353553385 : f32
    %310 = vector.broadcast %cst_69 : f32 to vector<24x24xf32>
    %311 = arith.mulf %309, %310 : vector<24x24xf32>
    %312 = vector.broadcast %12 : vector<1x24xf32> to vector<24x24xf32>
    %313 = arith.addf %311, %312 : vector<24x24xf32>
    %314 = tpu.concatenate %13, %13, %13, %308 in 1 : vector<24x8xbf16>, vector<24x8xbf16>, vector<24x8xbf16>, vector<24x8xbf16> -> vector<24x32xbf16>
    %315 = tpu.concatenate %278, %290, %302, %314 in 0 : vector<24x32xbf16>, vector<24x32xbf16>, vector<24x32xbf16>, vector<24x32xbf16> -> vector<96x32xbf16>
    %316 = vector.extract_strided_slice %265 {offsets = [24, 0], sizes = [24, 96], strides = [1, 1]} : vector<48x96xf32> to vector<24x96xf32>
    %317 = vector.extract_strided_slice %316 {offsets = [0, 0], sizes = [24, 8], strides = [1, 1]} : vector<24x96xf32> to vector<24x8xf32>
    %318 = arith.truncf %317 : vector<24x8xf32> to vector<24x8xbf16>
    %319 = vector.extract_strided_slice %316 {offsets = [0, 32], sizes = [24, 8], strides = [1, 1]} : vector<24x96xf32> to vector<24x8xf32>
    %320 = arith.truncf %319 : vector<24x8xf32> to vector<24x8xbf16>
    %321 = vector.extract_strided_slice %316 {offsets = [0, 64], sizes = [24, 8], strides = [1, 1]} : vector<24x96xf32> to vector<24x8xf32>
    %322 = arith.truncf %321 : vector<24x8xf32> to vector<24x8xbf16>
    %cst_70 = arith.constant dense<0.000000e+00> : vector<24x24xf32>
    %323 = tpu.matmul %318, %320, %cst_70 {dimension_numbers = #tpu.dot_dimension_numbers<[1], [1], [0], [0], [0, 0, 1, 0], [], []>} : vector<24x8xbf16>, vector<24x8xbf16>, vector<24x24xf32> -> vector<24x24xf32>
    %cst_71 = arith.constant 0.353553385 : f32
    %324 = vector.broadcast %cst_71 : f32 to vector<24x24xf32>
    %325 = arith.mulf %323, %324 : vector<24x24xf32>
    %326 = vector.broadcast %12 : vector<1x24xf32> to vector<24x24xf32>
    %327 = arith.addf %325, %326 : vector<24x24xf32>
    %328 = tpu.concatenate %322, %13, %13, %13 in 1 : vector<24x8xbf16>, vector<24x8xbf16>, vector<24x8xbf16>, vector<24x8xbf16> -> vector<24x32xbf16>
    %329 = vector.extract_strided_slice %316 {offsets = [0, 8], sizes = [24, 8], strides = [1, 1]} : vector<24x96xf32> to vector<24x8xf32>
    %330 = arith.truncf %329 : vector<24x8xf32> to vector<24x8xbf16>
    %331 = vector.extract_strided_slice %316 {offsets = [0, 40], sizes = [24, 8], strides = [1, 1]} : vector<24x96xf32> to vector<24x8xf32>
    %332 = arith.truncf %331 : vector<24x8xf32> to vector<24x8xbf16>
    %333 = vector.extract_strided_slice %316 {offsets = [0, 72], sizes = [24, 8], strides = [1, 1]} : vector<24x96xf32> to vector<24x8xf32>
    %334 = arith.truncf %333 : vector<24x8xf32> to vector<24x8xbf16>
    %cst_72 = arith.constant dense<0.000000e+00> : vector<24x24xf32>
    %335 = tpu.matmul %330, %332, %cst_72 {dimension_numbers = #tpu.dot_dimension_numbers<[1], [1], [0], [0], [0, 0, 1, 0], [], []>} : vector<24x8xbf16>, vector<24x8xbf16>, vector<24x24xf32> -> vector<24x24xf32>
    %cst_73 = arith.constant 0.353553385 : f32
    %336 = vector.broadcast %cst_73 : f32 to vector<24x24xf32>
    %337 = arith.mulf %335, %336 : vector<24x24xf32>
    %338 = vector.broadcast %12 : vector<1x24xf32> to vector<24x24xf32>
    %339 = arith.addf %337, %338 : vector<24x24xf32>
    %340 = tpu.concatenate %13, %334, %13, %13 in 1 : vector<24x8xbf16>, vector<24x8xbf16>, vector<24x8xbf16>, vector<24x8xbf16> -> vector<24x32xbf16>
    %341 = vector.extract_strided_slice %316 {offsets = [0, 16], sizes = [24, 8], strides = [1, 1]} : vector<24x96xf32> to vector<24x8xf32>
    %342 = arith.truncf %341 : vector<24x8xf32> to vector<24x8xbf16>
    %343 = vector.extract_strided_slice %316 {offsets = [0, 48], sizes = [24, 8], strides = [1, 1]} : vector<24x96xf32> to vector<24x8xf32>
    %344 = arith.truncf %343 : vector<24x8xf32> to vector<24x8xbf16>
    %345 = vector.extract_strided_slice %316 {offsets = [0, 80], sizes = [24, 8], strides = [1, 1]} : vector<24x96xf32> to vector<24x8xf32>
    %346 = arith.truncf %345 : vector<24x8xf32> to vector<24x8xbf16>
    %cst_74 = arith.constant dense<0.000000e+00> : vector<24x24xf32>
    %347 = tpu.matmul %342, %344, %cst_74 {dimension_numbers = #tpu.dot_dimension_numbers<[1], [1], [0], [0], [0, 0, 1, 0], [], []>} : vector<24x8xbf16>, vector<24x8xbf16>, vector<24x24xf32> -> vector<24x24xf32>
    %cst_75 = arith.constant 0.353553385 : f32
    %348 = vector.broadcast %cst_75 : f32 to vector<24x24xf32>
    %349 = arith.mulf %347, %348 : vector<24x24xf32>
    %350 = vector.broadcast %12 : vector<1x24xf32> to vector<24x24xf32>
    %351 = arith.addf %349, %350 : vector<24x24xf32>
    %352 = tpu.concatenate %13, %13, %346, %13 in 1 : vector<24x8xbf16>, vector<24x8xbf16>, vector<24x8xbf16>, vector<24x8xbf16> -> vector<24x32xbf16>
    %353 = vector.extract_strided_slice %316 {offsets = [0, 24], sizes = [24, 8], strides = [1, 1]} : vector<24x96xf32> to vector<24x8xf32>
    %354 = arith.truncf %353 : vector<24x8xf32> to vector<24x8xbf16>
    %355 = vector.extract_strided_slice %316 {offsets = [0, 56], sizes = [24, 8], strides = [1, 1]} : vector<24x96xf32> to vector<24x8xf32>
    %356 = arith.truncf %355 : vector<24x8xf32> to vector<24x8xbf16>
    %357 = vector.extract_strided_slice %316 {offsets = [0, 88], sizes = [24, 8], strides = [1, 1]} : vector<24x96xf32> to vector<24x8xf32>
    %358 = arith.truncf %357 : vector<24x8xf32> to vector<24x8xbf16>
    %cst_76 = arith.constant dense<0.000000e+00> : vector<24x24xf32>
    %359 = tpu.matmul %354, %356, %cst_76 {dimension_numbers = #tpu.dot_dimension_numbers<[1], [1], [0], [0], [0, 0, 1, 0], [], []>} : vector<24x8xbf16>, vector<24x8xbf16>, vector<24x24xf32> -> vector<24x24xf32>
    %cst_77 = arith.constant 0.353553385 : f32
    %360 = vector.broadcast %cst_77 : f32 to vector<24x24xf32>
    %361 = arith.mulf %359, %360 : vector<24x24xf32>
    %362 = vector.broadcast %12 : vector<1x24xf32> to vector<24x24xf32>
    %363 = arith.addf %361, %362 : vector<24x24xf32>
    %364 = tpu.concatenate %13, %13, %13, %358 in 1 : vector<24x8xbf16>, vector<24x8xbf16>, vector<24x8xbf16>, vector<24x8xbf16> -> vector<24x32xbf16>
    %365 = tpu.concatenate %328, %340, %352, %364 in 0 : vector<24x32xbf16>, vector<24x32xbf16>, vector<24x32xbf16>, vector<24x32xbf16> -> vector<96x32xbf16>
    %366 = tpu.concatenate %277, %289, %301, %313, %327, %339, %351, %363 in 0 : vector<24x24xf32>, vector<24x24xf32>, vector<24x24xf32>, vector<24x24xf32>, vector<24x24xf32>, vector<24x24xf32>, vector<24x24xf32>, vector<24x24xf32> -> vector<192x24xf32>
    %cst_78 = arith.constant dense<0xFF800000> : vector<192xf32>
    %367 = vector.multi_reduction <maximumf>, %366, %cst_78 [1] : vector<192x24xf32> to vector<192xf32>
    %368 = vector.shape_cast %367 : vector<192xf32> to vector<192x1xf32>
    %369 = vector.broadcast %368 : vector<192x1xf32> to vector<192x24xf32>
    %370 = arith.subf %366, %369 : vector<192x24xf32>
    %371 = math.exp %370 : vector<192x24xf32>
    %cst_79 = arith.constant dense<0.000000e+00> : vector<192xf32>
    %372 = vector.multi_reduction <add>, %371, %cst_79 [1] : vector<192x24xf32> to vector<192xf32>
    %373 = vector.shape_cast %372 : vector<192xf32> to vector<192x1xf32>
    %374 = tpu.reciprocal %373 {approx = true} : vector<192x1xf32> -> vector<192x1xf32>
    %375 = vector.broadcast %374 : vector<192x1xf32> to vector<192x24xf32>
    %376 = arith.mulf %371, %375 : vector<192x24xf32>
    %377 = arith.truncf %376 : vector<192x24xf32> to vector<192x24xbf16>
    %378 = vector.extract_strided_slice %377 {offsets = [0, 0], sizes = [24, 24], strides = [1, 1]} : vector<192x24xbf16> to vector<24x24xbf16>
    %379 = vector.extract_strided_slice %377 {offsets = [24, 0], sizes = [24, 24], strides = [1, 1]} : vector<192x24xbf16> to vector<24x24xbf16>
    %380 = vector.extract_strided_slice %377 {offsets = [48, 0], sizes = [24, 24], strides = [1, 1]} : vector<192x24xbf16> to vector<24x24xbf16>
    %381 = vector.extract_strided_slice %377 {offsets = [72, 0], sizes = [24, 24], strides = [1, 1]} : vector<192x24xbf16> to vector<24x24xbf16>
    %382 = tpu.concatenate %378, %379, %380, %381 in 1 : vector<24x24xbf16>, vector<24x24xbf16>, vector<24x24xbf16>, vector<24x24xbf16> -> vector<24x96xbf16>
    %cst_80 = arith.constant dense<0.000000e+00> : vector<24x32xf32>
    %383 = tpu.matmul %382, %315, %cst_80 {dimension_numbers = #tpu.dot_dimension_numbers<[1], [0], [0], [1], [0, 0, 1, 1], [], []>} : vector<24x96xbf16>, vector<96x32xbf16>, vector<24x32xf32> -> vector<24x32xf32>
    %384 = vector.extract_strided_slice %377 {offsets = [96, 0], sizes = [24, 24], strides = [1, 1]} : vector<192x24xbf16> to vector<24x24xbf16>
    %385 = vector.extract_strided_slice %377 {offsets = [120, 0], sizes = [24, 24], strides = [1, 1]} : vector<192x24xbf16> to vector<24x24xbf16>
    %386 = vector.extract_strided_slice %377 {offsets = [144, 0], sizes = [24, 24], strides = [1, 1]} : vector<192x24xbf16> to vector<24x24xbf16>
    %387 = vector.extract_strided_slice %377 {offsets = [168, 0], sizes = [24, 24], strides = [1, 1]} : vector<192x24xbf16> to vector<24x24xbf16>
    %388 = tpu.concatenate %384, %385, %386, %387 in 1 : vector<24x24xbf16>, vector<24x24xbf16>, vector<24x24xbf16>, vector<24x24xbf16> -> vector<24x96xbf16>
    %cst_81 = arith.constant dense<0.000000e+00> : vector<24x32xf32>
    %389 = tpu.matmul %388, %365, %cst_81 {dimension_numbers = #tpu.dot_dimension_numbers<[1], [0], [0], [1], [0, 0, 1, 1], [], []>} : vector<24x96xbf16>, vector<96x32xbf16>, vector<24x32xf32> -> vector<24x32xf32>
    %390 = tpu.concatenate %383, %389 in 0 : vector<24x32xf32>, vector<24x32xf32> -> vector<48x32xf32>
    %391 = arith.truncf %390 : vector<48x32xf32> to vector<48x32xbf16>
    %cst_82 = arith.constant dense<0.000000e+00> : vector<48x32xf32>
    %392 = tpu.matmul %391, %228, %cst_82 {dimension_numbers = #tpu.dot_dimension_numbers<[1], [0], [0], [1], [0, 0, 1, 1], [], []>} : vector<48x32xbf16>, vector<32x32xbf16>, vector<48x32xf32> -> vector<48x32xf32>
    %393 = arith.addf %226, %392 : vector<48x32xf32>
    %394 = vector.broadcast %237 : vector<1x32xf32> to vector<48x32xf32>
    %395 = arith.addf %393, %394 : vector<48x32xf32>
    %cst_83 = arith.constant dense<0.000000e+00> : vector<48xf32>
    %396 = vector.multi_reduction <add>, %395, %cst_83 [1] : vector<48x32xf32> to vector<48xf32>
    %397 = vector.shape_cast %396 : vector<48xf32> to vector<48x1xf32>
    %cst_84 = arith.constant 3.200000e+01 : f32
    %398 = vector.broadcast %cst_84 : f32 to vector<48x1xf32>
    %399 = arith.divf %397, %398 : vector<48x1xf32>
    %400 = vector.broadcast %399 : vector<48x1xf32> to vector<48x32xf32>
    %401 = arith.subf %395, %400 : vector<48x32xf32>
    %402 = arith.mulf %401, %401 : vector<48x32xf32>
    %cst_85 = arith.constant dense<0.000000e+00> : vector<48xf32>
    %403 = vector.multi_reduction <add>, %402, %cst_85 [1] : vector<48x32xf32> to vector<48xf32>
    %404 = vector.shape_cast %403 : vector<48xf32> to vector<48x1xf32>
    %cst_86 = arith.constant 3.200000e+01 : f32
    %405 = vector.broadcast %cst_86 : f32 to vector<48x1xf32>
    %406 = arith.divf %404, %405 : vector<48x1xf32>
    %407 = vector.broadcast %399 : vector<48x1xf32> to vector<48x32xf32>
    %408 = arith.subf %395, %407 : vector<48x32xf32>
    %cst_87 = arith.constant 9.99999974E-6 : f32
    %409 = vector.broadcast %cst_87 : f32 to vector<48x1xf32>
    %410 = arith.addf %406, %409 : vector<48x1xf32>
    %411 = math.rsqrt %410 : vector<48x1xf32>
    %412 = vector.broadcast %411 : vector<48x1xf32> to vector<48x32xf32>
    %413 = arith.mulf %408, %412 : vector<48x32xf32>
    %414 = vector.broadcast %234 : vector<1x32xf32> to vector<48x32xf32>
    %415 = arith.mulf %413, %414 : vector<48x32xf32>
    %416 = vector.broadcast %235 : vector<1x32xf32> to vector<48x32xf32>
    %417 = arith.addf %415, %416 : vector<48x32xf32>
    %418 = arith.truncf %417 : vector<48x32xf32> to vector<48x32xbf16>
    %cst_88 = arith.constant dense<0.000000e+00> : vector<48x128xf32>
    %419 = tpu.matmul %418, %229, %cst_88 {dimension_numbers = #tpu.dot_dimension_numbers<[1], [0], [0], [1], [0, 0, 1, 1], [], []>} : vector<48x32xbf16>, vector<32x128xbf16>, vector<48x128xf32> -> vector<48x128xf32>
    %420 = vector.broadcast %238 : vector<1x128xf32> to vector<48x128xf32>
    %421 = arith.addf %419, %420 : vector<48x128xf32>
    %cst_89 = arith.constant 5.000000e-01 : f32
    %422 = vector.broadcast %cst_89 : f32 to vector<48x128xf32>
    %423 = arith.mulf %422, %421 : vector<48x128xf32>
    %cst_90 = arith.constant 4.471500e-02 : f32
    %424 = vector.broadcast %cst_90 : f32 to vector<48x128xf32>
    %425 = arith.mulf %424, %421 : vector<48x128xf32>
    %426 = arith.mulf %425, %421 : vector<48x128xf32>
    %427 = arith.mulf %426, %421 : vector<48x128xf32>
    %428 = arith.addf %421, %427 : vector<48x128xf32>
    %cst_91 = arith.constant 0.797884583 : f32
    %429 = vector.broadcast %cst_91 : f32 to vector<48x128xf32>
    %430 = arith.mulf %429, %428 : vector<48x128xf32>
    %431 = math.tanh %430 : vector<48x128xf32>
    %cst_92 = arith.constant 1.000000e+00 : f32
    %432 = vector.broadcast %cst_92 : f32 to vector<48x128xf32>
    %433 = arith.addf %432, %431 : vector<48x128xf32>
    %434 = arith.mulf %423, %433 : vector<48x128xf32>
    %435 = arith.truncf %434 : vector<48x128xf32> to vector<48x128xbf16>
    %cst_93 = arith.constant dense<0.000000e+00> : vector<48x32xf32>
    %436 = tpu.matmul %435, %230, %cst_93 {dimension_numbers = #tpu.dot_dimension_numbers<[1], [0], [0], [1], [0, 0, 1, 1], [], []>} : vector<48x128xbf16>, vector<128x32xbf16>, vector<48x32xf32> -> vector<48x32xf32>
    %437 = arith.addf %395, %436 : vector<48x32xf32>
    %438 = vector.broadcast %239 : vector<1x32xf32> to vector<48x32xf32>
    %439 = arith.addf %437, %438 : vector<48x32xf32>
    %c496 = arith.constant 496 : index
    %c0_94 = arith.constant 0 : index
    %440 = vector.load %arg1[%c496, %c0_94] : memref<528x128xbf16, #tpu.memory_space<vmem>>, vector<32x16xbf16>
    %441 = vector.extract_strided_slice %439 {offsets = [16, 0], sizes = [1, 32], strides = [1, 1]} : vector<48x32xf32> to vector<1x32xf32>
    %442 = vector.extract_strided_slice %439 {offsets = [40, 0], sizes = [1, 32], strides = [1, 1]} : vector<48x32xf32> to vector<1x32xf32>
    %443 = tpu.concatenate %441, %442 in 0 : vector<1x32xf32>, vector<1x32xf32> -> vector<2x32xf32>
    %444 = arith.truncf %443 : vector<2x32xf32> to vector<2x32xbf16>
    %cst_95 = arith.constant dense<0.000000e+00> : vector<2x16xf32>
    %445 = tpu.matmul %444, %440, %cst_95 {dimension_numbers = #tpu.dot_dimension_numbers<[1], [0], [0], [1], [0, 0, 1, 1], [], []>} : vector<2x32xbf16>, vector<32x16xbf16>, vector<2x16xf32> -> vector<2x16xf32>
    %446 = arith.mulf %445, %445 : vector<2x16xf32>
    %cst_96 = arith.constant dense<0.000000e+00> : vector<2xf32>
    %447 = vector.multi_reduction <add>, %446, %cst_96 [1] : vector<2x16xf32> to vector<2xf32>
    %448 = vector.shape_cast %447 : vector<2xf32> to vector<2x1xf32>
    %cst_97 = arith.constant 9.99999996E-13 : f32
    %449 = vector.broadcast %cst_97 : f32 to vector<2x1xf32>
    %450 = arith.addf %448, %449 : vector<2x1xf32>
    %451 = math.rsqrt %450 : vector<2x1xf32>
    %452 = vector.broadcast %451 : vector<2x1xf32> to vector<2x16xf32>
    %453 = arith.mulf %445, %452 : vector<2x16xf32>
    %c0_98 = arith.constant 0 : index
    %c0_99 = arith.constant 0 : index
    %454 = vector.load %arg3[%c0_98, %c0_99] : memref<2x16xf32, #tpu.memory_space<vmem>>, vector<2x16xf32>
    tpu.vector_store %arg3[%c0_98, %c0_99], %453 {strides = array<i32>} : memref<2x16xf32, #tpu.memory_space<vmem>>, vector<2x16xf32>,
    return
  }
}

</mosaic_0001>

<bundles_post_ra>
// kernel: image_encoder_forward.1
= control target key start
LH: loop header
LB: loop body
LE: loop exit
PB: predicated region body
PF: predicated region fallthrough
CT: control target
= control target key end

     0   :  { %s5359_s0 = inlined_call_operand.vmem [shape: f32[48,48], index: 0, kind: input, shape index: {}]   ;;  %s5360_s1 = inlined_call_operand.vmem [shape: bf16[528,128], index: 1, kind: input, shape index: {}]   ;;  %s5361_s2 = inlined_call_operand.vmem [shape: f32[40,128], index: 2, kind: input, shape index: {}]   ;;  %s5362_s3 = inlined_call_operand.hbm [shape: f32[2,16], index: 3, kind: output, shape index: {}]  }
   0x1   :  { %v3439_v0 = vld [vmem:[%s5360_s1 + $0x10] sm:$0xff]  ;;  %v3438_v1 = vld [vmem:[%s5360_s1 + $0x8] sm:$0xff] }
   0x2   :  { %67 = vmatpush.bf16.msra.mxu0 %v3439_v0 }
   0x3   :  { %8 = vsyncpa [#allocation3], 0  ;;  %v3437_v2 = vld [vmem:[%s5360_s1] sm:$0xff]  ;;  %v26_v4 = vld [vmem:[%s5359_s0 + $0x8] sm:$0xff]  ;;  %vm52_vm0 = vcmask 392192   ;;  %vm119_vm1 = vcmask 261120  }
   0x4   :  { %v25_v3 = vld [vmem:[%s5359_s0] sm:$0xff]  ;;  %v27_v6 = vld [vmem:[%s5359_s0 + $0x10] sm:$0xff]  ;;  %v28_v7 = vld [vmem:[%s5359_s0 + $0x18] sm:$0xff]  ;;  %v3782_v27 = vmov 32.0   ;;  %s3783_s10 = smov 96   ;;  %s3784_s15 = smov 72  }
   0x5   :  { %v31_v5 = vpack.c.bf16 %v26_v4, %v25_v3  ;;  %v32_v8 = vpack.c.bf16 %v28_v7, %v27_v6  ;;  %v29_v9 = vld [vmem:[%s5359_s0 + $0x20] sm:$0xff]  ;;  %v30_v10 = vld [vmem:[%s5359_s0 + $0x28] sm:$0xff]  ;;  %v24_v20 = vld [vmem:[%s5361_s2 + $0x10] sm:$0xff]  ;;  %3486 = vrcp.f32 %v3782_v27  ;;  %s3785_s16 = smov 88   ;;  %s3786_s17 = smov 112  }
   0x6   :  { %68 = vmatpush.bf16.msra.mxu0 %v3438_v1  ;;  %v33_v11 = vpack.c.bf16 %v30_v10, %v29_v9  ;;  %v22_v12 = vld [vmem:[%s5361_s2] sm:$0xff]  ;;  %v23_v16 = vld [vmem:[%s5361_s2 + $0x8] sm:$0xff]  ;;  %v3908_v58 = vld [vmem:[%s5361_s2 + $0x18] sm:$0xff]  ;;  %s3787_s18 = smov 80   ;;  %s3788_s19 = smov 120  }
   0x7   :  { %v3913_v60 = vperm.slane %v3908_v58, 0  ;;  %v3441_v62 = vld [vmem:[%s5360_s1 + $0x20] sm:$0xff]  ;;  %v3440_v1 = vld [vmem:[%s5360_s1 + $0x18] sm:$0xff]  ;;  %s3789_s20 = smov 104   ;;  %s3790_s21 = smov 64  }
   0x8   :  { %307 = vmatpush.bf16.msra.mxu1 %v3441_v62  ;;  %s3792_s22 = smov 48   ;;  %s3793_s23 = smov 24  }
   0x9   :  { %s3794_s24 = smov 32  }
   0xa   :  { %69 = vmatpush.bf16.msra.mxu0 %v3437_v2 }
   0xb   :  { %v3487_v28 = vpop.eup %3486 }
   0xc   :  { %v139_v29 = vmul.f32 32.0, %v3487_v28  ;;  %vm143_vm2 = vweird.f32 %v3487_v28  ;;  %308 = vmatpush.bf16.msra.mxu1 %v3440_v1 }
   0xd   :  { %3255 = vmatmul.msk.bf16.vlgmr.msra.gmra.mxu0 %vm52_vm0, %v31_v5 }
   0xe   :  { %v140_v30 = vsub.f32 1.0, %v139_v29 }
  0x10   :  { %v141_v31 = vmul.f32 %v3487_v28, %v140_v30 }
  0x12   :  { %v142_v32 = vadd.f32 %v3487_v28, %v141_v31 }
  0x14   :  { %v3871_v33 = vsel %vm143_vm2, %v3487_v28, %v142_v32 }
  0x1d   :  { %3256 = vmatmul.msk.bf16.gmra.mxu0 %vm52_vm0, %v32_v8 }
  0x2d   :  { %3257 = vmatmul.msk.bf16.gmra.mxu0 %vm52_vm0, %v33_v11 }
  0x8a   :  { %v71_v13 = vpop.f32.mrf.mxu0 }
  0x8b   :  { %v3849_v14 = vadd.f32 %v71_v13, %v22_v12 }
  0x8d   :  { %v120_v15 = vsel %vm119_vm1, %v3849_v14, 0.0 }
  0x8e   :  { %121 = vadd.xlane.f32.xlu0 %v120_v15 }
  0x92   :  { %v73_v17 = vpop.f32.mrf.mxu0 }
  0x93   :  { %v3856_v18 = vadd.f32 %v73_v17, %v23_v16 }
  0x95   :  { %v123_v19 = vsel %vm119_vm1, %v3856_v18, 0.0 }
  0x96   :  { %124 = vadd.xlane.f32.xlu0 %v123_v19 }
  0x9a   :  { %v76_v21 = vpop.f32.mrf.mxu0 }
  0x9b   :  { %v3863_v22 = vadd.f32 %v76_v21, %v24_v20 }
  0x9d   :  { %v126_v23 = vsel %vm119_vm1, %v3863_v22, 0.0 }
  0x9e   :  { %127 = vadd.xlane.f32.xlu1 %v126_v23 }
  0xa2   :  { %v78_v24 = vpop.f32.mrf.mxu0 }
  0xa3   :  { %v3867_v25 = vadd.f32 %v78_v24, %v22_v12 }
  0xa5   :  { %v129_v26 = vsel %vm119_vm1, %v3867_v25, 0.0 }
  0xa6   :  { %130 = vadd.xlane.f32.xlu1 %v129_v26 }
  0xaa   :  { %v81_v48 = vpop.f32.mrf.mxu0 }
  0xab   :  { %v3894_v51 = vadd.f32 %v81_v48, %v23_v16 }
  0xad   :  { %v132_v55 = vsel %vm119_vm1, %v3894_v51, 0.0 }
  0xb2   :  { %v83_v57 = vpop.f32.mrf.mxu0 }
  0xb3   :  { %v3910_v59 = vadd.f32 %v83_v57, %v24_v20 }
  0xb5   :  { %v135_v61 = vsel %vm119_vm1, %v3910_v59, 0.0 }
 0x101   :  { %v122_v34 = vpop.xlane.xlu0 %121 }
 0x102   :  { %v145_v35 = vmul.f32 %v3871_v33, %v122_v34 }
 0x104   :  { %v3875_v36 = vsub.f32 %v3849_v14, %v145_v35 }
 0x106   :  { %v157_v37 = vmul.f32 %v3875_v36, %v3875_v36 }
 0x108   :  { %v163_v38 = vsel %vm119_vm1, %v157_v37, 0.0 }
 0x109   :  { %164 = vadd.xlane.f32.xlu2 %v163_v38  ;;  %v125_v39 = vpop.xlane.xlu0 %124 }
 0x10a   :  { %v146_v40 = vmul.f32 %v3871_v33, %v125_v39 }
 0x10c   :  { %v3882_v41 = vsub.f32 %v3856_v18, %v146_v40 }
 0x10e   :  { %v158_v42 = vmul.f32 %v3882_v41, %v3882_v41 }
 0x110   :  { %v166_v43 = vsel %vm119_vm1, %v158_v42, 0.0 }
 0x111   :  { %v128_v44 = vpop.xlane.xlu1 %127  ;;  %167 = vadd.xlane.f32.xlu2 %v166_v43 }
 0x112   :  { %v147_v45 = vmul.f32 %v3871_v33, %v128_v44 }
 0x114   :  { %v3889_v46 = vsub.f32 %v3863_v22, %v147_v45 }
 0x116   :  { %v159_v47 = vmul.f32 %v3889_v46, %v3889_v46 }
 0x118   :  { %v169_v49 = vsel %vm119_vm1, %v159_v47, 0.0 }
 0x119   :  { %v131_v50 = vpop.xlane.xlu1 %130  ;;  %170 = vadd.xlane.f32.xlu0 %v169_v49 }
 0x11a   :  { %v148_v52 = vmul.f32 %v3871_v33, %v131_v50 }
 0x11c   :  { %v3898_v53 = vsub.f32 %v3867_v25, %v148_v52 }
 0x11e   :  { %v160_v54 = vmul.f32 %v3898_v53, %v3898_v53 }
 0x120   :  { %v172_v56 = vsel %vm119_vm1, %v160_v54, 0.0 }
 0x121   :  { %173 = vadd.xlane.f32.xlu1 %v172_v56  ;;  %133 = vadd.xlane.f32.xlu0 %v132_v55 }
 0x129   :  { %136 = vadd.xlane.f32.xlu1 %v135_v61  ;;  %267 = vrot.lane.b32.xlu2 %v3913_v60, %s3783_s10 }
 0x17c   :  { %v165_v63 = vpop.xlane.xlu2 %164 }
 0x17d   :  { %v181_v0 = vmul.f32 %v165_v63, %v3871_v33 }
 0x17f   :  { %v187_v2 = vadd.f32 1e-05, %v181_v0 }
 0x181   :  { %3488 = vrsqrt.f32 %v187_v2  ;;  %vm199_vm4 = vweird.f32 %v187_v2 }
 0x184   :  { %v168_v3 = vpop.xlane.xlu2 %167 }
 0x185   :  { %v182_v4 = vmul.f32 %v168_v3, %v3871_v33 }
 0x187   :  { %v3489_v5 = vpop.eup %3488  ;;  %v188_v6 = vadd.f32 1e-05, %v182_v4 }
 0x188   :  { %v194_v7 = vmul.f32 %v3489_v5, %v187_v2  ;;  %vm200_vm3 = vweird.f32 %v3489_v5 }
 0x189   :  { %3490 = vrsqrt.f32 %v188_v6  ;;  %vm201_vm5 = vmor %vm199_vm4, %vm200_vm3  ;;  %vm209_vm7 = vweird.f32 %v188_v6 }
 0x18a   :  { %v195_v8 = vmul.f32 %v3489_v5, %v194_v7 }
 0x18c   :  { %v196_v9 = vmul.f32 0.5, %v195_v8  ;;  %v171_v10 = vpop.xlane.xlu0 %170  ;;  %v3939_v45 = vpop.permute.xlu2 %267 }
 0x18d   :  { %v183_v11 = vmul.f32 %v171_v10, %v3871_v33 }
 0x18e   :  { %v197_v12 = vsub.f32 1.5, %v196_v9 }
 0x18f   :  { %v3491_v13 = vpop.eup %3490  ;;  %v189_v15 = vadd.f32 1e-05, %v183_v11 }
 0x190   :  { %v198_v16 = vmul.f32 %v3489_v5, %v197_v12  ;;  %v204_v17 = vmul.f32 %v3491_v13, %v188_v6  ;;  %vm210_vm6 = vweird.f32 %v3491_v13 }
 0x191   :  { %3492 = vrsqrt.f32 %v189_v15  ;;  %vm211_vm8 = vmor %vm209_vm7, %vm210_vm6  ;;  %vm219_vm10 = vweird.f32 %v189_v15  ;;  %vm335_vm7 = vcmask 64512  }
 0x192   :  { %v205_v19 = vmul.f32 %v3491_v13, %v204_v17  ;;  %v202_v20 = vsel %vm201_vm5, %v3489_v5, %v198_v16 }
 0x193   :  { %v253_v32 = vmul.f32 %v202_v20, %v3875_v36 }
 0x194   :  { %v206_v21 = vmul.f32 0.5, %v205_v19  ;;  %v174_v23 = vpop.xlane.xlu1 %173  ;;  %v134_v24 = vpop.xlane.xlu0 %133 }
 0x195   :  { %v184_v26 = vmul.f32 %v174_v23, %v3871_v33  ;;  %v149_v27 = vmul.f32 %v3871_v33, %v134_v24  ;;  %v260_v43 = vmul.f32 %v3913_v60, %v253_v32 }
 0x196   :  { %v207_v28 = vsub.f32 1.5, %v206_v21 }
 0x197   :  { %v3493_v29 = vpop.eup %3492  ;;  %v190_v30 = vadd.f32 1e-05, %v184_v26  ;;  %v3931_v31 = vsub.f32 %v3894_v51, %v149_v27  ;;  %v270_v54 = vadd.f32 %v3939_v45, %v260_v43  ;;  %v3962_v26 = vperm.slane %v3908_v58, 1 }
 0x198   :  { %v208_v34 = vmul.f32 %v3491_v13, %v207_v28  ;;  %v214_v35 = vmul.f32 %v3493_v29, %v189_v15  ;;  %vm220_vm9 = vweird.f32 %v3493_v29 }
 0x199   :  { %3494 = vrsqrt.f32 %v190_v30  ;;  %v161_v37 = vmul.f32 %v3931_v31, %v3931_v31  ;;  %vm221_vm11 = vmor %vm219_vm10, %vm220_vm9  ;;  %vm229_vm13 = vweird.f32 %v190_v30  ;;  %vm391_vm9 = vcmask 195584  }
 0x19a   :  { %v212_v38 = vsel %vm211_vm8, %v3491_v13, %v208_v34  ;;  %v215_v39 = vmul.f32 %v3493_v29, %v214_v35  ;;  %vm543_vm10 = vcmask 1043456  }
 0x19b   :  { %v175_v40 = vsel %vm119_vm1, %v161_v37, 0.0  ;;  %v254_v42 = vmul.f32 %v212_v38, %v3882_v41 }
 0x19c   :  { %v216_v44 = vmul.f32 0.5, %v215_v39  ;;  %v137_v36 = vpop.xlane.xlu1 %136  ;;  %176 = vadd.xlane.f32.xlu0 %v175_v40 }
 0x19d   :  { %v150_v47 = vmul.f32 %v3871_v33, %v137_v36  ;;  %v261_v48 = vmul.f32 %v3913_v60, %v254_v42 }
 0x19e   :  { %v217_v49 = vsub.f32 1.5, %v216_v44 }
 0x19f   :  { %v3495_v50 = vpop.eup %3494  ;;  %v3944_v52 = vsub.f32 %v3910_v59, %v150_v47  ;;  %v271_v41 = vadd.f32 %v3939_v45, %v261_v48 }
 0x1a0   :  { %v218_v55 = vmul.f32 %v3493_v29, %v217_v49  ;;  %v224_v56 = vmul.f32 %v3495_v50, %v190_v30  ;;  %vm230_vm12 = vweird.f32 %v3495_v50 }
 0x1a1   :  { %v276_v57 = vpack.c.bf16 %v271_v41, %v270_v54  ;;  %v162_v61 = vmul.f32 %v3944_v52, %v3944_v52  ;;  %vm231_vm14 = vmor %vm229_vm13, %vm230_vm12  ;;  %vm1132_vm12 = vcmask 588800   ;;  %vm1137_vm13 = vcmask 785408  }
 0x1a2   :  { %v225_v62 = vmul.f32 %v3495_v50, %v224_v56  ;;  %v222_v0 = vsel %vm221_vm11, %v3493_v29, %v218_v55  ;;  %vm388_vm11 = vcmask 130048  }
 0x1a3   :  { %3266 = vmatmul.msk.bf16.vlgmr.msra.gmra.mxu1 %vm119_vm1, %v276_v57  ;;  %v178_v63 = vsel %vm119_vm1, %v162_v61, 0.0  ;;  %v255_v3 = vmul.f32 %v222_v0, %v3889_v46 }
 0x1a4   :  { %v226_v1 = vmul.f32 0.5, %v225_v62  ;;  %179 = vadd.xlane.f32.xlu1 %v178_v63 }
 0x1a5   :  { %v262_v7 = vmul.f32 %v3913_v60, %v255_v3 }
 0x1a6   :  { %v227_v2 = vsub.f32 1.5, %v226_v1 }
 0x1a7   :  { %v272_v9 = vadd.f32 %v3939_v45, %v262_v7 }
 0x1a8   :  { %v228_v4 = vmul.f32 %v3495_v50, %v227_v2 }
 0x1aa   :  { %v232_v5 = vsel %vm231_vm14, %v3495_v50, %v228_v4 }
 0x1ab   :  { %v256_v6 = vmul.f32 %v232_v5, %v3898_v53 }
 0x1ad   :  { %v263_v8 = vmul.f32 %v3913_v60, %v256_v6 }
 0x1af   :  { %v273_v10 = vadd.f32 %v3939_v45, %v263_v8 }
 0x1b1   :  { %v277_v11 = vpack.c.bf16 %v273_v10, %v272_v9 }
 0x1b3   :  { %3267 = vmatmul.msk.bf16.gmra.mxu1 %vm119_vm1, %v277_v11 }
 0x20f   :  { %v177_v12 = vpop.xlane.xlu0 %176 }
 0x210   :  { %v185_v46 = vmul.f32 %v177_v12, %v3871_v33 }
 0x212   :  { %v191_v13 = vadd.f32 1e-05, %v185_v46 }
 0x214   :  { %3496 = vrsqrt.f32 %v191_v13  ;;  %vm239_vm2 = vweird.f32 %v191_v13 }
 0x217   :  { %v180_v15 = vpop.xlane.xlu1 %179 }
 0x218   :  { %v186_v16 = vmul.f32 %v180_v15, %v3871_v33 }
 0x21a   :  { %v3497_v53 = vpop.eup %3496  ;;  %v192_v17 = vadd.f32 1e-05, %v186_v16 }
 0x21b   :  { %v234_v19 = vmul.f32 %v3497_v53, %v191_v13  ;;  %vm240_vm15 = vweird.f32 %v3497_v53 }
 0x21c   :  { %3498 = vrsqrt.f32 %v192_v17  ;;  %vm241_vm3 = vmor %vm239_vm2, %vm240_vm15  ;;  %vm249_vm5 = vweird.f32 %v192_v17 }
 0x21d   :  { %v235_v20 = vmul.f32 %v3497_v53, %v234_v19 }
 0x21f   :  { %v236_v21 = vmul.f32 0.5, %v235_v20 }
 0x220   :  { %v310_v23 = vpop.f32.mrf.mxu1 }
 0x221   :  { %v237_v24 = vsub.f32 1.5, %v236_v21  ;;  %v311_v32 = vadd.f32 %v310_v23, %v3962_v26 }
 0x222   :  { %v3499_v27 = vpop.eup %3498 }
 0x223   :  { %v238_v28 = vmul.f32 %v3497_v53, %v237_v24  ;;  %v244_v29 = vmul.f32 %v3499_v27, %v192_v17  ;;  %vm250_vm4 = vweird.f32 %v3499_v27  ;;  %v327_v39 = vpack.c.bf16 %v311_v32, %v311_v32 }
 0x224   :  { %vm251_vm6 = vmor %vm249_vm5, %vm250_vm4 }
 0x225   :  { %v245_v30 = vmul.f32 %v3499_v27, %v244_v29  ;;  %v242_v34 = vsel %vm241_vm3, %v3497_v53, %v238_v28  ;;  %v3969_v47 = vunpack.c.l.b16 %v327_v39 }
 0x226   :  { %v257_v58 = vmul.f32 %v242_v34, %v3931_v31 }
 0x227   :  { %v246_v35 = vmul.f32 0.5, %v245_v30 }
 0x228   :  { %v312_v37 = vpop.f32.mrf.mxu1  ;;  %v264_v50 = vmul.f32 %v3913_v60, %v257_v58 }
 0x229   :  { %v247_v38 = vsub.f32 1.5, %v246_v35  ;;  %v313_v40 = vadd.f32 %v312_v37, %v3962_v26 }
 0x22a   :  { %v274_v56 = vadd.f32 %v3939_v45, %v264_v50 }
 0x22b   :  { %v248_v42 = vmul.f32 %v3499_v27, %v247_v38  ;;  %v3967_v43 = vpack.c.bf16 %v313_v40, %v311_v32  ;;  %v328_v44 = vpack.c.bf16 %v313_v40, %v313_v40 }
 0x22d   :  { %v252_v36 = vsel %vm251_vm6, %v3499_v27, %v248_v42  ;;  %v3971_v48 = vunpack.c.l.b16 %v328_v44  ;;  %331 = vrot.lane.b32.xlu1 %v3967_v43, %s3783_s10 }
 0x22e   :  { %v258_v49 = vmul.f32 %v252_v36, %v3944_v52 }
 0x22f   :  { %v377_v31 = vpack.c.b16 %v3971_v48, %v3969_v47 }
 0x230   :  { %v315_v54 = vpop.f32.mrf.mxu1  ;;  %v265_v41 = vmul.f32 %v3913_v60, %v258_v49 }
 0x231   :  { %v316_v55 = vadd.f32 %v315_v54, %v3962_v26  ;;  %v86_v54 = vlaneseq }
 0x232   :  { %v275_v57 = vadd.f32 %v3939_v45, %v265_v41 }
 0x233   :  { %v3983_v61 = vpack.c.bf16 %v316_v55, %v316_v55  ;;  %v87_v41 = vand.u32 127, %v86_v54 }
 0x234   :  { %v278_v62 = vpack.c.bf16 %v275_v57, %v274_v56 }
 0x235   :  { %500 = vrot.lane.b32.xlu1 %v3983_v61, %s3784_s15  ;;  %401 = vrot.lane.b32.xlu2 %v3983_v61, %s3785_s16  ;;  %v376_v38 = vunpack.c.l.b16 %v3983_v61  ;;  %vm88_vm8 = vcmp.lt.s32.totalorder %v87_v41, 17 }
 0x236   :  { %333 = vrot.lane.b32.xlu0 %v3983_v61, %s3783_s10  ;;  %3268 = vmatmul.msk.bf16.gmra.mxu1 %vm119_vm1, %v278_v62 }
 0x237   :  { %v378_v39 = vpack.c.b16 %v376_v38, %v376_v38 }
 0x238   :  { %v317_v1 = vpop.f32.mrf.mxu1 }
 0x239   :  { %v318_v9 = vadd.f32 %v317_v1, %v3962_v26 }
 0x23b   :  { %v563_v28 = vpack.c.bf16 %v318_v9, %v318_v9 }
 0x23d   :  { %445 = vrot.lane.b32.xlu1 %v3967_v43, %s3786_s17  ;;  %399 = vrot.lane.b32.xlu2 %v3967_v43, %s3785_s16  ;;  %v609_v30 = vunpack.c.l.b16 %v563_v28 }
 0x23e   :  { %451 = vrot.lane.b32.xlu0 %v3983_v61, %s3787_s18 }
 0x245   :  { %395 = vrot.lane.b32.xlu2 %v3967_v43, %s3788_s19 }
 0x246   :  { %449 = vrot.lane.b32.xlu0 %v3967_v43, %s3787_s18 }
 0x24d   :  { %397 = vrot.lane.b32.xlu2 %v3983_v61, %s3788_s19 }
 0x24e   :  { %494 = vrot.lane.b32.xlu0 %v3967_v43, %s3789_s20 }
 0x255   :  { %498 = vrot.lane.b32.xlu2 %v3967_v43, %s3784_s15 }
 0x256   :  { %496 = vrot.lane.b32.xlu0 %v3983_v61, %s3789_s20 }
 0x25d   :  { %447 = vrot.lane.b32.xlu2 %v3983_v61, %s3786_s17 }
 0x28f   :  { %v402_v45 = vpop.permute.xlu2 %401 }
 0x290   :  { %v413_v7 = vsel %vm335_vm7, %v402_v45, 0 }
 0x297   :  { %v400_v52 = vpop.permute.xlu2 %399 }
 0x298   :  { %v410_v16 = vsel %vm335_vm7, %v400_v52, 0 }
 0x29f   :  { %v396_v2 = vpop.permute.xlu2 %395  ;;  %v332_v3 = vpop.permute.xlu1 %331 }
 0x2a0   :  { %v343_v5 = vsel %vm335_vm7, %v332_v3, 0 }
 0x2a7   :  { %v398_v11 = vpop.permute.xlu2 %397  ;;  %v501_v46 = vpop.permute.xlu1 %500 }
 0x2a8   :  { %v334_v63 = vpop.permute.xlu0 %333  ;;  %v512_v53 = vsel %vm335_vm7, %v501_v46, 0 }
 0x2a9   :  { %v346_v0 = vsel %vm335_vm7, %v334_v63, 0  ;;  %v3791_v63 = vmov -1e+30  }
 0x2aa   :  { %354 = vmatpush.bf16.xpose.msra.mxu2 %v346_v0  ;;  %3470 = vmatpush.bf16.xpose.msra.mxu3 %v346_v0  ;;  %v4081_v0 = vsel %vm88_vm8, 0.0, %v3791_v63 }
 0x2af   :  { %v499_v21 = vpop.permute.xlu2 %498  ;;  %v446_v24 = vpop.permute.xlu1 %445 }
 0x2b0   :  { %v452_v4 = vpop.permute.xlu0 %451  ;;  %v509_v23 = vsel %vm335_vm7, %v499_v21, 0 }
 0x2b1   :  { %v463_v6 = vsel %vm335_vm7, %v452_v4, 0 }
 0x2b2   :  { %355 = vmatpush.bf16.xpose.msra.mxu2 %v343_v5  ;;  %3471 = vmatpush.bf16.xpose.msra.mxu3 %v343_v5 }
 0x2b3   :  { %v320_v8 = vpop.f32.mrf.mxu1 }
 0x2b4   :  { %v321_v10 = vadd.f32 %v320_v8, %v3962_v26 }
 0x2b6   :  { %v4018_v12 = vpack.c.bf16 %v321_v10, %v318_v9  ;;  %v564_v27 = vpack.c.bf16 %v321_v10, %v321_v10 }
 0x2b7   :  { %v448_v34 = vpop.permute.xlu2 %447 }
 0x2b8   :  { %v450_v13 = vpop.permute.xlu0 %449  ;;  %681 = vrot.lane.b32.xlu0 %v4018_v12, %s3787_s18  ;;  %v610_v29 = vunpack.c.l.b16 %v564_v27 }
 0x2b9   :  { %3269 = vmatmul.msk.bf16.vlgmr.msra.gmra.mxu2 %vm335_vm7, %v3967_v43  ;;  %3270 = vmatmul.msk.bf16.vlgmr.msra.gmra.mxu3 %vm335_vm7, %v3983_v61  ;;  %v460_v15 = vsel %vm335_vm7, %v450_v13, 0 }
 0x2ba   :  { %421 = vmatpush.bf16.xpose.msrb.mxu3 %v413_v7  ;;  %471 = vmatpush.bf16.xpose.msrb.mxu2 %v463_v6  ;;  %v612_v32 = vpack.c.b16 %v610_v29, %v609_v30 }
 0x2bb   :  { %v322_v17 = vpop.f32.mrf.mxu1 }
 0x2bc   :  { %v323_v19 = vadd.f32 %v322_v17, %v3962_v26 }
 0x2be   :  { %v4030_v20 = vpack.c.bf16 %v323_v19, %v323_v19 }
 0x2c0   :  { %732 = vrot.lane.b32.xlu2 %v4030_v20, %s3784_s15  ;;  %683 = vrot.lane.b32.xlu1 %v4030_v20, %s3787_s18  ;;  %v611_v35 = vunpack.c.l.b16 %v4030_v20  ;;  %v495_v40 = vpop.permute.xlu0 %494 }
 0x2c1   :  { %677 = vrot.lane.b32.xlu0 %v4018_v12, %s3786_s17 }
 0x2c2   :  { %422 = vmatpush.bf16.xpose.msrb.mxu3 %v410_v16  ;;  %472 = vmatpush.bf16.xpose.msrb.mxu2 %v460_v15  ;;  %v613_v37 = vpack.c.b16 %v611_v35, %v611_v35 }
 0x2c8   :  { %633 = vrot.lane.b32.xlu1 %v4030_v20, %s3785_s16  ;;  %730 = vrot.lane.b32.xlu2 %v4018_v12, %s3784_s15  ;;  %v497_v58 = vpop.permute.xlu0 %496 }
 0x2c9   :  { %569 = vrot.lane.b32.xlu0 %v4030_v20, %s3783_s10  ;;  %3271 = vmatmul.msk.bf16.vlgmr.msrb.gmra.mxu3 %vm335_vm7, %v396_v2 }
 0x2ca   :  { %520 = vmatpush.bf16.xpose.msra.mxu3 %v512_v53  ;;  %3273 = vmatmul.msk.bf16.vlgmr.msrb.gmra.mxu2 %vm335_vm7, %v446_v24 }
 0x2d0   :  { %631 = vrot.lane.b32.xlu1 %v4018_v12, %s3785_s16  ;;  %726 = vrot.lane.b32.xlu2 %v4018_v12, %s3789_s20 }
 0x2d1   :  { %567 = vrot.lane.b32.xlu0 %v4018_v12, %s3783_s10 }
 0x2d2   :  { %521 = vmatpush.bf16.xpose.msra.mxu3 %v509_v23 }
 0x2d8   :  { %627 = vrot.lane.b32.xlu1 %v4018_v12, %s3788_s19  ;;  %679 = vrot.lane.b32.xlu2 %v4030_v20, %s3786_s17 }
 0x2d9   :  { %614 = vrot.lane.b32.xlu0 %v612_v32, %s3790_s21  ;;  %3272 = vmatmul.msk.bf16.gmra.mxu3 %vm335_vm7, %v398_v11 }
 0x2da   :  { %3274 = vmatmul.msk.bf16.gmra.mxu2 %vm335_vm7, %v448_v34 }
 0x2e0   :  { %728 = vrot.lane.b32.xlu1 %v4030_v20, %s3789_s20  ;;  %629 = vrot.lane.b32.xlu2 %v4030_v20, %s3788_s19 }
 0x2e1   :  { %616 = vrot.lane.b32.xlu0 %v613_v37, %s3790_s21 }
 0x2e8   :  { %381 = vrot.lane.b32.xlu1 %v378_v39, %s3790_s21  ;;  %379 = vrot.lane.b32.xlu2 %v377_v31, %s3790_s21 }
 0x2e9   :  { %3275 = vmatmul.msk.bf16.vlgmr.msra.gmra.mxu3 %vm335_vm7, %v495_v40 }
 0x2f9   :  { %3276 = vmatmul.msk.bf16.gmra.mxu3 %vm335_vm7, %v497_v58 }
 0x31a   :  { %v733_v42 = vpop.permute.xlu2 %732 }
 0x31b   :  { %v744_v43 = vsel %vm335_vm7, %v733_v42, 0 }
 0x31c   :  { %752 = vmatpush.bf16.xpose.msrb.mxu3 %v744_v43 }
 0x322   :  { %v731_v44 = vpop.permute.xlu2 %730 }
 0x323   :  { %v741_v36 = vsel %vm335_vm7, %v731_v44, 0 }
 0x324   :  { %753 = vmatpush.bf16.xpose.msrb.mxu3 %v741_v36 }
 0x32a   :  { %v727_v49 = vpop.permute.xlu2 %726  ;;  %v682_v50 = vpop.permute.xlu0 %681 }
 0x32b   :  { %3283 = vmatmul.msk.bf16.vlgmr.msrb.gmra.mxu3 %vm335_vm7, %v727_v49  ;;  %v692_v61 = vsel %vm335_vm7, %v682_v50, 0 }
 0x332   :  { %v684_v47 = vpop.permute.xlu1 %683  ;;  %v680_v5 = vpop.permute.xlu2 %679 }
 0x333   :  { %v695_v48 = vsel %vm335_vm7, %v684_v47, 0  ;;  %v678_v31 = vpop.permute.xlu0 %677 }
 0x334   :  { %703 = vmatpush.bf16.xpose.msra.mxu2 %v695_v48 }
 0x33a   :  { %v634_v55 = vpop.permute.xlu1 %633  ;;  %v630_v19 = vpop.permute.xlu2 %629 }
 0x33b   :  { %v570_v56 = vpop.permute.xlu0 %569  ;;  %v645_v57 = vsel %vm335_vm7, %v634_v55, 0 }
 0x33c   :  { %v357_v62 = vpop.f32.mrf.mxu2  ;;  %v362_v45 = vpop.f32.mrf.mxu3  ;;  %v581_v52 = vsel %vm335_vm7, %v570_v56, 0  ;;  %653 = vmatpush.bf16.xpose.msrb.mxu0 %v645_v57  ;;  %704 = vmatpush.bf16.xpose.msra.mxu2 %v692_v61 }
 0x33d   :  { %v366_v1 = vmul.f32 0.35355338, %v357_v62  ;;  %v368_v2 = vmul.f32 0.35355338, %v362_v45  ;;  %589 = vmatpush.bf16.xpose.msrb.mxu1 %v581_v52 }
 0x33f   :  { %v4084_v3 = vadd.f32 %v368_v2, %v4081_v0  ;;  %v4087_v4 = vadd.f32 %v366_v1, %v4081_v0 }
 0x341   :  { %v796_v6 = vsel %vm391_vm9, %v4084_v3, -inf  ;;  %v790_v7 = vsel %vm391_vm9, %v4087_v4, -inf }
 0x342   :  { %797 = vmax.xlane.f32.xlu2 %v796_v6  ;;  %791 = vmax.xlane.f32.xlu1 %v790_v7  ;;  %v632_v8 = vpop.permute.xlu1 %631  ;;  %v4123_v40 = vpop.permute.xlu2 %379 }
 0x343   :  { %v568_v9 = vpop.permute.xlu0 %567  ;;  %3281 = vmatmul.msk.bf16.vlgmr.msra.gmra.mxu2 %vm335_vm7, %v678_v31  ;;  %v642_v10 = vsel %vm335_vm7, %v632_v8, 0  ;;  %v539_v54 = vsel %vm391_vm9, 0, %v4123_v40 }
 0x344   :  { %v359_v11 = vpop.f32.mrf.mxu2  ;;  %v364_v46 = vpop.f32.mrf.mxu3  ;;  %v578_v13 = vsel %vm335_vm7, %v568_v9, 0  ;;  %654 = vmatpush.bf16.xpose.msrb.mxu0 %v642_v10  ;;  %v550_v56 = vrot.slane %v539_v54, 4  ;;  %v439_v10 = vsel %vm335_vm7, 0, %v4123_v40  ;;  %v385_v54 = vsel %vm335_vm7, %v4123_v40, 0 }
 0x345   :  { %v367_v15 = vmul.f32 0.35355338, %v359_v11  ;;  %590 = vmatpush.bf16.xpose.msrb.mxu1 %v578_v13 }
 0x347   :  { %v4097_v16 = vadd.f32 %v367_v15, %v4081_v0 }
 0x349   :  { %v793_v53 = vsel %vm391_vm9, %v4097_v16, -inf }
 0x34a   :  { %794 = vmax.xlane.f32.xlu0 %v793_v53  ;;  %v628_v17 = vpop.permute.xlu1 %627  ;;  %v441_v53 = vsel %vm388_vm11, %v439_v10, 0 }
 0x34b   :  { %v4101_v21 = vpop.permute.xlu0 %614  ;;  %3279 = vmatmul.msk.bf16.vlgmr.msrb.gmra.mxu0 %vm335_vm7, %v628_v17 }
 0x34c   :  { %v424_v23 = vpop.f32.mrf.mxu3  ;;  %3277 = vmatmul.msk.bf16.vlgmr.msrb.gmra.mxu1 %vm335_vm7, %v4018_v12  ;;  %v770_v12 = vsel %vm391_vm9, 0, %v4101_v21  ;;  %v671_v47 = vsel %vm335_vm7, 0, %v4101_v21  ;;  %v721_v45 = vsel %vm388_vm11, 0, %v4101_v21 }
 0x34d   :  { %v433_v24 = vmul.f32 0.35355338, %v424_v23  ;;  %v474_v27 = vpop.f32.mrf.mxu2  ;;  %v780_v42 = vrot.slane %v770_v12, 4  ;;  %v673_v57 = vsel %vm388_vm11, %v671_v47, 0 }
 0x34e   :  { %v483_v28 = vmul.f32 0.35355338, %v474_v27  ;;  %v675_v6 = vsel %vm391_vm9, %v673_v57, 0 }
 0x34f   :  { %v4107_v29 = vadd.f32 %v433_v24, %v4081_v0  ;;  %v774_v46 = vrot.slane %v675_v6, 4 }
 0x350   :  { %v4110_v30 = vadd.f32 %v483_v28, %v4081_v0 }
 0x351   :  { %v799_v32 = vsel %vm391_vm9, %v4107_v29, -inf }
 0x352   :  { %800 = vmax.xlane.f32.xlu1 %v799_v32  ;;  %v808_v34 = vsel %vm391_vm9, %v4110_v30, -inf  ;;  %v729_v35 = vpop.permute.xlu1 %728  ;;  %v443_v32 = vsel %vm391_vm9, %v441_v53, 0 }
 0x353   :  { %809 = vmax.xlane.f32.xlu2 %v808_v34  ;;  %v617_v37 = vpop.permute.xlu0 %616  ;;  %3282 = vmatmul.msk.bf16.gmra.mxu2 %vm335_vm7, %v680_v5  ;;  %v619_v34 = vsel %vm335_vm7, %v4101_v21, 0 }
 0x354   :  { %v4119_v38 = vpop.f32.mrf.mxu3  ;;  %3284 = vmatmul.msk.bf16.gmra.mxu3 %vm335_vm7, %v729_v35  ;;  %v771_v39 = vsel %vm391_vm9, 0, %v617_v37  ;;  %v722_v44 = vsel %vm388_vm11, 0, %v617_v37  ;;  %v672_v36 = vsel %vm335_vm7, 0, %v617_v37  ;;  %v621_v7 = vsel %vm335_vm7, %v617_v37, 0 }
 0x355   :  { %v4125_v58 = vpop.f32.mrf.mxu2  ;;  %v781_v43 = vrot.slane %v771_v39, 4  ;;  %v725_v50 = vsel %vm391_vm9, %v722_v44, 0  ;;  %v674_v48 = vsel %vm388_vm11, %v672_v36, 0  ;;  %v623_v13 = vsel %vm388_vm11, %v621_v7, 0 }
 0x356   :  { %v788_v41 = vsel %vm543_vm10, %v725_v50, %v780_v42  ;;  %v676_v63 = vsel %vm391_vm9, %v674_v48, 0  ;;  %v626_v27 = vsel %vm391_vm9, %v623_v13, 0  ;;  %v389_v48 = vsel %vm388_vm11, %v385_v54, 0 }
 0x357   :  { %v782_v49 = vsel %vm543_vm10, %v780_v42, %v781_v43  ;;  %v775_v9 = vrot.slane %v676_v63, 4  ;;  %v785_v39 = vsel %vm543_vm10, %v626_v27, %v774_v46  ;;  %v544_v42 = vrot.slane %v443_v32, 4 }
 0x358   :  { %1224 = vmatpush.bf16.msra.mxu0 %v782_v49  ;;  %v622_v43 = vsel %vm388_vm11, %v619_v34, 0  ;;  %v434_v6 = vmul.f32 0.35355338, %v4119_v38 }
 0x359   :  { %v776_v17 = vsel %vm543_vm10, %v774_v46, %v775_v9  ;;  %v624_v49 = vsel %vm391_vm9, %v622_v43, 0 }
 0x35a   :  { %v382_v31 = vpop.permute.xlu1 %381 }
 0x35b   :  { %3280 = vmatmul.msk.bf16.gmra.mxu0 %vm335_vm7, %v630_v19  ;;  %v540_v55 = vsel %vm391_vm9, 0, %v382_v31  ;;  %v490_v52 = vsel %vm388_vm11, 0, %v382_v31  ;;  %v440_v2 = vsel %vm335_vm7, 0, %v382_v31  ;;  %v489_v19 = vsel %vm388_vm11, 0, %v4123_v40 }
 0x35c   :  { %v4140_v61 = vpop.f32.mrf.mxu3  ;;  %3278 = vmatmul.msk.bf16.gmra.mxu1 %vm335_vm7, %v4030_v20  ;;  %1225 = vmatpush.bf16.msra.mxu0 %v788_v41  ;;  %v551_v62 = vrot.slane %v540_v55, 4  ;;  %v723_v20 = vsel %vm391_vm9, %v721_v45, 0  ;;  %v493_v8 = vsel %vm391_vm9, %v490_v52, 0  ;;  %v442_v11 = vsel %vm388_vm11, %v440_v2, 0 }
 0x35d   :  { %v4148_v1 = vpop.f32.mrf.mxu2  ;;  %v559_v15 = vsel %vm543_vm10, %v493_v8, %v550_v56  ;;  %v444_v23 = vsel %vm391_vm9, %v442_v11, 0  ;;  %v387_v35 = vsel %vm335_vm7, %v382_v31, 0  ;;  %v491_v12 = vsel %vm391_vm9, %v489_v19, 0 }
 0x35e   :  { %v552_v5 = vsel %vm543_vm10, %v550_v56, %v551_v62  ;;  %v545_v37 = vrot.slane %v444_v23, 4  ;;  %v390_v44 = vsel %vm388_vm11, %v387_v35, 0  ;;  %v392_v31 = vsel %vm391_vm9, %v389_v48, 0 }
 0x35f   :  { %1144 = vmatpush.bf16.msra.mxu1 %v552_v5  ;;  %v394_v21 = vsel %vm391_vm9, %v390_v44, 0  ;;  %v435_v23 = vmul.f32 0.35355338, %v4140_v61 }
 0x360   :  { %1226 = vmatpush.bf16.msra.mxu0 %v723_v20  ;;  %v546_v36 = vsel %vm543_vm10, %v544_v42, %v545_v37  ;;  %v556_v47 = vsel %vm543_vm10, %v394_v21, %v544_v42  ;;  %v484_v20 = vmul.f32 0.35355338, %v4125_v58 }
 0x361   :  { %v4223_v37 = vadd.f32 %v435_v23, %v4081_v0 }
 0x362   :  { %v4205_v38 = vadd.f32 %v484_v20, %v4081_v0 }
 0x363   :  { %1145 = vmatpush.bf16.msra.mxu1 %v559_v15  ;;  %v4202_v15 = vadd.f32 %v434_v6, %v4081_v0  ;;  %v805_v21 = vsel %vm391_vm9, %v4223_v37, -inf }
 0x364   :  { %v431_v24 = vpop.f32.mrf.mxu3  ;;  %1227 = vmatpush.bf16.msra.mxu0 %v776_v17  ;;  %v811_v27 = vsel %vm391_vm9, %v4205_v38, -inf }
 0x365   :  { %v481_v28 = vpop.f32.mrf.mxu2  ;;  %v802_v17 = vsel %vm391_vm9, %v4202_v15, -inf }
 0x367   :  { %1146 = vmatpush.bf16.msra.mxu1 %v491_v12 }
 0x368   :  { %1228 = vmatpush.bf16.msra.mxu0 %v785_v39 }
 0x36b   :  { %1147 = vmatpush.bf16.msra.mxu1 %v546_v36  ;;  %v485_v36 = vmul.f32 0.35355338, %v4148_v1 }
 0x36c   :  { %v4178_v50 = vpop.f32.mrf.mxu3  ;;  %1229 = vmatpush.bf16.msra.mxu0 %v624_v49 }
 0x36d   :  { %v532_v1 = vmul.f32 0.35355338, %v4178_v50 }
 0x36f   :  { %1148 = vmatpush.bf16.msra.mxu1 %v556_v47  ;;  %v4255_v50 = vadd.f32 %v532_v1, %v4081_v0 }
 0x373   :  { %1149 = vmatpush.bf16.msra.mxu1 %v392_v31 }
 0x374   :  { %v525_v41 = vpop.f32.mrf.mxu3 }
 0x375   :  { %v533_v39 = vmul.f32 0.35355338, %v525_v41 }
 0x377   :  { %v4236_v41 = vadd.f32 %v533_v39, %v4081_v0 }
 0x37c   :  { %v528_v55 = vpop.f32.mrf.mxu3 }
 0x37d   :  { %v534_v6 = vmul.f32 0.35355338, %v528_v55 }
 0x384   :  { %v530_v56 = vpop.f32.mrf.mxu3 }
 0x3ae   :  { %v4185_v57 = vpop.f32.mrf.mxu3 }
 0x3b5   :  { %v792_v48 = vpop.xlane.xlu1 %791 }
 0x3b6   :  { %v757_v10 = vpop.f32.mrf.mxu3 }
 0x3c5   :  { %v801_v20 = vpop.xlane.xlu1 %800 }
 0x3c6   :  { %v4187_v62 = vpop.f32.mrf.mxu2 }
 0x3c7   :  { %v715_v55 = vmul.f32 0.35355338, %v4187_v62 }
 0x3c8   :  { %v656_v45 = vpop.f32.mrf.mxu0 }
 0x3c9   :  { %v592_v52 = vpop.f32.mrf.mxu1  ;;  %v665_v63 = vmul.f32 0.35355338, %v656_v45  ;;  %v4242_v45 = vadd.f32 %v485_v36, %v4081_v0 }
 0x3ca   :  { %v601_v2 = vmul.f32 0.35355338, %v592_v52 }
 0x3cb   :  { %v4190_v40 = vadd.f32 %v665_v63, %v4081_v0  ;;  %v820_v63 = vsel %vm391_vm9, %v4236_v41, -inf }
 0x3cc   :  { %v4193_v5 = vadd.f32 %v601_v2, %v4081_v0 }
 0x3cd   :  { %v835_v7 = vsel %vm391_vm9, %v4190_v40, -inf }
 0x3ce   :  { %836 = vmax.xlane.f32.xlu0 %v835_v7  ;;  %v708_v8 = vpop.f32.mrf.mxu2  ;;  %v826_v9 = vsel %vm391_vm9, %v4193_v5, -inf  ;;  %v814_v7 = vsel %vm391_vm9, %v4242_v45, -inf }
 0x3cf   :  { %827 = vmax.xlane.f32.xlu1 %v826_v9  ;;  %v716_v52 = vmul.f32 0.35355338, %v708_v8  ;;  %v4258_v8 = vadd.f32 %v534_v6, %v4081_v0 }
 0x3d0   :  { %v658_v11 = vpop.f32.mrf.mxu0 }
 0x3d1   :  { %v594_v46 = vpop.f32.mrf.mxu1  ;;  %v666_v13 = vmul.f32 0.35355338, %v658_v11  ;;  %v4252_v9 = vadd.f32 %v716_v52, %v4081_v0  ;;  %v865_v11 = vsub.f32 %v4107_v29, %v801_v20  ;;  %v4272_v29 = vadd.f32 %v715_v55, %v4081_v0 }
 0x3d2   :  { %v602_v58 = vmul.f32 0.35355338, %v594_v46  ;;  %v765_v46 = vmul.f32 0.35355338, %v757_v10  ;;  %v764_v10 = vmul.f32 0.35355338, %v4185_v57 }
 0x3d3   :  { %v4208_v53 = vadd.f32 %v666_v13, %v4081_v0  ;;  %v847_v13 = vsel %vm391_vm9, %v4252_v9, -inf  ;;  %v892_v23 = vmul.f32 1.442695, %v865_v11 }
 0x3d4   :  { %v4220_v12 = vadd.f32 %v602_v58, %v4081_v0  ;;  %v817_v58 = vsel %vm391_vm9, %v4255_v50, -inf }
 0x3d5   :  { %v838_v19 = vsel %vm391_vm9, %v4208_v53, -inf  ;;  %3500 = vpow2.f32 %v892_v23 }
 0x3d6   :  { %803 = vmax.xlane.f32.xlu0 %v802_v17  ;;  %839 = vmax.xlane.f32.xlu2 %v838_v19  ;;  %v711_v24 = vpop.f32.mrf.mxu2  ;;  %v829_v44 = vsel %vm391_vm9, %v4220_v12, -inf  ;;  %v823_v19 = vsel %vm391_vm9, %v4258_v8, -inf }
 0x3d7   :  { %v4217_v28 = vpop.f32.mrf.mxu3  ;;  %812 = vmax.xlane.f32.xlu1 %v811_v27  ;;  %v717_v17 = vmul.f32 0.35355338, %v711_v24  ;;  %v4269_v27 = vadd.f32 %v765_v46, %v4081_v0 }
 0x3d8   :  { %v661_v32 = vpop.f32.mrf.mxu0  ;;  %v766_v57 = vmul.f32 0.35355338, %v4217_v28 }
 0x3d9   :  { %v597_v34 = vpop.f32.mrf.mxu1  ;;  %v667_v35 = vmul.f32 0.35355338, %v661_v32  ;;  %v4275_v62 = vadd.f32 %v717_v17, %v4081_v0  ;;  %v856_v24 = vsel %vm391_vm9, %v4269_v27, -inf  ;;  %v844_v32 = vsel %vm391_vm9, %v4272_v29, -inf }
 0x3da   :  { %v603_v42 = vmul.f32 0.35355338, %v597_v34 }
 0x3db   :  { %v4226_v61 = vadd.f32 %v667_v35, %v4081_v0  ;;  %v850_v34 = vsel %vm391_vm9, %v4275_v62, -inf  ;;  %v4285_v35 = vadd.f32 %v764_v10, %v4081_v0  ;;  %v4287_v39 = vpop.eup %3500 }
 0x3dc   :  { %v4239_v56 = vadd.f32 %v603_v42, %v4081_v0  ;;  %v862_v42 = vsub.f32 %v4087_v4, %v792_v48 }
 0x3dd   :  { %v841_v43 = vsel %vm391_vm9, %v4226_v61, -inf }
 0x3de   :  { %842 = vmax.xlane.f32.xlu2 %v841_v43  ;;  %v713_v49 = vpop.f32.mrf.mxu2  ;;  %830 = vmax.xlane.f32.xlu0 %v829_v44  ;;  %v832_v2 = vsel %vm391_vm9, %v4239_v56, -inf  ;;  %v943_v43 = vsel %vm391_vm9, %v4287_v39, 0.0  ;;  %v853_v44 = vsel %vm391_vm9, %v4285_v35, -inf  ;;  %v886_v36 = vmul.f32 1.442695, %v862_v42 }
 0x3df   :  { %v762_v54 = vpop.f32.mrf.mxu3  ;;  %806 = vmax.xlane.f32.xlu1 %v805_v21  ;;  %v798_v49 = vpop.xlane.xlu2 %797  ;;  %v4296_v21 = vadd.f32 %v766_v57, %v4081_v0 }
 0x3e0   :  { %v663_v47 = vpop.f32.mrf.mxu0  ;;  %v864_v54 = vsub.f32 %v4084_v3, %v798_v49  ;;  %3502 = vpow2.f32 %v886_v36 }
 0x3e1   :  { %v599_v31 = vpop.f32.mrf.mxu1  ;;  %v859_v4 = vsel %vm391_vm9, %v4296_v21, -inf  ;;  %v795_v47 = vpop.xlane.xlu0 %794 }
 0x3e2   :  { %v890_v28 = vmul.f32 1.442695, %v864_v54  ;;  %v863_v31 = vsub.f32 %v4097_v16, %v795_v47 }
 0x3e4   :  { %3504 = vpow2.f32 %v890_v28  ;;  %v888_v52 = vmul.f32 1.442695, %v863_v31 }
 0x3e6   :  { %821 = vmax.xlane.f32.xlu2 %v820_v63  ;;  %833 = vmax.xlane.f32.xlu0 %v832_v2  ;;  %v4301_v48 = vpop.eup %3502  ;;  %3506 = vpow2.f32 %v888_v52 }
 0x3e7   :  { %815 = vmax.xlane.f32.xlu1 %v814_v7  ;;  %v934_v1 = vsel %vm391_vm9, %v4301_v48, 0.0  ;;  %v810_v63 = vpop.xlane.xlu2 %809 }
 0x3e8   :  { %v868_v3 = vsub.f32 %v4110_v30, %v810_v63 }
 0x3ea   :  { %v4306_v2 = vpop.eup %3504  ;;  %v898_v7 = vmul.f32 1.442695, %v868_v3 }
 0x3eb   :  { %v940_v6 = vsel %vm391_vm9, %v4306_v2, 0.0 }
 0x3ec   :  { %v4311_v20 = vpop.eup %3506  ;;  %3508 = vpow2.f32 %v898_v7 }
 0x3ed   :  { %v937_v16 = vsel %vm391_vm9, %v4311_v20, 0.0 }
 0x3ee   :  { %848 = vmax.xlane.f32.xlu2 %v847_v13  ;;  %818 = vmax.xlane.f32.xlu0 %v817_v58 }
 0x3ef   :  { %824 = vmax.xlane.f32.xlu1 %v823_v19 }
 0x3f2   :  { %v4315_v11 = vpop.eup %3508 }
 0x3f3   :  { %v952_v46 = vsel %vm391_vm9, %v4315_v11, 0.0 }
 0x3f6   :  { %857 = vmax.xlane.f32.xlu2 %v856_v24  ;;  %845 = vmax.xlane.f32.xlu0 %v844_v32 }
 0x3f7   :  { %851 = vmax.xlane.f32.xlu1 %v850_v34 }
 0x3fe   :  { %944 = vadd.xlane.f32.xlu2 %v943_v43  ;;  %854 = vmax.xlane.f32.xlu0 %v853_v44 }
 0x406   :  { %860 = vmax.xlane.f32.xlu0 %v859_v4 }
 0x40e   :  { %935 = vadd.xlane.f32.xlu0 %v934_v1 }
 0x416   :  { %941 = vadd.xlane.f32.xlu0 %v940_v6 }
 0x41e   :  { %938 = vadd.xlane.f32.xlu0 %v937_v16 }
 0x426   :  { %953 = vadd.xlane.f32.xlu0 %v952_v46 }
 0x441   :  { %v837_v55 = vpop.xlane.xlu0 %836 }
 0x442   :  { %v828_v30 = vpop.xlane.xlu1 %827  ;;  %v877_v13 = vsub.f32 %v4190_v40, %v837_v55 }
 0x443   :  { %v874_v58 = vsub.f32 %v4193_v5, %v828_v30 }
 0x444   :  { %v916_v17 = vmul.f32 1.442695, %v877_v13 }
 0x445   :  { %v910_v19 = vmul.f32 1.442695, %v874_v58 }
 0x446   :  { %3510 = vpow2.f32 %v916_v17 }
 0x447   :  { %3512 = vpow2.f32 %v910_v19 }
 0x449   :  { %v840_v23 = vpop.xlane.xlu2 %839  ;;  %v804_v10 = vpop.xlane.xlu0 %803 }
 0x44a   :  { %v878_v24 = vsub.f32 %v4208_v53, %v840_v23  ;;  %v813_v32 = vpop.xlane.xlu1 %812  ;;  %v866_v34 = vsub.f32 %v4202_v15, %v804_v10 }
 0x44b   :  { %v869_v42 = vsub.f32 %v4205_v38, %v813_v32 }
 0x44c   :  { %v4324_v57 = vpop.eup %3510  ;;  %v918_v43 = vmul.f32 1.442695, %v878_v24  ;;  %v894_v44 = vmul.f32 1.442695, %v866_v34 }
 0x44d   :  { %v4326_v40 = vpop.eup %3512  ;;  %v900_v5 = vmul.f32 1.442695, %v869_v42  ;;  %v979_v36 = vsel %vm391_vm9, %v4324_v57, 0.0 }
 0x44e   :  { %3514 = vpow2.f32 %v918_v43  ;;  %v970_v49 = vsel %vm391_vm9, %v4326_v40, 0.0  ;;  %980 = vadd.xlane.f32.xlu1 %v979_v36 }
 0x44f   :  { %3516 = vpow2.f32 %v900_v5  ;;  %971 = vadd.xlane.f32.xlu2 %v970_v49 }
 0x450   :  { %3518 = vpow2.f32 %v894_v44 }
 0x451   :  { %v843_v15 = vpop.xlane.xlu2 %842  ;;  %v4332_v38 = vpop.xlane.xlu0 %830 }
 0x452   :  { %v807_v53 = vpop.xlane.xlu1 %806  ;;  %v879_v30 = vsub.f32 %v4226_v61, %v843_v15 }
 0x453   :  { %v867_v54 = vsub.f32 %v4223_v37, %v807_v53 }
 0x454   :  { %v4335_v4 = vpop.eup %3514  ;;  %v920_v17 = vmul.f32 1.442695, %v879_v30 }
 0x455   :  { %v4337_v28 = vpop.eup %3516  ;;  %v896_v47 = vmul.f32 1.442695, %v867_v54  ;;  %v982_v31 = vsel %vm391_vm9, %v4335_v4, 0.0 }
 0x456   :  { %v4341_v1 = vpop.eup %3518  ;;  %v955_v52 = vsel %vm391_vm9, %v4337_v28, 0.0  ;;  %983 = vadd.xlane.f32.xlu0 %v982_v31 }
 0x457   :  { %3520 = vpow2.f32 %v896_v47  ;;  %956 = vadd.xlane.f32.xlu2 %v955_v52  ;;  %v946_v63 = vsel %vm391_vm9, %v4341_v1, 0.0 }
 0x458   :  { %947 = vadd.xlane.f32.xlu1 %v946_v63 }
 0x459   :  { %v822_v37 = vpop.xlane.xlu2 %821  ;;  %v4347_v3 = vpop.xlane.xlu0 %833 }
 0x45a   :  { %v872_v6 = vsub.f32 %v4236_v41, %v822_v37  ;;  %v816_v7 = vpop.xlane.xlu1 %815 }
 0x45b   :  { %v870_v16 = vsub.f32 %v4242_v45, %v816_v7 }
 0x45c   :  { %v906_v46 = vmul.f32 1.442695, %v872_v6 }
 0x45d   :  { %v4351_v55 = vpop.eup %3520  ;;  %v902_v13 = vmul.f32 1.442695, %v870_v16 }
 0x45e   :  { %3522 = vpow2.f32 %v906_v46  ;;  %v949_v58 = vsel %vm391_vm9, %v4351_v55, 0.0 }
 0x45f   :  { %3524 = vpow2.f32 %v902_v13  ;;  %950 = vadd.xlane.f32.xlu2 %v949_v58 }
 0x460   :  { %3526 = vpow2.f32 %v920_v17 }
 0x461   :  { %v849_v19 = vpop.xlane.xlu2 %848  ;;  %v819_v23 = vpop.xlane.xlu0 %818 }
 0x462   :  { %v881_v41 = vsub.f32 %v4252_v9, %v849_v19  ;;  %v825_v10 = vpop.xlane.xlu1 %824  ;;  %v871_v45 = vsub.f32 %v4255_v50, %v819_v23 }
 0x463   :  { %v873_v42 = vsub.f32 %v4258_v8, %v825_v10 }
 0x464   :  { %v4358_v24 = vpop.eup %3522  ;;  %v924_v32 = vmul.f32 1.442695, %v881_v41  ;;  %v904_v34 = vmul.f32 1.442695, %v871_v45 }
 0x465   :  { %v4360_v61 = vpop.eup %3524  ;;  %v964_v43 = vsel %vm391_vm9, %v4358_v24, 0.0  ;;  %v908_v9 = vmul.f32 1.442695, %v873_v42 }
 0x466   :  { %3528 = vpow2.f32 %v924_v32  ;;  %v958_v44 = vsel %vm391_vm9, %v4360_v61, 0.0  ;;  %965 = vadd.xlane.f32.xlu0 %v964_v43  ;;  %v4369_v15 = vpop.eup %3526 }
 0x467   :  { %959 = vadd.xlane.f32.xlu2 %v958_v44  ;;  %3530 = vpow2.f32 %v904_v34 }
 0x468   :  { %3532 = vpow2.f32 %v908_v9 }
 0x469   :  { %v858_v50 = vpop.xlane.xlu2 %857  ;;  %v846_v5 = vpop.xlane.xlu0 %845 }
 0x46a   :  { %v884_v36 = vsub.f32 %v4269_v27, %v858_v50  ;;  %v880_v49 = vsub.f32 %v4272_v29, %v846_v5  ;;  %v852_v8 = vpop.xlane.xlu1 %851  ;;  %v985_v27 = vsel %vm391_vm9, %v4369_v15, 0.0 }
 0x46b   :  { %v882_v63 = vsub.f32 %v4275_v62, %v852_v8 }
 0x46c   :  { %v4371_v53 = vpop.eup %3528  ;;  %v930_v54 = vmul.f32 1.442695, %v884_v36  ;;  %v922_v47 = vmul.f32 1.442695, %v880_v49 }
 0x46d   :  { %v991_v31 = vsel %vm391_vm9, %v4371_v53, 0.0  ;;  %v4375_v52 = vpop.eup %3530  ;;  %v926_v6 = vmul.f32 1.442695, %v882_v63 }
 0x46e   :  { %3534 = vpow2.f32 %v930_v54  ;;  %992 = vadd.xlane.f32.xlu0 %v991_v31  ;;  %v961_v29 = vsel %vm391_vm9, %v4375_v52, 0.0  ;;  %v4382_v7 = vpop.eup %3532 }
 0x46f   :  { %986 = vadd.xlane.f32.xlu2 %v985_v27  ;;  %3536 = vpow2.f32 %v922_v47  ;;  %962 = vadd.xlane.f32.xlu1 %v961_v29  ;;  %v967_v13 = vsel %vm391_vm9, %v4382_v7, 0.0 }
 0x470   :  { %3538 = vpow2.f32 %v926_v6 }
 0x471   :  { %v855_v37 = vpop.xlane.xlu0 %854  ;;  %v945_v9 = vpop.xlane.xlu2 %944 }
 0x472   :  { %v883_v46 = vsub.f32 %v4285_v35, %v855_v37 }
 0x474   :  { %v4384_v16 = vpop.eup %3534  ;;  %v928_v17 = vmul.f32 1.442695, %v883_v46 }
 0x475   :  { %v1000_v62 = vsel %vm391_vm9, %v4384_v16, 0.0  ;;  %v4389_v30 = vpop.eup %3536 }
 0x476   :  { %1001 = vadd.xlane.f32.xlu0 %v1000_v62  ;;  %v988_v58 = vsel %vm391_vm9, %v4389_v30, 0.0  ;;  %v4396_v35 = vpop.eup %3538  ;;  %3540 = vpow2.f32 %v928_v17 }
 0x477   :  { %968 = vadd.xlane.f32.xlu2 %v967_v13  ;;  %989 = vadd.xlane.f32.xlu1 %v988_v58  ;;  %v994_v10 = vsel %vm391_vm9, %v4396_v35, 0.0 }
 0x479   :  { %v861_v19 = vpop.xlane.xlu0 %860 }
 0x47a   :  { %v885_v23 = vsub.f32 %v4296_v21, %v861_v19 }
 0x47c   :  { %v932_v41 = vmul.f32 1.442695, %v885_v23  ;;  %v4400_v45 = vpop.eup %3540 }
 0x47d   :  { %v997_v21 = vsel %vm391_vm9, %v4400_v45, 0.0 }
 0x47e   :  { %3542 = vpow2.f32 %v932_v41 }
 0x47f   :  { %995 = vadd.xlane.f32.xlu1 %v994_v10 }
 0x481   :  { %v4408_v42 = vpop.xlane.xlu0 %935 }
 0x484   :  { %v4402_v32 = vpop.eup %3542 }
 0x485   :  { %v1003_v34 = vsel %vm391_vm9, %v4402_v32, 0.0 }
 0x486   :  { %1004 = vadd.xlane.f32.xlu0 %v1003_v34 }
 0x487   :  { %998 = vadd.xlane.f32.xlu1 %v997_v21 }
 0x489   :  { %v4410_v43 = vpop.xlane.xlu0 %941 }
 0x491   :  { %v4412_v44 = vpop.xlane.xlu0 %938 }
 0x499   :  { %v954_v50 = vpop.xlane.xlu0 %953 }
 0x49a   :  { %3544 = vrcp.f32 %v954_v50 }
 0x49b   :  { %3546 = vrcp.f32 %v945_v9 }
 0x4a0   :  { %v3545_v54 = vpop.eup %3544 }
 0x4a1   :  { %v3547_v31 = vpop.eup %3546  ;;  %v1036_v63 = vmul.f32 %v3545_v54, %v4315_v11 }
 0x4a2   :  { %v1033_v27 = vmul.f32 %v3547_v31, %v4287_v39 }
 0x4a3   :  { %v1060_v13 = vpack.c.bf16 %v1036_v63, %v1036_v63 }
 0x4a4   :  { %v1057_v19 = vpack.c.bf16 %v1033_v27, %v1033_v27 }
 0x4a5   :  { %v1101_v34 = vunpack.c.l.b16 %v1060_v13 }
 0x4a6   :  { %v1089_v21 = vunpack.c.l.b16 %v1057_v19 }
 0x4c1   :  { %v981_v5 = vpop.xlane.xlu1 %980 }
 0x4c2   :  { %v4414_v36 = vpop.xlane.xlu2 %971 }
 0x4c9   :  { %v984_v49 = vpop.xlane.xlu0 %983 }
 0x4ca   :  { %v957_v8 = vpop.xlane.xlu2 %956  ;;  %3548 = vrcp.f32 %v984_v49 }
 0x4cb   :  { %3550 = vrcp.f32 %v957_v8  ;;  %v948_v47 = vpop.xlane.xlu1 %947 }
 0x4cc   :  { %3552 = vrcp.f32 %v948_v47 }
 0x4cd   :  { %3554 = vrcp.f32 %v981_v5 }
 0x4d0   :  { %v3549_v29 = vpop.eup %3548 }
 0x4d1   :  { %v3551_v37 = vpop.eup %3550  ;;  %v1046_v41 = vmul.f32 %v3549_v29, %v4335_v4 }
 0x4d2   :  { %v3553_v6 = vpop.eup %3552  ;;  %v951_v46 = vpop.xlane.xlu2 %950  ;;  %v1037_v62 = vmul.f32 %v3551_v37, %v4337_v28 }
 0x4d3   :  { %v3555_v58 = vpop.eup %3554  ;;  %3556 = vrcp.f32 %v951_v46  ;;  %v1034_v17 = vmul.f32 %v3553_v6, %v4341_v1  ;;  %v1070_v5 = vpack.c.bf16 %v1046_v41, %v1046_v41 }
 0x4d4   :  { %v1061_v23 = vpack.c.bf16 %v1037_v62, %v1037_v62  ;;  %v1045_v39 = vmul.f32 %v3555_v58, %v4324_v57 }
 0x4d5   :  { %v1058_v10 = vpack.c.bf16 %v1034_v17, %v1034_v17  ;;  %v1172_v57 = vunpack.c.l.b16 %v1070_v5 }
 0x4d6   :  { %v1102_v11 = vunpack.c.l.b16 %v1061_v23  ;;  %v1069_v54 = vpack.c.bf16 %v1045_v39, %v1045_v39 }
 0x4d7   :  { %v1090_v9 = vunpack.c.l.b16 %v1058_v10 }
 0x4d8   :  { %v1104_v50 = vpack.c.b16 %v1102_v11, %v1101_v34  ;;  %v1171_v63 = vunpack.c.l.b16 %v1069_v54 }
 0x4d9   :  { %v3557_v49 = vpop.eup %3556  ;;  %v1092_v28 = vpack.c.b16 %v1090_v9, %v1089_v21  ;;  %v966_v4 = vpop.xlane.xlu0 %965 }
 0x4da   :  { %v960_v8 = vpop.xlane.xlu2 %959  ;;  %1106 = vrot.lane.b32.xlu2 %v1104_v50, %s3792_s22  ;;  %v1035_v1 = vmul.f32 %v3557_v49, %v4351_v55  ;;  %v1174_v29 = vpack.c.b16 %v1172_v57, %v1171_v63 }
 0x4db   :  { %3558 = vrcp.f32 %v960_v8  ;;  %1094 = vrot.lane.b32.xlu0 %v1092_v28, %s3793_s23 }
 0x4dc   :  { %v1059_v47 = vpack.c.bf16 %v1035_v1, %v1035_v1  ;;  %3560 = vrcp.f32 %v966_v4  ;;  %v876_v4 = vsub.f32 %v4239_v56, %v4347_v3 }
 0x4de   :  { %v1091_v31 = vunpack.c.l.b16 %v1059_v47  ;;  %v914_v57 = vmul.f32 1.442695, %v876_v4 }
 0x4e0   :  { %v1093_v27 = vpack.c.b16 %v1091_v31, %v1091_v31 }
 0x4e1   :  { %v3559_v37 = vpop.eup %3558  ;;  %v993_v23 = vpop.xlane.xlu0 %992 }
 0x4e2   :  { %v987_v6 = vpop.xlane.xlu2 %986  ;;  %1176 = vrot.lane.b32.xlu2 %v1174_v29, %s3793_s23  ;;  %v1038_v46 = vmul.f32 %v3559_v37, %v4360_v61  ;;  %v963_v55 = vpop.xlane.xlu1 %962 }
 0x4e3   :  { %1096 = vrot.lane.b32.xlu0 %v1093_v27, %s3793_s23  ;;  %v3561_v62 = vpop.eup %3560  ;;  %3562 = vrcp.f32 %v963_v55 }
 0x4e4   :  { %v1062_v13 = vpack.c.bf16 %v1038_v46, %v1038_v46  ;;  %v1040_v17 = vmul.f32 %v3561_v62, %v4358_v24 }
 0x4e6   :  { %v1103_v58 = vunpack.c.l.b16 %v1062_v13  ;;  %v1064_v61 = vpack.c.bf16 %v1040_v17, %v1040_v17  ;;  %v875_v17 = vsub.f32 %v4220_v12, %v4332_v38 }
 0x4e8   :  { %v1105_v19 = vpack.c.b16 %v1103_v58, %v1103_v58  ;;  %v1114_v9 = vunpack.c.l.b16 %v1064_v61 }
 0x4e9   :  { %v3563_v41 = vpop.eup %3562  ;;  %v1002_v28 = vpop.xlane.xlu0 %1001 }
 0x4ea   :  { %v969_v10 = vpop.xlane.xlu2 %968  ;;  %v990_v34 = vpop.xlane.xlu1 %989  ;;  %v1039_v11 = vmul.f32 %v3563_v41, %v4375_v52 }
 0x4eb   :  { %3564 = vrcp.f32 %v969_v10  ;;  %1108 = vrot.lane.b32.xlu0 %v1105_v19, %s3792_s22 }
 0x4ec   :  { %v1063_v39 = vpack.c.bf16 %v1039_v11, %v1039_v11  ;;  %3566 = vrcp.f32 %v1002_v28 }
 0x4ed   :  { %3568 = vrcp.f32 %v987_v6 }
 0x4ee   :  { %v1113_v21 = vunpack.c.l.b16 %v1063_v39 }
 0x4f0   :  { %v1116_v5 = vpack.c.b16 %v1114_v9, %v1113_v21 }
 0x4f1   :  { %v3565_v50 = vpop.eup %3564 }
 0x4f2   :  { %v1041_v49 = vmul.f32 %v3565_v50, %v4382_v7  ;;  %v996_v24 = vpop.xlane.xlu1 %995  ;;  %1118 = vrot.lane.b32.xlu1 %v1116_v5, %s3784_s15  ;;  %v3567_v47 = vpop.eup %3566 }
 0x4f3   :  { %v1052_v7 = vmul.f32 %v3567_v47, %v4384_v16  ;;  %v3569_v31 = vpop.eup %3568 }
 0x4f4   :  { %v1065_v8 = vpack.c.bf16 %v1041_v49, %v1041_v49  ;;  %v1047_v56 = vmul.f32 %v3569_v31, %v4369_v15  ;;  %v912_v15 = vmul.f32 1.442695, %v875_v17 }
 0x4f5   :  { %v1076_v37 = vpack.c.bf16 %v1052_v7, %v1052_v7 }
 0x4f6   :  { %v1115_v1 = vunpack.c.l.b16 %v1065_v8  ;;  %v1071_v13 = vpack.c.bf16 %v1047_v56, %v1047_v56 }
 0x4f7   :  { %v1196_v55 = vunpack.c.l.b16 %v1076_v37 }
 0x4f8   :  { %v1117_v54 = vpack.c.b16 %v1115_v1, %v1115_v1 }
 0x4f9   :  { %v1005_v63 = vpop.xlane.xlu0 %1004 }
 0x4fa   :  { %1120 = vrot.lane.b32.xlu0 %v1117_v54, %s3784_s15  ;;  %v999_v52 = vpop.xlane.xlu1 %998 }
 0x4fb   :  { %3570 = vrcp.f32 %v999_v52 }
 0x4fc   :  { %3572 = vpow2.f32 %v914_v57 }
 0x4fd   :  { %3574 = vrcp.f32 %v1005_v63 }
 0x4fe   :  { %3576 = vpow2.f32 %v912_v15 }
 0x4ff   :  { %3578 = vrcp.f32 %v990_v34 }
 0x500   :  { %3580 = vrcp.f32 %v993_v23 }
 0x501   :  { %v3571_v27 = vpop.eup %3570  ;;  %3582 = vrcp.f32 %v996_v24 }
 0x502   :  { %v1051_v29 = vmul.f32 %v3571_v27, %v4400_v45  ;;  %v4439_v3 = vpop.eup %3572  ;;  %v1173_v45 = vunpack.c.l.b16 %v1071_v13  ;;  %3584 = vrcp.f32 %v4412_v44 }
 0x503   :  { %v3575_v58 = vpop.eup %3574  ;;  %v976_v16 = vsel %vm391_vm9, %v4439_v3, 0.0  ;;  %3586 = vrcp.f32 %v4408_v42 }
 0x504   :  { %v1075_v46 = vpack.c.bf16 %v1051_v29, %v1051_v29  ;;  %v1053_v19 = vmul.f32 %v3575_v58, %v4402_v32  ;;  %v1175_v41 = vpack.c.b16 %v1173_v45, %v1173_v45  ;;  %v4448_v61 = vpop.eup %3576  ;;  %3588 = vrcp.f32 %v4410_v43 }
 0x505   :  { %v973_v12 = vsel %vm391_vm9, %v4448_v61, 0.0  ;;  %v3579_v38 = vpop.eup %3578  ;;  %3590 = vrcp.f32 %v4414_v36 }
 0x506   :  { %v1195_v6 = vunpack.c.l.b16 %v1075_v46  ;;  %v1077_v10 = vpack.c.bf16 %v1053_v19, %v1053_v19  ;;  %v3581_v32 = vpop.eup %3580  ;;  %v1048_v21 = vmul.f32 %v3579_v38, %v4389_v30 }
 0x507   :  { %v1049_v9 = vmul.f32 %v3581_v32, %v4371_v53  ;;  %v3583_v5 = vpop.eup %3582 }
 0x508   :  { %v1198_v62 = vpack.c.b16 %v1196_v55, %v1195_v6  ;;  %v1197_v11 = vunpack.c.l.b16 %v1077_v10  ;;  %v1072_v50 = vpack.c.bf16 %v1048_v21, %v1048_v21  ;;  %v1050_v8 = vmul.f32 %v3583_v5, %v4396_v35  ;;  %v3585_v53 = vpop.eup %3584 }
 0x509   :  { %v1073_v49 = vpack.c.bf16 %v1049_v9, %v1049_v9  ;;  %v3587_v30 = vpop.eup %3586  ;;  %v1031_v24 = vmul.f32 %v3585_v53, %v4311_v20  ;;  %v3442_v53 = vld [vmem:[%s5360_s1 + $0x28] sm:$0xff] }
 0x50a   :  { %1200 = vrot.lane.b32.xlu0 %v1198_v62, %s3784_s15  ;;  %v1199_v39 = vpack.c.b16 %v1197_v11, %v1197_v11  ;;  %v1183_v28 = vunpack.c.l.b16 %v1072_v50  ;;  %v1074_v4 = vpack.c.bf16 %v1050_v8, %v1050_v8  ;;  %v1030_v52 = vmul.f32 %v3587_v30, %v4301_v48  ;;  %v3589_v44 = vpop.eup %3588 }
 0x50b   :  { %977 = vadd.xlane.f32.xlu2 %v976_v16  ;;  %v1184_v1 = vunpack.c.l.b16 %v1073_v49  ;;  %v1055_v47 = vpack.c.bf16 %v1031_v24, %v1031_v24  ;;  %v1032_v48 = vmul.f32 %v3589_v44, %v4306_v2  ;;  %v3591_v45 = vpop.eup %3590 }
 0x50c   :  { %v1185_v34 = vunpack.c.l.b16 %v1074_v4  ;;  %v1054_v57 = vpack.c.bf16 %v1030_v52, %v1030_v52 }
 0x50d   :  { %v1186_v54 = vpack.c.b16 %v1184_v1, %v1183_v28  ;;  %v1082_v7 = vunpack.c.l.b16 %v1055_v47  ;;  %v1056_v56 = vpack.c.bf16 %v1032_v48, %v1032_v48 }
 0x50e   :  { %v1187_v23 = vpack.c.b16 %v1185_v34, %v1185_v34  ;;  %v1081_v31 = vunpack.c.l.b16 %v1054_v57 }
 0x50f   :  { %v1083_v6 = vunpack.c.l.b16 %v1056_v56 }
 0x510   :  { %v1084_v63 = vpack.c.b16 %v1082_v7, %v1081_v31 }
 0x511   :  { %v1085_v55 = vpack.c.b16 %v1083_v6, %v1083_v6 }
 0x512   :  { %1178 = vrot.lane.b32.xlu0 %v1175_v41, %s3793_s23  ;;  %v1042_v41 = vmul.f32 %v3591_v45, %v4326_v40 }
 0x51a   :  { %1202 = vrot.lane.b32.xlu0 %v1199_v39, %s3784_s15  ;;  %v1066_v39 = vpack.c.bf16 %v1042_v41, %v1042_v41 }
 0x51c   :  { %974 = vadd.xlane.f32.xlu1 %v973_v12  ;;  %v1163_v38 = vunpack.c.l.b16 %v1066_v39 }
 0x534   :  { %v1107_v42 = vpop.permute.xlu2 %1106 }
 0x535   :  { %1188 = vrot.lane.b32.xlu1 %v1186_v54, %s3792_s22 }
 0x53c   :  { %v1177_v17 = vpop.permute.xlu2 %1176 }
 0x53d   :  { %1190 = vrot.lane.b32.xlu1 %v1187_v23, %s3792_s22  ;;  %v3443_v23 = vld [vmem:[%s5360_s1 + $0x30] sm:$0xff] }
 0x53e   :  { %1270 = vmatpush.bf16.msrb.mxu2 %v3443_v23 }
 0x542   :  { %1271 = vmatpush.bf16.msrb.mxu2 %v3442_v53 }
 0x545   :  { %1295 = vrot.lane.b32.xlu1 %v3962_v26, %s3794_s24 }
 0x54d   :  { %v1095_v35 = vpop.permute.xlu0 %1094 }
 0x54e   :  { %v1124_v29 = vsel %vm391_vm9, %v1084_v63, %v1095_v35 }
 0x54f   :  { %v1129_v20 = vsel %vm52_vm0, %v1124_v29, %v1107_v42 }
 0x555   :  { %v1097_v27 = vpop.permute.xlu0 %1096 }
 0x556   :  { %v1127_v13 = vsel %vm391_vm9, %v1085_v55, %v1097_v27 }
 0x55d   :  { %v1109_v43 = vpop.permute.xlu0 %1108 }
 0x55e   :  { %v1131_v58 = vsel %vm52_vm0, %v1127_v13, %v1109_v43 }
 0x564   :  { %v1119_v37 = vpop.permute.xlu1 %1118 }
 0x565   :  { %v1134_v46 = vsel %vm1132_vm12, %v1129_v20, %v1119_v37 }
 0x566   :  { %3285 = vmatmul.msk.bf16.vlgmr.msra.gmra.mxu1 %vm1137_vm13, %v1134_v46 }
 0x56c   :  { %v1121_v62 = vpop.permute.xlu0 %1120 }
 0x56d   :  { %v1136_v16 = vsel %vm1132_vm12, %v1131_v58, %v1121_v62 }
 0x576   :  { %3286 = vmatmul.msk.bf16.gmra.mxu1 %vm1137_vm13, %v1136_v16 }
 0x57c   :  { %v1201_v26 = vpop.permute.xlu0 %1200 }
 0x57e   :  { %v978_v10 = vpop.xlane.xlu2 %977 }
 0x584   :  { %v1179_v28 = vpop.permute.xlu0 %1178 }
 0x58c   :  { %v1203_v34 = vpop.permute.xlu0 %1202 }
 0x58f   :  { %v975_v2 = vpop.xlane.xlu1 %974 }
 0x590   :  { %3592 = vrcp.f32 %v975_v2 }
 0x591   :  { %3594 = vrcp.f32 %v978_v10 }
 0x596   :  { %v3593_v19 = vpop.eup %3592 }
 0x597   :  { %v1043_v15 = vmul.f32 %v3593_v19, %v4448_v61  ;;  %v3595_v32 = vpop.eup %3594 }
 0x598   :  { %v1044_v36 = vmul.f32 %v3595_v32, %v4439_v3 }
 0x599   :  { %v1067_v11 = vpack.c.bf16 %v1043_v15, %v1043_v15 }
 0x59a   :  { %v1068_v49 = vpack.c.bf16 %v1044_v36, %v1044_v36 }
 0x59b   :  { %v1164_v12 = vunpack.c.l.b16 %v1067_v11 }
 0x59c   :  { %v1165_v40 = vunpack.c.l.b16 %v1068_v49 }
 0x59d   :  { %v1166_v21 = vpack.c.b16 %v1164_v12, %v1163_v38 }
 0x59e   :  { %v1167_v8 = vpack.c.b16 %v1165_v40, %v1165_v40 }
 0x59f   :  { %v1206_v9 = vsel %vm391_vm9, %v1166_v21, %v1177_v17 }
 0x5a0   :  { %v1209_v54 = vsel %vm391_vm9, %v1167_v8, %v1179_v28 }
 0x5a7   :  { %v1189_v50 = vpop.permute.xlu1 %1188 }
 0x5a8   :  { %v1211_v5 = vsel %vm52_vm0, %v1206_v9, %v1189_v50 }
 0x5a9   :  { %v1215_v61 = vsel %vm1132_vm12, %v1211_v5, %v1201_v26 }
 0x5aa   :  { %3287 = vmatmul.msk.bf16.vlgmr.msra.gmra.mxu0 %vm1137_vm13, %v1215_v61 }
 0x5af   :  { %v1191_v1 = vpop.permute.xlu1 %1190 }
 0x5b0   :  { %v1213_v4 = vsel %vm52_vm0, %v1209_v54, %v1191_v1 }
 0x5b1   :  { %v1217_v3 = vsel %vm1132_vm12, %v1213_v4, %v1203_v34 }
 0x5b7   :  { %v1296_v42 = vpop.permute.xlu1 %1295 }
 0x5ba   :  { %3288 = vmatmul.msk.bf16.gmra.mxu0 %vm1137_vm13, %v1217_v3 }
 0x5e3   :  { %v1151_v30 = vpop.f32.mrf.mxu1 }
 0x5eb   :  { %v1153_v24 = vpop.f32.mrf.mxu1 }
 0x5ec   :  { %v1240_v52 = vpack.c.bf16 %v1153_v24, %v1151_v30 }
 0x5ee   :  { %3297 = vmatmul.msk.bf16.vlgmr.msrb.gmra.mxu2 %vm119_vm1, %v1240_v52 }
 0x5f3   :  { %v1156_v35 = vpop.f32.mrf.mxu1 }
 0x5fb   :  { %v1158_v47 = vpop.f32.mrf.mxu1 }
 0x627   :  { %v1231_v57 = vpop.f32.mrf.mxu0 }
 0x628   :  { %v1241_v7 = vpack.c.bf16 %v1231_v57, %v1156_v35 }
 0x62a   :  { %3298 = vmatmul.msk.bf16.gmra.mxu2 %vm119_vm1, %v1241_v7 }
 0x62f   :  { %v1233_v31 = vpop.f32.mrf.mxu0 }
 0x637   :  { %v1236_v63 = vpop.f32.mrf.mxu0 }
 0x638   :  { %v1242_v27 = vpack.c.bf16 %v1236_v63, %v1233_v31 }
 0x63a   :  { %3299 = vmatmul.msk.bf16.gmra.mxu2 %vm119_vm1, %v1242_v27 }
 0x63f   :  { %v1238_v29 = vpop.f32.mrf.mxu0 }
 0x671   :  { %v1273_v44 = vpop.f32.mrf.mxu2 }
 0x672   :  { %v1288_v37 = vadd.f32 %v1273_v44, %v3849_v14 }
 0x674   :  { %v4496_v20 = vadd.f32 %v1296_v42, %v1288_v37 }
 0x676   :  { %v1304_v48 = vsel %vm119_vm1, %v4496_v20, 0.0 }
 0x677   :  { %1305 = vadd.xlane.f32.xlu0 %v1304_v48 }
 0x679   :  { %v1275_v46 = vpop.f32.mrf.mxu2 }
 0x67a   :  { %v1289_v56 = vadd.f32 %v1275_v46, %v3856_v18 }
 0x67c   :  { %v4501_v43 = vadd.f32 %v1296_v42, %v1289_v56 }
 0x67e   :  { %v1307_v6 = vsel %vm119_vm1, %v4501_v43, 0.0 }
 0x67f   :  { %1308 = vadd.xlane.f32.xlu1 %v1307_v6 }
 0x6ad   :  { %v1278_v55 = vpop.f32.mrf.mxu2 }
 0x6ae   :  { %v1290_v62 = vadd.f32 %v1278_v55, %v3863_v22 }
 0x6b0   :  { %v4506_v13 = vadd.f32 %v1296_v42, %v1290_v62 }
 0x6b2   :  { %v1310_v14 = vsel %vm119_vm1, %v4506_v13, 0.0 }
 0x6b3   :  { %1311 = vadd.xlane.f32.xlu2 %v1310_v14 }
 0x6b5   :  { %v1280_v58 = vpop.f32.mrf.mxu2 }
 0x6b6   :  { %v1291_v16 = vadd.f32 %v1280_v58, %v3867_v25 }
 0x6b8   :  { %v4511_v2 = vadd.f32 %v1296_v42, %v1291_v16 }
 0x6ba   :  { %v1313_v18 = vsel %vm119_vm1, %v4511_v2, 0.0 }
 0x6bb   :  { %1314 = vadd.xlane.f32.xlu2 %v1313_v18 }
 0x6bd   :  { %v1283_v17 = vpop.f32.mrf.mxu2 }
 0x6be   :  { %v1292_v45 = vadd.f32 %v1283_v17, %v3894_v51 }
 0x6c0   :  { %v4516_v19 = vadd.f32 %v1296_v42, %v1292_v45 }
 0x6c2   :  { %v1316_v22 = vsel %vm119_vm1, %v4516_v19, 0.0 }
 0x6c3   :  { %1317 = vadd.xlane.f32.xlu2 %v1316_v22 }
 0x6c5   :  { %v1285_v15 = vpop.f32.mrf.mxu2 }
 0x6c6   :  { %v1293_v41 = vadd.f32 %v1285_v15, %v3910_v59 }
 0x6c8   :  { %v4521_v10 = vadd.f32 %v1296_v42, %v1293_v41  ;;  %v3444_v42 = vld [vmem:[%s5360_s1 + $0x38] sm:$0xff] }
 0x6ca   :  { %v1319_v25 = vsel %vm119_vm1, %v4521_v10, 0.0 }
 0x6cb   :  { %1320 = vadd.xlane.f32.xlu0 %v1319_v25 }
 0x6ea   :  { %v1306_v11 = vpop.xlane.xlu0 %1305 }
 0x6eb   :  { %v1322_v39 = vmul.f32 %v1306_v11, %v3871_v33 }
 0x6ed   :  { %v4527_v51 = vsub.f32 %v4496_v20, %v1322_v39 }
 0x6ef   :  { %v1334_v12 = vmul.f32 %v4527_v51, %v4527_v51 }
 0x6f1   :  { %v1340_v38 = vsel %vm119_vm1, %v1334_v12, 0.0 }
 0x6f2   :  { %v1309_v32 = vpop.xlane.xlu1 %1308  ;;  %1341 = vadd.xlane.f32.xlu1 %v1340_v38 }
 0x6f3   :  { %v1323_v59 = vmul.f32 %v1309_v32, %v3871_v33 }
 0x6f5   :  { %v4534_v21 = vsub.f32 %v4501_v43, %v1323_v59 }
 0x6f7   :  { %v1335_v26 = vmul.f32 %v4534_v21, %v4534_v21 }
 0x6f9   :  { %v1343_v36 = vsel %vm119_vm1, %v1335_v26, 0.0 }
 0x6fa   :  { %1344 = vadd.xlane.f32.xlu2 %v1343_v36 }
 0x712   :  { %1436 = vrot.lane.b32.xlu2 %v3913_v60, %s3790_s21 }
 0x726   :  { %v1312_v9 = vpop.xlane.xlu2 %1311 }
 0x727   :  { %v1324_v50 = vmul.f32 %v1312_v9, %v3871_v33 }
 0x729   :  { %v4543_v5 = vsub.f32 %v4506_v13, %v1324_v50 }
 0x72b   :  { %v1336_v49 = vmul.f32 %v4543_v5, %v4543_v5 }
 0x72d   :  { %v1346_v61 = vsel %vm119_vm1, %v1336_v49, 0.0 }
 0x72e   :  { %v1315_v40 = vpop.xlane.xlu2 %1314  ;;  %1347 = vadd.xlane.f32.xlu0 %v1346_v61 }
 0x72f   :  { %v1325_v28 = vmul.f32 %v1315_v40, %v3871_v33 }
 0x731   :  { %v4550_v8 = vsub.f32 %v4511_v2, %v1325_v28 }
 0x733   :  { %v1337_v1 = vmul.f32 %v4550_v8, %v4550_v8 }
 0x735   :  { %v1349_v54 = vsel %vm119_vm1, %v1337_v1, 0.0 }
 0x736   :  { %v1318_v4 = vpop.xlane.xlu2 %1317  ;;  %1350 = vadd.xlane.f32.xlu1 %v1349_v54 }
 0x737   :  { %v1326_v34 = vmul.f32 %v1318_v4, %v3871_v33 }
 0x739   :  { %v4557_v3 = vsub.f32 %v4516_v19, %v1326_v34 }
 0x73b   :  { %v1338_v23 = vmul.f32 %v4557_v3, %v4557_v3 }
 0x73d   :  { %v1352_v53 = vsel %vm119_vm1, %v1338_v23, 0.0 }
 0x73e   :  { %1353 = vadd.xlane.f32.xlu1 %v1352_v53  ;;  %v1321_v30 = vpop.xlane.xlu0 %1320 }
 0x73f   :  { %v1327_v24 = vmul.f32 %v1321_v30, %v3871_v33 }
 0x741   :  { %v4564_v52 = vsub.f32 %v4521_v10, %v1327_v24 }
 0x742   :  { %1445 = vrot.lane.b32.xlu0 %v3913_v60, %s3794_s24  ;;  %v3445_v60 = vld [vmem:[%s5360_s1 + $0x40] sm:$0xff] }
 0x743   :  { %v1339_v35 = vmul.f32 %v4564_v52, %v4564_v52  ;;  %1485 = vmatpush.bf16.msra.mxu3 %v3445_v60 }
 0x745   :  { %v1355_v47 = vsel %vm119_vm1, %v1339_v35, 0.0 }
 0x746   :  { %1356 = vadd.xlane.f32.xlu1 %v1355_v47 }
 0x747   :  { %1486 = vmatpush.bf16.msra.mxu3 %v3444_v42 }
 0x765   :  { %v1342_v57 = vpop.xlane.xlu1 %1341 }
 0x766   :  { %v1358_v31 = vmul.f32 %v1342_v57, %v3871_v33 }
 0x768   :  { %v1364_v27 = vadd.f32 1e-05, %v1358_v31 }
 0x76a   :  { %3596 = vrsqrt.f32 %v1364_v27  ;;  %vm1376_vm2 = vweird.f32 %v1364_v27 }
 0x76d   :  { %v1345_v7 = vpop.xlane.xlu2 %1344 }
 0x76e   :  { %v1359_v63 = vmul.f32 %v1345_v7, %v3871_v33 }
 0x770   :  { %v1365_v29 = vadd.f32 1e-05, %v1359_v63  ;;  %v3597_v44 = vpop.eup %3596 }
 0x771   :  { %v1371_v48 = vmul.f32 %v3597_v44, %v1364_v27  ;;  %vm1377_vm14 = vweird.f32 %v3597_v44 }
 0x772   :  { %3598 = vrsqrt.f32 %v1365_v29  ;;  %vm1378_vm3 = vmor %vm1376_vm2, %vm1377_vm14  ;;  %vm1386_vm4 = vweird.f32 %v1365_v29 }
 0x773   :  { %v1372_v56 = vmul.f32 %v3597_v44, %v1371_v48 }
 0x775   :  { %v1373_v55 = vmul.f32 0.5, %v1372_v56  ;;  %v4583_v36 = vpop.permute.xlu2 %1436 }
 0x777   :  { %v1374_v16 = vsub.f32 1.5, %v1373_v55 }
 0x778   :  { %v3599_v37 = vpop.eup %3598 }
 0x779   :  { %v1381_v46 = vmul.f32 %v3599_v37, %v1365_v29  ;;  %v1375_v45 = vmul.f32 %v3597_v44, %v1374_v16  ;;  %vm1387_vm15 = vweird.f32 %v3599_v37 }
 0x77a   :  { %vm1388_vm5 = vmor %vm1386_vm4, %vm1387_vm15 }
 0x77b   :  { %v1382_v6 = vmul.f32 %v3599_v37, %v1381_v46  ;;  %v1379_v11 = vsel %vm1378_vm3, %v3597_v44, %v1375_v45 }
 0x77c   :  { %v1430_v32 = vmul.f32 %v1379_v11, %v4527_v51 }
 0x77d   :  { %v1383_v62 = vmul.f32 0.5, %v1382_v6 }
 0x77e   :  { %v1439_v61 = vmul.f32 %v4583_v36, %v1430_v32 }
 0x77f   :  { %v1384_v17 = vsub.f32 1.5, %v1383_v62 }
 0x781   :  { %v1385_v22 = vmul.f32 %v3599_v37, %v1384_v17 }
 0x783   :  { %v1389_v12 = vsel %vm1388_vm5, %v3599_v37, %v1385_v22 }
 0x784   :  { %v1431_v26 = vmul.f32 %v1389_v12, %v4534_v21 }
 0x786   :  { %v1440_v1 = vmul.f32 %v4583_v36, %v1431_v26  ;;  %v3450_v26 = vld [vmem:[%s5360_s1 + $0x68] sm:$0xff] }
 0x7a1   :  { %v1348_v14 = vpop.xlane.xlu0 %1347 }
 0x7a2   :  { %v1360_v58 = vmul.f32 %v1348_v14, %v3871_v33 }
 0x7a4   :  { %v1366_v18 = vadd.f32 1e-05, %v1360_v58 }
 0x7a6   :  { %3600 = vrsqrt.f32 %v1366_v18  ;;  %vm1396_vm8 = vweird.f32 %v1366_v18 }
 0x7a9   :  { %v1351_v15 = vpop.xlane.xlu1 %1350 }
 0x7aa   :  { %v1361_v41 = vmul.f32 %v1351_v15, %v3871_v33 }
 0x7ac   :  { %v3601_v25 = vpop.eup %3600  ;;  %v1367_v39 = vadd.f32 1e-05, %v1361_v41 }
 0x7ad   :  { %v1391_v38 = vmul.f32 %v3601_v25, %v1366_v18  ;;  %vm1397_vm6 = vweird.f32 %v3601_v25 }
 0x7ae   :  { %3602 = vrsqrt.f32 %v1367_v39  ;;  %vm1398_vm14 = vmor %vm1396_vm8, %vm1397_vm6  ;;  %vm1406_vm2 = vweird.f32 %v1367_v39 }
 0x7af   :  { %v1392_v59 = vmul.f32 %v3601_v25, %v1391_v38 }
 0x7b1   :  { %v1393_v9 = vmul.f32 0.5, %v1392_v59  ;;  %v1354_v50 = vpop.xlane.xlu1 %1353  ;;  %v3453_v59 = vld [vmem:[%s5360_s1 + $0x80] sm:$0xff] }
 0x7b2   :  { %v1362_v49 = vmul.f32 %v1354_v50, %v3871_v33  ;;  %1608 = vmatpush.bf16.msrb.mxu1 %v3453_v59  ;;  %v3447_v50 = vld [vmem:[%s5360_s1 + $0x50] sm:$0xff] }
 0x7b3   :  { %v1394_v40 = vsub.f32 1.5, %v1393_v9  ;;  %v3448_v9 = vld [vmem:[%s5360_s1 + $0x58] sm:$0xff] }
 0x7b4   :  { %v3603_v28 = vpop.eup %3602  ;;  %v1368_v54 = vadd.f32 1e-05, %v1362_v49  ;;  %v1446_v4 = vpop.permute.xlu0 %1445  ;;  %v3446_v49 = vld [vmem:[%s5360_s1 + $0x48] sm:$0xff] }
 0x7b5   :  { %v1395_v34 = vmul.f32 %v3601_v25, %v1394_v40  ;;  %v1401_v51 = vmul.f32 %v3603_v28, %v1367_v39  ;;  %v1448_v23 = vadd.f32 %v1446_v4, %v1439_v61  ;;  %v1449_v21 = vadd.f32 %v1446_v4, %v1440_v1  ;;  %v4627_v61 = vld [vmem:[%s5361_s2 + $0x18] sm:$0xff] }
 0x7b6   :  { %3604 = vrsqrt.f32 %v1368_v54  ;;  %vm1407_vm15 = vweird.f32 %v3603_v28  ;;  %vm1416_vm5 = vweird.f32 %v1368_v54  ;;  %v1457_v40 = vperm.slane %v4627_v61, 2 }
 0x7b7   :  { %v1402_v53 = vmul.f32 %v3603_v28, %v1401_v51  ;;  %v1454_v30 = vpack.c.bf16 %v1449_v21, %v1448_v23  ;;  %v1399_v24 = vsel %vm1398_vm14, %v3601_v25, %v1395_v34  ;;  %vm1408_vm3 = vmor %vm1406_vm2, %vm1407_vm15 }
 0x7b8   :  { %v1432_v63 = vmul.f32 %v1399_v24, %v4543_v5 }
 0x7b9   :  { %v1403_v35 = vmul.f32 0.5, %v1402_v53  ;;  %v1357_v47 = vpop.xlane.xlu1 %1356  ;;  %3308 = vmatmul.msk.bf16.vlgmr.msra.gmra.mxu3 %vm119_vm1, %v1454_v30 }
 0x7ba   :  { %v1363_v57 = vmul.f32 %v1357_v47, %v3871_v33  ;;  %v1441_v48 = vmul.f32 %v4583_v36, %v1432_v63 }
 0x7bb   :  { %v1404_v7 = vsub.f32 1.5, %v1403_v35 }
 0x7bc   :  { %v3605_v31 = vpop.eup %3604  ;;  %v1369_v27 = vadd.f32 1e-05, %v1363_v57  ;;  %v1450_v62 = vadd.f32 %v1446_v4, %v1441_v48 }
 0x7bd   :  { %v1405_v29 = vmul.f32 %v3603_v28, %v1404_v7  ;;  %v1411_v60 = vmul.f32 %v3605_v31, %v1368_v54  ;;  %vm1417_vm4 = vweird.f32 %v3605_v31 }
 0x7be   :  { %3606 = vrsqrt.f32 %v1369_v27  ;;  %vm1418_vm6 = vmor %vm1416_vm5, %vm1417_vm4  ;;  %vm1426_vm14 = vweird.f32 %v1369_v27 }
 0x7bf   :  { %v1409_v44 = vsel %vm1408_vm3, %v3603_v28, %v1405_v29  ;;  %v1412_v42 = vmul.f32 %v3605_v31, %v1411_v60 }
 0x7c0   :  { %v1433_v37 = vmul.f32 %v1409_v44, %v4550_v8 }
 0x7c1   :  { %v1413_v46 = vmul.f32 0.5, %v1412_v42 }
 0x7c2   :  { %v1442_v56 = vmul.f32 %v4583_v36, %v1433_v37 }
 0x7c3   :  { %v1414_v6 = vsub.f32 1.5, %v1413_v46 }
 0x7c4   :  { %v3607_v55 = vpop.eup %3606  ;;  %v1451_v14 = vadd.f32 %v1446_v4, %v1442_v56 }
 0x7c5   :  { %v1415_v5 = vmul.f32 %v3605_v31, %v1414_v6  ;;  %v1421_v58 = vmul.f32 %v3607_v55, %v1369_v27  ;;  %vm1427_vm8 = vweird.f32 %v3607_v55 }
 0x7c6   :  { %v1455_v16 = vpack.c.bf16 %v1451_v14, %v1450_v62  ;;  %vm1428_vm15 = vmor %vm1426_vm14, %vm1427_vm8 }
 0x7c7   :  { %v1422_v18 = vmul.f32 %v3607_v55, %v1421_v58  ;;  %v1419_v17 = vsel %vm1418_vm6, %v3605_v31, %v1415_v5 }
 0x7c8   :  { %v1434_v22 = vmul.f32 %v1419_v17, %v4557_v3  ;;  %v3452_v3 = vld [vmem:[%s5360_s1 + $0x78] sm:$0xff] }
 0x7c9   :  { %v1423_v45 = vmul.f32 0.5, %v1422_v18  ;;  %3309 = vmatmul.msk.bf16.gmra.mxu3 %vm119_vm1, %v1455_v16  ;;  %1609 = vmatpush.bf16.msrb.mxu1 %v3452_v3 }
 0x7ca   :  { %v1443_v11 = vmul.f32 %v4583_v36, %v1434_v22 }
 0x7cb   :  { %v1424_v8 = vsub.f32 1.5, %v1423_v45 }
 0x7cc   :  { %v1452_v12 = vadd.f32 %v1446_v4, %v1443_v11 }
 0x7cd   :  { %v1425_v15 = vmul.f32 %v3607_v55, %v1424_v8 }
 0x7cf   :  { %v1429_v41 = vsel %vm1428_vm15, %v3607_v55, %v1425_v15 }
 0x7d0   :  { %v1435_v25 = vmul.f32 %v1429_v41, %v4564_v52  ;;  %v3451_v52 = vld [vmem:[%s5360_s1 + $0x70] sm:$0xff] }
 0x7d1   :  { %1610 = vmatpush.bf16.msrb.mxu1 %v3451_v52 }
 0x7d2   :  { %v1444_v39 = vmul.f32 %v4583_v36, %v1435_v25  ;;  %v3449_v36 = vld [vmem:[%s5360_s1 + $0x60] sm:$0xff] }
 0x7d4   :  { %v1453_v38 = vadd.f32 %v1446_v4, %v1444_v39 }
 0x7d5   :  { %1611 = vmatpush.bf16.msrb.mxu1 %v3450_v26 }
 0x7d6   :  { %v1456_v32 = vpack.c.bf16 %v1453_v38, %v1452_v12 }
 0x7d9   :  { %3310 = vmatmul.msk.bf16.gmra.mxu3 %vm119_vm1, %v1456_v32  ;;  %1612 = vmatpush.bf16.msrb.mxu1 %v3449_v36 }
 0x7dd   :  { %1613 = vmatpush.bf16.msrb.mxu1 %v3448_v9 }
 0x7e1   :  { %1614 = vmatpush.bf16.msrb.mxu1 %v3447_v50 }
 0x7e5   :  { %1615 = vmatpush.bf16.msrb.mxu1 %v3446_v49 }
 0x83c   :  { %v1488_v28 = vpop.f32.mrf.mxu3 }
 0x83d   :  { %v1489_v1 = vadd.f32 %v1488_v28, %v1457_v40 }
 0x83f   :  { %v1509_v54 = vmul.f32 0.044715, %v1489_v1  ;;  %v1503_v6 = vmul.f32 0.5, %v1489_v1 }
 0x841   :  { %v1515_v4 = vmul.f32 %v1509_v54, %v1489_v1 }
 0x843   :  { %v1521_v34 = vmul.f32 %v1515_v4, %v1489_v1 }
 0x844   :  { %v1490_v51 = vpop.f32.mrf.mxu3 }
 0x845   :  { %v1527_v23 = vadd.f32 %v1521_v34, %v1489_v1  ;;  %v1491_v21 = vadd.f32 %v1490_v51, %v1457_v40 }
 0x847   :  { %v1510_v53 = vmul.f32 0.044715, %v1491_v21  ;;  %v1533_v30 = vmul.f32 0.7978846, %v1527_v23  ;;  %v1504_v55 = vmul.f32 0.5, %v1491_v21 }
 0x849   :  { %v1516_v24 = vmul.f32 %v1510_v53, %v1491_v21  ;;  %3608 = vtanh.f32 %v1533_v30 }
 0x84b   :  { %v1522_v35 = vmul.f32 %v1516_v24, %v1491_v21 }
 0x84c   :  { %v1493_v47 = vpop.f32.mrf.mxu3 }
 0x84d   :  { %v1528_v57 = vadd.f32 %v1522_v35, %v1491_v21  ;;  %v1494_v7 = vadd.f32 %v1493_v47, %v1457_v40 }
 0x84f   :  { %v1534_v31 = vmul.f32 0.7978846, %v1528_v57  ;;  %v1511_v63 = vmul.f32 0.044715, %v1494_v7  ;;  %v3609_v29 = vpop.eup %3608  ;;  %v1505_v26 = vmul.f32 0.5, %v1494_v7 }
 0x850   :  { %v1545_v48 = vadd.f32 1.0, %v3609_v29 }
 0x851   :  { %3610 = vtanh.f32 %v1534_v31  ;;  %v1517_v27 = vmul.f32 %v1511_v63, %v1494_v7 }
 0x852   :  { %v1551_v58 = vmul.f32 %v1545_v48, %v1503_v6 }
 0x853   :  { %v1523_v60 = vmul.f32 %v1517_v27, %v1494_v7 }
 0x854   :  { %v1495_v44 = vpop.f32.mrf.mxu3 }
 0x855   :  { %v1496_v42 = vadd.f32 %v1495_v44, %v1457_v40  ;;  %v1529_v37 = vadd.f32 %v1523_v60, %v1494_v7  ;;  %v1638_v7 = vperm.slane %v4627_v61, 3 }
 0x857   :  { %v3611_v46 = vpop.eup %3610  ;;  %v1512_v56 = vmul.f32 0.044715, %v1496_v42  ;;  %v1535_v5 = vmul.f32 0.7978846, %v1529_v37  ;;  %v1506_v36 = vmul.f32 0.5, %v1496_v42 }
 0x858   :  { %v1546_v62 = vadd.f32 1.0, %v3611_v46 }
 0x859   :  { %v1518_v14 = vmul.f32 %v1512_v56, %v1496_v42  ;;  %3612 = vtanh.f32 %v1535_v5 }
 0x85a   :  { %v1552_v16 = vmul.f32 %v1546_v62, %v1504_v55 }
 0x85b   :  { %v1524_v18 = vmul.f32 %v1518_v14, %v1496_v42 }
 0x85c   :  { %v1498_v17 = vpop.f32.mrf.mxu3  ;;  %v1557_v45 = vpack.c.bf16 %v1552_v16, %v1551_v58 }
 0x85d   :  { %v1499_v8 = vadd.f32 %v1498_v17, %v1457_v40  ;;  %v1530_v22 = vadd.f32 %v1524_v18, %v1496_v42 }
 0x85e   :  { %1616 = vmatmul.bf16.vlgmr.msrb.gmra.mxu1 %v1557_v45 }
 0x85f   :  { %v1513_v15 = vmul.f32 0.044715, %v1499_v8  ;;  %v1536_v41 = vmul.f32 0.7978846, %v1530_v22  ;;  %v3613_v11 = vpop.eup %3612  ;;  %v1507_v53 = vmul.f32 0.5, %v1499_v8 }
 0x860   :  { %v1547_v59 = vadd.f32 1.0, %v3613_v11 }
 0x861   :  { %3614 = vtanh.f32 %v1536_v41  ;;  %v1519_v25 = vmul.f32 %v1513_v15, %v1499_v8 }
 0x862   :  { %v1553_v28 = vmul.f32 %v1547_v59, %v1505_v26 }
 0x863   :  { %v1525_v39 = vmul.f32 %v1519_v25, %v1499_v8 }
 0x864   :  { %v1500_v12 = vpop.f32.mrf.mxu3 }
 0x865   :  { %v1501_v38 = vadd.f32 %v1500_v12, %v1457_v40  ;;  %v1531_v32 = vadd.f32 %v1525_v39, %v1499_v8 }
 0x867   :  { %v3615_v3 = vpop.eup %3614  ;;  %v1514_v52 = vmul.f32 0.044715, %v1501_v38  ;;  %v1537_v49 = vmul.f32 0.7978846, %v1531_v32  ;;  %v1508_v30 = vmul.f32 0.5, %v1501_v38 }
 0x868   :  { %v1548_v9 = vadd.f32 1.0, %v3615_v3 }
 0x869   :  { %v1520_v50 = vmul.f32 %v1514_v52, %v1501_v38  ;;  %3616 = vtanh.f32 %v1537_v49 }
 0x86a   :  { %v1554_v1 = vmul.f32 %v1548_v9, %v1506_v36 }
 0x86b   :  { %v1526_v54 = vmul.f32 %v1520_v50, %v1501_v38 }
 0x86c   :  { %v1558_v4 = vpack.c.bf16 %v1554_v1, %v1553_v28  ;;  %v4693_v28 = vld [vmem:[%s5361_s2 + $0x20] sm:$0xff] }
 0x86d   :  { %v1532_v34 = vadd.f32 %v1526_v54, %v1501_v38 }
 0x86e   :  { %1621 = vmatmul.bf16.gmra.mxu1 %v1558_v4  ;;  %v4701_v4 = vperm.slane %v4693_v28, 0 }
 0x86f   :  { %v1538_v51 = vmul.f32 0.7978846, %v1532_v34  ;;  %v3617_v23 = vpop.eup %3616 }
 0x870   :  { %v1549_v40 = vadd.f32 1.0, %v3617_v23 }
 0x871   :  { %3618 = vtanh.f32 %v1538_v51 }
 0x872   :  { %v1555_v35 = vmul.f32 %v1549_v40, %v1507_v53 }
 0x877   :  { %v3619_v21 = vpop.eup %3618 }
 0x878   :  { %v1550_v24 = vadd.f32 1.0, %v3619_v21 }
 0x87a   :  { %v1556_v47 = vmul.f32 %v1550_v24, %v1508_v30  ;;  %v3455_v30 = vld [vmem:[%s5360_s1 + $0x90] sm:$0xff] }
 0x87b   :  { %1854 = vmatpush.bf16.msrb.mxu0 %v3455_v30 }
 0x87c   :  { %v1559_v57 = vpack.c.bf16 %v1556_v47, %v1555_v35  ;;  %v3454_v47 = vld [vmem:[%s5360_s1 + $0x88] sm:$0xff] }
 0x87e   :  { %1626 = vmatmul.bf16.gmra.mxu1 %v1559_v57 }
 0x87f   :  { %1855 = vmatpush.bf16.msrb.mxu0 %v3454_v47 }
 0x8db   :  { %v1617_v31 = vpop.f32.mrf.mxu1 }
 0x8dc   :  { %v1632_v63 = vadd.f32 %v1617_v31, %v4496_v20 }
 0x8de   :  { %v4632_v27 = vadd.f32 %v1638_v7, %v1632_v63 }
 0x8e0   :  { %v1674_v29 = vsel %vm119_vm1, %v4632_v27, 0.0 }
 0x8e1   :  { %1675 = vadd.xlane.f32.xlu1 %v1674_v29 }
 0x8e3   :  { %v1619_v60 = vpop.f32.mrf.mxu1 }
 0x8e4   :  { %v1633_v44 = vadd.f32 %v1619_v60, %v4501_v43 }
 0x8e6   :  { %v4637_v42 = vadd.f32 %v1638_v7, %v1633_v44 }
 0x8e8   :  { %v1677_v37 = vsel %vm119_vm1, %v4637_v42, 0.0 }
 0x8e9   :  { %1678 = vadd.xlane.f32.xlu2 %v1677_v37 }
 0x8eb   :  { %v1622_v48 = vpop.f32.mrf.mxu1 }
 0x8ec   :  { %v1634_v61 = vadd.f32 %v1622_v48, %v4506_v13 }
 0x8ee   :  { %v4642_v46 = vadd.f32 %v1638_v7, %v1634_v61 }
 0x8f0   :  { %v1680_v20 = vsel %vm119_vm1, %v4642_v46, 0.0 }
 0x8f1   :  { %1681 = vadd.xlane.f32.xlu0 %v1680_v20 }
 0x8f3   :  { %v1624_v56 = vpop.f32.mrf.mxu1 }
 0x8f4   :  { %v1635_v6 = vadd.f32 %v1624_v56, %v4511_v2 }
 0x8f6   :  { %v4647_v55 = vadd.f32 %v1638_v7, %v1635_v6 }
 0x8f8   :  { %v1683_v43 = vsel %vm119_vm1, %v4647_v55, 0.0 }
 0x8f9   :  { %1684 = vadd.xlane.f32.xlu1 %v1683_v43 }
 0x8fb   :  { %v1627_v62 = vpop.f32.mrf.mxu1 }
 0x8fc   :  { %v1636_v14 = vadd.f32 %v1627_v62, %v4516_v19 }
 0x8fe   :  { %v4652_v5 = vadd.f32 %v1638_v7, %v1636_v14 }
 0x900   :  { %v1686_v13 = vsel %vm119_vm1, %v4652_v5, 0.0 }
 0x901   :  { %1687 = vadd.xlane.f32.xlu1 %v1686_v13 }
 0x903   :  { %v1629_v58 = vpop.f32.mrf.mxu1 }
 0x904   :  { %v1637_v16 = vadd.f32 %v1629_v58, %v4521_v10 }
 0x906   :  { %v4657_v18 = vadd.f32 %v1638_v7, %v1637_v16 }
 0x908   :  { %v1689_v2 = vsel %vm119_vm1, %v4657_v18, 0.0 }
 0x909   :  { %1690 = vadd.xlane.f32.xlu1 %v1689_v2 }
 0x954   :  { %v1676_v17 = vpop.xlane.xlu1 %1675 }
 0x955   :  { %v1692_v45 = vmul.f32 %v1676_v17, %v3871_v33 }
 0x957   :  { %v4663_v19 = vsub.f32 %v4632_v27, %v1692_v45 }
 0x959   :  { %v1704_v8 = vmul.f32 %v4663_v19, %v4663_v19 }
 0x95b   :  { %v1710_v22 = vsel %vm119_vm1, %v1704_v8, 0.0 }
 0x95c   :  { %v1679_v15 = vpop.xlane.xlu2 %1678  ;;  %1711 = vadd.xlane.f32.xlu1 %v1710_v22 }
 0x95d   :  { %v1693_v10 = vmul.f32 %v1679_v15, %v3871_v33 }
 0x95f   :  { %v4670_v41 = vsub.f32 %v4637_v42, %v1693_v10 }
 0x961   :  { %v1705_v25 = vmul.f32 %v4670_v41, %v4670_v41 }
 0x963   :  { %v1713_v11 = vsel %vm119_vm1, %v1705_v25, 0.0 }
 0x964   :  { %v1682_v39 = vpop.xlane.xlu0 %1681  ;;  %1714 = vadd.xlane.f32.xlu1 %v1713_v11 }
 0x965   :  { %v1694_v12 = vmul.f32 %v1682_v39, %v3871_v33 }
 0x967   :  { %v4677_v38 = vsub.f32 %v4642_v46, %v1694_v12 }
 0x969   :  { %v1706_v32 = vmul.f32 %v4677_v38, %v4677_v38 }
 0x96b   :  { %v1716_v59 = vsel %vm119_vm1, %v1706_v32, 0.0 }
 0x96c   :  { %1717 = vadd.xlane.f32.xlu2 %v1716_v59  ;;  %v1685_v3 = vpop.xlane.xlu1 %1684 }
 0x96d   :  { %v1695_v52 = vmul.f32 %v1685_v3, %v3871_v33 }
 0x96f   :  { %v4684_v26 = vsub.f32 %v4647_v55, %v1695_v52 }
 0x971   :  { %v1707_v36 = vmul.f32 %v4684_v26, %v4684_v26 }
 0x973   :  { %v1719_v9 = vsel %vm119_vm1, %v1707_v36, 0.0 }
 0x974   :  { %1720 = vadd.xlane.f32.xlu0 %v1719_v9  ;;  %v1688_v50 = vpop.xlane.xlu1 %1687 }
 0x975   :  { %v1696_v49 = vmul.f32 %v1688_v50, %v3871_v33 }
 0x977   :  { %v4696_v1 = vsub.f32 %v4652_v5, %v1696_v49 }
 0x979   :  { %v1708_v54 = vmul.f32 %v4696_v1, %v4696_v1 }
 0x97b   :  { %v1722_v34 = vsel %vm119_vm1, %v1708_v54, 0.0 }
 0x97c   :  { %1723 = vadd.xlane.f32.xlu2 %v1722_v34  ;;  %v1691_v51 = vpop.xlane.xlu1 %1690 }
 0x97d   :  { %v1697_v23 = vmul.f32 %v1691_v51, %v3871_v33  ;;  %1814 = vrot.lane.b32.xlu1 %v4701_v4, %s3783_s10 }
 0x97f   :  { %v4708_v40 = vsub.f32 %v4657_v18, %v1697_v23 }
 0x981   :  { %v1709_v21 = vmul.f32 %v4708_v40, %v4708_v40 }
 0x983   :  { %v1725_v53 = vsel %vm119_vm1, %v1709_v21, 0.0 }
 0x984   :  { %1726 = vadd.xlane.f32.xlu0 %v1725_v53 }
 0x9cf   :  { %v1712_v24 = vpop.xlane.xlu1 %1711 }
 0x9d0   :  { %v1728_v35 = vmul.f32 %v1712_v24, %v3871_v33 }
 0x9d2   :  { %v1734_v57 = vadd.f32 1e-05, %v1728_v35 }
 0x9d4   :  { %3620 = vrsqrt.f32 %v1734_v57  ;;  %vm1746_vm3 = vweird.f32 %v1734_v57 }
 0x9d7   :  { %v1715_v7 = vpop.xlane.xlu1 %1714 }
 0x9d8   :  { %v1729_v31 = vmul.f32 %v1715_v7, %v3871_v33 }
 0x9da   :  { %v3621_v63 = vpop.eup %3620  ;;  %v1735_v29 = vadd.f32 1e-05, %v1729_v31 }
 0x9db   :  { %v1741_v60 = vmul.f32 %v3621_v63, %v1734_v57  ;;  %vm1747_vm2 = vweird.f32 %v3621_v63 }
 0x9dc   :  { %3622 = vrsqrt.f32 %v1735_v29  ;;  %vm1748_vm4 = vmor %vm1746_vm3, %vm1747_vm2  ;;  %vm1756_vm6 = vweird.f32 %v1735_v29 }
 0x9dd   :  { %v1742_v44 = vmul.f32 %v3621_v63, %v1741_v60 }
 0x9df   :  { %v1743_v37 = vmul.f32 0.5, %v1742_v44  ;;  %v1718_v48 = vpop.xlane.xlu2 %1717 }
 0x9e0   :  { %v1730_v61 = vmul.f32 %v1718_v48, %v3871_v33 }
 0x9e1   :  { %v1744_v20 = vsub.f32 1.5, %v1743_v37 }
 0x9e2   :  { %v3623_v56 = vpop.eup %3622  ;;  %v1736_v6 = vadd.f32 1e-05, %v1730_v61 }
 0x9e3   :  { %v1751_v43 = vmul.f32 %v3623_v56, %v1735_v29  ;;  %v1745_v62 = vmul.f32 %v3621_v63, %v1744_v20  ;;  %vm1757_vm5 = vweird.f32 %v3623_v56 }
 0x9e4   :  { %3624 = vrsqrt.f32 %v1736_v6  ;;  %vm1758_vm8 = vmor %vm1756_vm6, %vm1757_vm5  ;;  %vm1766_vm15 = vweird.f32 %v1736_v6 }
 0x9e5   :  { %v1752_v14 = vmul.f32 %v3623_v56, %v1751_v43  ;;  %v1749_v2 = vsel %vm1748_vm4, %v3621_v63, %v1745_v62 }
 0x9e6   :  { %v1800_v10 = vmul.f32 %v1749_v2, %v4663_v19 }
 0x9e7   :  { %v1753_v13 = vmul.f32 0.5, %v1752_v14  ;;  %v1721_v58 = vpop.xlane.xlu0 %1720 }
 0x9e8   :  { %v1731_v16 = vmul.f32 %v1721_v58, %v3871_v33  ;;  %v1807_v3 = vmul.f32 %v4701_v4, %v1800_v10 }
 0x9e9   :  { %v1754_v17 = vsub.f32 1.5, %v1753_v13 }
 0x9ea   :  { %v3625_v45 = vpop.eup %3624  ;;  %v1737_v8 = vadd.f32 1e-05, %v1731_v16 }
 0x9eb   :  { %v1755_v22 = vmul.f32 %v3623_v56, %v1754_v17  ;;  %v1761_v15 = vmul.f32 %v3625_v45, %v1736_v6  ;;  %vm1767_vm14 = vweird.f32 %v3625_v45 }
 0x9ec   :  { %3626 = vrsqrt.f32 %v1737_v8  ;;  %vm1768_vm2 = vmor %vm1766_vm15, %vm1767_vm14  ;;  %vm1776_vm4 = vweird.f32 %v1737_v8 }
 0x9ed   :  { %v1759_v25 = vsel %vm1758_vm8, %v3623_v56, %v1755_v22  ;;  %v1762_v11 = vmul.f32 %v3625_v45, %v1761_v15 }
 0x9ee   :  { %v1801_v39 = vmul.f32 %v1759_v25, %v4670_v41 }
 0x9ef   :  { %v1763_v12 = vmul.f32 0.5, %v1762_v11  ;;  %v1724_v32 = vpop.xlane.xlu2 %1723  ;;  %v4725_v59 = vpop.permute.xlu1 %1814 }
 0x9f0   :  { %v1808_v52 = vmul.f32 %v4701_v4, %v1801_v39  ;;  %v1732_v36 = vmul.f32 %v1724_v32, %v3871_v33  ;;  %v1817_v19 = vadd.f32 %v4725_v59, %v1807_v3 }
 0x9f1   :  { %v1764_v9 = vsub.f32 1.5, %v1763_v12 }
 0x9f2   :  { %v3627_v50 = vpop.eup %3626  ;;  %v1738_v49 = vadd.f32 1e-05, %v1732_v36  ;;  %v1818_v54 = vadd.f32 %v4725_v59, %v1808_v52 }
 0x9f3   :  { %v1765_v34 = vmul.f32 %v3625_v45, %v1764_v9  ;;  %v1771_v41 = vmul.f32 %v3627_v50, %v1737_v8  ;;  %vm1777_vm3 = vweird.f32 %v3627_v50 }
 0x9f4   :  { %3628 = vrsqrt.f32 %v1738_v49  ;;  %v1823_v51 = vpack.c.bf16 %v1818_v54, %v1817_v19  ;;  %vm1778_vm5 = vmor %vm1776_vm4, %vm1777_vm3  ;;  %vm1786_vm8 = vweird.f32 %v1738_v49 }
 0x9f5   :  { %v1772_v23 = vmul.f32 %v3627_v50, %v1771_v41  ;;  %v1769_v21 = vsel %vm1768_vm2, %v3625_v45, %v1765_v34 }
 0x9f6   :  { %3351 = vmatmul.msk.bf16.vlgmr.msrb.gmra.mxu0 %vm119_vm1, %v1823_v51  ;;  %v1802_v57 = vmul.f32 %v1769_v21, %v4677_v38 }
 0x9f7   :  { %v1773_v53 = vmul.f32 0.5, %v1772_v23  ;;  %v1727_v30 = vpop.xlane.xlu0 %1726 }
 0x9f8   :  { %v1733_v24 = vmul.f32 %v1727_v30, %v3871_v33  ;;  %v1809_v37 = vmul.f32 %v4701_v4, %v1802_v57 }
 0x9f9   :  { %v1774_v35 = vsub.f32 1.5, %v1773_v53 }
 0x9fa   :  { %v3629_v47 = vpop.eup %3628  ;;  %v1739_v7 = vadd.f32 1e-05, %v1733_v24  ;;  %v1819_v6 = vadd.f32 %v4725_v59, %v1809_v37 }
 0x9fb   :  { %v1775_v31 = vmul.f32 %v3627_v50, %v1774_v35  ;;  %v1781_v63 = vmul.f32 %v3629_v47, %v1738_v49  ;;  %vm1787_vm6 = vweird.f32 %v3629_v47 }
 0x9fc   :  { %3630 = vrsqrt.f32 %v1739_v7  ;;  %vm1788_vm14 = vmor %vm1786_vm8, %vm1787_vm6  ;;  %vm1796_vm2 = vweird.f32 %v1739_v7 }
 0x9fd   :  { %v1779_v29 = vsel %vm1778_vm5, %v3627_v50, %v1775_v31  ;;  %v1782_v60 = vmul.f32 %v3629_v47, %v1781_v63 }
 0x9fe   :  { %v1803_v44 = vmul.f32 %v1779_v29, %v4684_v26 }
 0x9ff   :  { %v1783_v48 = vmul.f32 0.5, %v1782_v60 }
 0xa00   :  { %v1810_v61 = vmul.f32 %v4701_v4, %v1803_v44 }
 0xa01   :  { %v1784_v20 = vsub.f32 1.5, %v1783_v48 }
 0xa02   :  { %v3631_v56 = vpop.eup %3630  ;;  %v1820_v38 = vadd.f32 %v4725_v59, %v1810_v61 }
 0xa03   :  { %v1785_v43 = vmul.f32 %v3629_v47, %v1784_v20  ;;  %v1791_v62 = vmul.f32 %v3631_v56, %v1739_v7  ;;  %vm1797_vm15 = vweird.f32 %v3631_v56 }
 0xa04   :  { %v1824_v14 = vpack.c.bf16 %v1820_v38, %v1819_v6  ;;  %vm1798_vm3 = vmor %vm1796_vm2, %vm1797_vm15 }
 0xa05   :  { %v1792_v13 = vmul.f32 %v3631_v56, %v1791_v62  ;;  %v1789_v26 = vsel %vm1788_vm14, %v3629_v47, %v1785_v43 }
 0xa06   :  { %3352 = vmatmul.msk.bf16.gmra.mxu0 %vm119_vm1, %v1824_v14  ;;  %v1804_v2 = vmul.f32 %v1789_v26, %v4696_v1  ;;  %v4749_v1 = vperm.slane %v4693_v28, 1 }
 0xa07   :  { %v1793_v58 = vmul.f32 0.5, %v1792_v13 }
 0xa08   :  { %v1811_v22 = vmul.f32 %v4701_v4, %v1804_v2 }
 0xa09   :  { %v1794_v16 = vsub.f32 1.5, %v1793_v58 }
 0xa0a   :  { %v1821_v10 = vadd.f32 %v4725_v59, %v1811_v22 }
 0xa0b   :  { %v1795_v17 = vmul.f32 %v3631_v56, %v1794_v16 }
 0xa0d   :  { %v1799_v45 = vsel %vm1798_vm3, %v3631_v56, %v1795_v17 }
 0xa0e   :  { %v1805_v8 = vmul.f32 %v1799_v45, %v4708_v40 }
 0xa10   :  { %v1812_v15 = vmul.f32 %v4701_v4, %v1805_v8 }
 0xa12   :  { %v1822_v25 = vadd.f32 %v4725_v59, %v1812_v15 }
 0xa14   :  { %v1825_v11 = vpack.c.bf16 %v1822_v25, %v1821_v10 }
 0xa16   :  { %3353 = vmatmul.msk.bf16.gmra.mxu0 %vm119_vm1, %v1825_v11 }
 0xa73   :  { %v1857_v39 = vpop.f32.mrf.mxu0 }
 0xa74   :  { %v1858_v12 = vadd.f32 %v1857_v39, %v4749_v1 }
 0xa76   :  { %v1874_v3 = vpack.c.bf16 %v1858_v12, %v1858_v12 }
 0xa78   :  { %v1920_v9 = vunpack.c.l.b16 %v1874_v3 }
 0xa7b   :  { %v1859_v32 = vpop.f32.mrf.mxu0 }
 0xa7c   :  { %v1860_v40 = vadd.f32 %v1859_v32, %v4749_v1 }
 0xa7e   :  { %v4753_v52 = vpack.c.bf16 %v1860_v40, %v1858_v12  ;;  %v1875_v36 = vpack.c.bf16 %v1860_v40, %v1860_v40 }
 0xa80   :  { %v1921_v50 = vunpack.c.l.b16 %v1875_v36  ;;  %1942 = vrot.lane.b32.xlu1 %v4753_v52, %s3785_s16 }
 0xa82   :  { %v1923_v59 = vpack.c.b16 %v1921_v50, %v1920_v9 }
 0xa83   :  { %v1862_v49 = vpop.f32.mrf.mxu0 }
 0xa84   :  { %v1863_v19 = vadd.f32 %v1862_v49, %v4749_v1 }
 0xa86   :  { %v4758_v28 = vpack.c.bf16 %v1863_v19, %v1863_v19 }
 0xa88   :  { %1994 = vrot.lane.b32.xlu0 %v4758_v28, %s3787_s18  ;;  %1944 = vrot.lane.b32.xlu2 %v4758_v28, %s3785_s16  ;;  %v1922_v24 = vunpack.c.l.b16 %v4758_v28 }
 0xa89   :  { %1992 = vrot.lane.b32.xlu1 %v4753_v52, %s3787_s18 }
 0xa8a   :  { %v1924_v47 = vpack.c.b16 %v1922_v24, %v1922_v24 }
 0xa8b   :  { %v1864_v54 = vpop.f32.mrf.mxu0 }
 0xa8c   :  { %v1865_v53 = vadd.f32 %v1864_v54, %v4749_v1 }
 0xa8e   :  { %v2103_v57 = vpack.c.bf16 %v1865_v53, %v1865_v53 }
 0xa90   :  { %2043 = vrot.lane.b32.xlu0 %v4758_v28, %s3784_s15  ;;  %1938 = vrot.lane.b32.xlu2 %v4753_v52, %s3788_s19  ;;  %v2149_v31 = vunpack.c.l.b16 %v2103_v57 }
 0xa91   :  { %1988 = vrot.lane.b32.xlu1 %v4753_v52, %s3786_s17 }
 0xa93   :  { %v1867_v34 = vpop.f32.mrf.mxu0 }
 0xa94   :  { %v1868_v21 = vadd.f32 %v1867_v34, %v4749_v1 }
 0xa96   :  { %v4793_v30 = vpack.c.bf16 %v1868_v21, %v1865_v53  ;;  %v2104_v35 = vpack.c.bf16 %v1868_v21, %v1868_v21 }
 0xa98   :  { %2041 = vrot.lane.b32.xlu0 %v4753_v52, %s3784_s15  ;;  %2037 = vrot.lane.b32.xlu2 %v4753_v52, %s3789_s20  ;;  %v2150_v7 = vunpack.c.l.b16 %v2104_v35 }
 0xa9a   :  { %v2152_v63 = vpack.c.b16 %v2150_v7, %v2149_v31 }
 0xa9b   :  { %v1869_v41 = vpop.f32.mrf.mxu0 }
 0xa9c   :  { %v1870_v51 = vadd.f32 %v1869_v41, %v4749_v1 }
 0xa9e   :  { %v4777_v23 = vpack.c.bf16 %v1870_v51, %v1870_v51 }
 0xaa0   :  { %1940 = vrot.lane.b32.xlu0 %v4758_v28, %s3788_s19  ;;  %1878 = vrot.lane.b32.xlu2 %v4753_v52, %s3783_s10  ;;  %v2151_v29 = vunpack.c.l.b16 %v4777_v23 }
 0xaa1   :  { %2173 = vrot.lane.b32.xlu1 %v4777_v23, %s3785_s16 }
 0xaa2   :  { %v2153_v60 = vpack.c.b16 %v2151_v29, %v2151_v29 }
 0xaa8   :  { %1990 = vrot.lane.b32.xlu0 %v4758_v28, %s3786_s17  ;;  %1880 = vrot.lane.b32.xlu2 %v4758_v28, %s3783_s10 }
 0xaa9   :  { %2223 = vrot.lane.b32.xlu1 %v4777_v23, %s3787_s18 }
 0xab0   :  { %2171 = vrot.lane.b32.xlu0 %v4793_v30, %s3785_s16  ;;  %2039 = vrot.lane.b32.xlu2 %v4758_v28, %s3789_s20 }
 0xab1   :  { %2272 = vrot.lane.b32.xlu1 %v4777_v23, %s3784_s15 }
 0xab8   :  { %2221 = vrot.lane.b32.xlu0 %v4793_v30, %s3787_s18  ;;  %2270 = vrot.lane.b32.xlu2 %v4793_v30, %s3784_s15  ;;  %s3234_s18 = sshll.u32 %s5362_s3, 4  ;;  %s3235_s18 = int_to_ptr.hbm [resolvable:$true] %s3234_s18 }
 0xab9   :  { %2167 = vrot.lane.b32.xlu1 %v4793_v30, %s3788_s19 }
 0xac0   :  { %2217 = vrot.lane.b32.xlu0 %v4793_v30, %s3786_s17  ;;  %2109 = vrot.lane.b32.xlu2 %v4777_v23, %s3783_s10 }
 0xac1   :  { %2266 = vrot.lane.b32.xlu1 %v4793_v30, %s3789_s20 }
 0xac8   :  { %2169 = vrot.lane.b32.xlu0 %v4777_v23, %s3788_s19  ;;  %2219 = vrot.lane.b32.xlu2 %v4777_v23, %s3786_s17 }
 0xac9   :  { %2107 = vrot.lane.b32.xlu1 %v4793_v30, %s3783_s10 }
 0xad0   :  { %2268 = vrot.lane.b32.xlu0 %v4777_v23, %s3789_s20  ;;  %1925 = vrot.lane.b32.xlu2 %v1923_v59, %s3790_s21 }
 0xad1   :  { %1927 = vrot.lane.b32.xlu1 %v1924_v47, %s3790_s21 }
 0xad8   :  { %2154 = vrot.lane.b32.xlu0 %v2152_v63, %s3790_s21 }
 0xae0   :  { %2156 = vrot.lane.b32.xlu0 %v2153_v60, %s3790_s21 }
 0xae2   :  { %v1945_v44 = vpop.permute.xlu2 %1944 }
 0xae3   :  { %v1956_v37 = vsel %vm335_vm7, %v1945_v44, 0 }
 0xae4   :  { %1964 = vmatpush.bf16.xpose.msrb.mxu3 %v1956_v37 }
 0xaea   :  { %v1939_v48 = vpop.permute.xlu2 %1938 }
 0xaf2   :  { %v2038_v61 = vpop.permute.xlu2 %2037  ;;  %v1943_v20 = vpop.permute.xlu1 %1942 }
 0xaf3   :  { %v1953_v56 = vsel %vm335_vm7, %v1943_v20, 0 }
 0xaf4   :  { %1965 = vmatpush.bf16.xpose.msrb.mxu3 %v1953_v56 }
 0xafa   :  { %v1995_v6 = vpop.permute.xlu0 %1994  ;;  %v1879_v38 = vpop.permute.xlu2 %1878 }
 0xafb   :  { %v2006_v43 = vsel %vm335_vm7, %v1995_v6, 0  ;;  %3356 = vmatmul.msk.bf16.vlgmr.msrb.gmra.mxu3 %vm335_vm7, %v1939_v48  ;;  %v1993_v62 = vpop.permute.xlu1 %1992  ;;  %v1889_v8 = vsel %vm335_vm7, %v1879_v38, 0 }
 0xafc   :  { %2014 = vmatpush.bf16.xpose.msra.mxu1 %v2006_v43  ;;  %v2003_v26 = vsel %vm335_vm7, %v1993_v62, 0 }
 0xb02   :  { %v2044_v14 = vpop.permute.xlu0 %2043  ;;  %v1881_v13 = vpop.permute.xlu2 %1880 }
 0xb03   :  { %v2055_v58 = vsel %vm335_vm7, %v2044_v14, 0  ;;  %v1892_v16 = vsel %vm335_vm7, %v1881_v13, 0  ;;  %v1989_v2 = vpop.permute.xlu1 %1988 }
 0xb04   :  { %1900 = vmatpush.bf16.xpose.msra.mxu2 %v1892_v16  ;;  %2015 = vmatpush.bf16.xpose.msra.mxu1 %v2003_v26 }
 0xb05   :  { %2063 = vmatpush.bf16.xpose.msra.mxu0 %v2055_v58 }
 0xb0a   :  { %v2042_v17 = vpop.permute.xlu0 %2041  ;;  %v2040_v45 = vpop.permute.xlu2 %2039 }
 0xb0b   :  { %v2052_v22 = vsel %vm335_vm7, %v2042_v17, 0  ;;  %3358 = vmatmul.msk.bf16.vlgmr.msra.gmra.mxu1 %vm335_vm7, %v1989_v2 }
 0xb0c   :  { %1901 = vmatpush.bf16.xpose.msra.mxu2 %v1889_v8 }
 0xb0d   :  { %2064 = vmatpush.bf16.xpose.msra.mxu0 %v2052_v22 }
 0xb12   :  { %v1941_v15 = vpop.permute.xlu0 %1940  ;;  %v2271_v10 = vpop.permute.xlu2 %2270 }
 0xb13   :  { %v2174_v25 = vpop.permute.xlu1 %2173  ;;  %3354 = vmatmul.msk.bf16.vlgmr.msra.gmra.mxu2 %vm335_vm7, %v4753_v52  ;;  %3357 = vmatmul.msk.bf16.gmra.mxu3 %vm335_vm7, %v1941_v15  ;;  %v2281_v54 = vsel %vm335_vm7, %v2271_v10, 0 }
 0xb14   :  { %v2185_v11 = vsel %vm335_vm7, %v2174_v25, 0  ;;  %3360 = vmatmul.msk.bf16.vlgmr.msra.gmra.mxu0 %vm335_vm7, %v2038_v61 }
 0xb15   :  { %2193 = vmatpush.bf16.xpose.msra.mxu3 %v2185_v11 }
 0xb1a   :  { %v1991_v39 = vpop.permute.xlu0 %1990  ;;  %v2110_v12 = vpop.permute.xlu2 %2109 }
 0xb1b   :  { %v2121_v32 = vsel %vm335_vm7, %v2110_v12, 0  ;;  %v2224_v3 = vpop.permute.xlu1 %2223  ;;  %3359 = vmatmul.msk.bf16.gmra.mxu1 %vm335_vm7, %v1991_v39 }
 0xb1c   :  { %v2235_v40 = vsel %vm335_vm7, %v2224_v3, 0  ;;  %2129 = vmatpush.bf16.xpose.msrb.mxu2 %v2121_v32 }
 0xb1d   :  { %2243 = vmatpush.bf16.xpose.msrb.mxu1 %v2235_v40 }
 0xb22   :  { %v2172_v36 = vpop.permute.xlu0 %2171 }
 0xb23   :  { %v2182_v52 = vsel %vm335_vm7, %v2172_v36, 0  ;;  %v2273_v9 = vpop.permute.xlu1 %2272  ;;  %3355 = vmatmul.msk.bf16.gmra.mxu2 %vm335_vm7, %v4758_v28  ;;  %v2220_v28 = vpop.permute.xlu2 %2219 }
 0xb24   :  { %v2284_v50 = vsel %vm335_vm7, %v2273_v9, 0  ;;  %3361 = vmatmul.msk.bf16.gmra.mxu0 %vm335_vm7, %v2040_v45  ;;  %2194 = vmatpush.bf16.xpose.msra.mxu3 %v2182_v52 }
 0xb25   :  { %2292 = vmatpush.bf16.xpose.msrb.mxu0 %v2284_v50 }
 0xb2a   :  { %v2222_v59 = vpop.permute.xlu0 %2221 }
 0xb2b   :  { %v2232_v49 = vsel %vm335_vm7, %v2222_v59, 0  ;;  %v2168_v19 = vpop.permute.xlu1 %2167  ;;  %v1926_v24 = vpop.permute.xlu2 %1925 }
 0xb2c   :  { %3364 = vmatmul.msk.bf16.vlgmr.msra.gmra.mxu3 %vm335_vm7, %v2168_v19  ;;  %2244 = vmatpush.bf16.xpose.msrb.mxu1 %v2232_v49  ;;  %v2081_v35 = vsel %vm391_vm9, 0, %v1926_v24  ;;  %v1982_v48 = vsel %vm335_vm7, 0, %v1926_v24  ;;  %v2032_v6 = vsel %vm388_vm11, 0, %v1926_v24  ;;  %v1930_v39 = vsel %vm335_vm7, %v1926_v24, 0 }
 0xb2d   :  { %2293 = vmatpush.bf16.xpose.msrb.mxu0 %v2281_v54  ;;  %v2091_v31 = vrot.slane %v2081_v35, 4  ;;  %v1984_v56 = vsel %vm388_vm11, %v1982_v48, 0  ;;  %v2034_v62 = vsel %vm391_vm9, %v2032_v6, 0  ;;  %v1933_v40 = vsel %vm388_vm11, %v1930_v39, 0 }
 0xb2e   :  { %v1986_v14 = vsel %vm391_vm9, %v1984_v56, 0  ;;  %v1935_v59 = vsel %vm391_vm9, %v1933_v40, 0 }
 0xb2f   :  { %v2085_v16 = vrot.slane %v1986_v14, 4 }
 0xb32   :  { %v2218_v34 = vpop.permute.xlu0 %2217 }
 0xb33   :  { %v2267_v41 = vpop.permute.xlu1 %2266  ;;  %3366 = vmatmul.msk.bf16.vlgmr.msrb.gmra.mxu1 %vm335_vm7, %v2218_v34 }
 0xb34   :  { %3368 = vmatmul.msk.bf16.vlgmr.msrb.gmra.mxu0 %vm335_vm7, %v2267_v41 }
 0xb3a   :  { %v2170_v51 = vpop.permute.xlu0 %2169 }
 0xb3b   :  { %v2108_v21 = vpop.permute.xlu1 %2107 }
 0xb3c   :  { %v2118_v53 = vsel %vm335_vm7, %v2108_v21, 0  ;;  %3365 = vmatmul.msk.bf16.gmra.mxu3 %vm335_vm7, %v2170_v51 }
 0xb3d   :  { %2130 = vmatpush.bf16.xpose.msrb.mxu2 %v2118_v53 }
 0xb42   :  { %v2269_v47 = vpop.permute.xlu0 %2268 }
 0xb43   :  { %v1928_v57 = vpop.permute.xlu1 %1927  ;;  %3367 = vmatmul.msk.bf16.gmra.mxu1 %vm335_vm7, %v2220_v28 }
 0xb44   :  { %v2082_v7 = vsel %vm391_vm9, 0, %v1928_v57  ;;  %3362 = vmatmul.msk.bf16.vlgmr.msrb.gmra.mxu2 %vm335_vm7, %v4793_v30  ;;  %3369 = vmatmul.msk.bf16.gmra.mxu0 %vm335_vm7, %v2269_v47  ;;  %v2033_v29 = vsel %vm388_vm11, 0, %v1928_v57  ;;  %v1983_v60 = vsel %vm335_vm7, 0, %v1928_v57  ;;  %v1932_v43 = vsel %vm335_vm7, %v1928_v57, 0 }
 0xb45   :  { %v2092_v63 = vrot.slane %v2082_v7, 4  ;;  %v2036_v37 = vsel %vm391_vm9, %v2033_v29, 0  ;;  %v1985_v61 = vsel %vm388_vm11, %v1983_v60, 0  ;;  %v1934_v2 = vsel %vm388_vm11, %v1932_v43, 0 }
 0xb46   :  { %v2099_v30 = vsel %vm543_vm10, %v2036_v37, %v2091_v31  ;;  %v1987_v38 = vsel %vm391_vm9, %v1985_v61, 0  ;;  %v1937_v25 = vsel %vm391_vm9, %v1934_v2, 0 }
 0xb47   :  { %v2093_v44 = vsel %vm543_vm10, %v2091_v31, %v2092_v63  ;;  %v2086_v13 = vrot.slane %v1987_v38, 4  ;;  %v2096_v3 = vsel %vm543_vm10, %v1937_v25, %v2085_v16 }
 0xb48   :  { %2682 = vmatpush.bf16.msra.mxu2 %v2093_v44 }
 0xb49   :  { %v2087_v22 = vsel %vm543_vm10, %v2085_v16, %v2086_v13 }
 0xb4a   :  { %v2155_v20 = vpop.permute.xlu0 %2154 }
 0xb4b   :  { %v2310_v26 = vsel %vm391_vm9, 0, %v2155_v20  ;;  %v2211_v12 = vsel %vm335_vm7, 0, %v2155_v20  ;;  %v2261_v9 = vsel %vm388_vm11, 0, %v2155_v20  ;;  %v2159_v53 = vsel %vm335_vm7, %v2155_v20, 0 }
 0xb4c   :  { %2683 = vmatpush.bf16.msra.mxu2 %v2099_v30  ;;  %v2320_v45 = vrot.slane %v2310_v26, 4  ;;  %v2213_v36 = vsel %vm388_vm11, %v2211_v12, 0  ;;  %v2263_v54 = vsel %vm391_vm9, %v2261_v9, 0  ;;  %v2162_v35 = vsel %vm388_vm11, %v2159_v53, 0 }
 0xb4d   :  { %v2215_v19 = vsel %vm391_vm9, %v2213_v36, 0  ;;  %v2164_v47 = vsel %vm391_vm9, %v2162_v35, 0 }
 0xb4e   :  { %v2314_v41 = vrot.slane %v2215_v19, 4 }
 0xb50   :  { %2684 = vmatpush.bf16.msra.mxu2 %v2034_v62 }
 0xb52   :  { %v2157_v58 = vpop.permute.xlu0 %2156 }
 0xb53   :  { %v2311_v17 = vsel %vm391_vm9, 0, %v2157_v58  ;;  %v2262_v15 = vsel %vm388_vm11, 0, %v2157_v58  ;;  %v2212_v10 = vsel %vm335_vm7, 0, %v2157_v58  ;;  %v2161_v49 = vsel %vm335_vm7, %v2157_v58, 0 }
 0xb54   :  { %v2321_v8 = vrot.slane %v2311_v17, 4  ;;  %3363 = vmatmul.msk.bf16.gmra.mxu2 %vm335_vm7, %v4777_v23  ;;  %v2265_v32 = vsel %vm391_vm9, %v2262_v15, 0  ;;  %v2214_v23 = vsel %vm388_vm11, %v2212_v10, 0  ;;  %v2163_v28 = vsel %vm388_vm11, %v2161_v49, 0 }
 0xb55   :  { %2685 = vmatpush.bf16.msra.mxu2 %v2087_v22  ;;  %v2328_v52 = vsel %vm543_vm10, %v2265_v32, %v2320_v45  ;;  %v2216_v50 = vsel %vm391_vm9, %v2214_v23, 0  ;;  %v2166_v21 = vsel %vm391_vm9, %v2163_v28, 0 }
 0xb56   :  { %v2322_v11 = vsel %vm543_vm10, %v2320_v45, %v2321_v8  ;;  %v2315_v34 = vrot.slane %v2216_v50, 4  ;;  %v2325_v24 = vsel %vm543_vm10, %v2166_v21, %v2314_v41 }
 0xb57   :  { %2762 = vmatpush.bf16.msrb.mxu3 %v2322_v11 }
 0xb58   :  { %v2316_v51 = vsel %vm543_vm10, %v2314_v41, %v2315_v34 }
 0xb59   :  { %2686 = vmatpush.bf16.msra.mxu2 %v2096_v3 }
 0xb5b   :  { %2763 = vmatpush.bf16.msrb.mxu3 %v2328_v52 }
 0xb5d   :  { %2687 = vmatpush.bf16.msra.mxu2 %v1935_v59 }
 0xb5f   :  { %2764 = vmatpush.bf16.msrb.mxu3 %v2263_v54 }
 0xb63   :  { %2765 = vmatpush.bf16.msrb.mxu3 %v2316_v51 }
 0xb67   :  { %2766 = vmatpush.bf16.msrb.mxu3 %v2325_v24 }
 0xb6b   :  { %2767 = vmatpush.bf16.msrb.mxu3 %v2164_v47 }
 0xb7e   :  { %v1967_v57 = vpop.f32.mrf.mxu3 }
 0xb7f   :  { %v1976_v20 = vmul.f32 0.35355338, %v1967_v57 }
 0xb81   :  { %v4921_v13 = vadd.f32 %v1976_v20, %v4081_v0 }
 0xb83   :  { %v2339_v45 = vsel %vm391_vm9, %v4921_v13, -inf }
 0xb86   :  { %v1969_v60 = vpop.f32.mrf.mxu3 }
 0xb87   :  { %v1977_v12 = vmul.f32 0.35355338, %v1969_v60 }
 0xb88   :  { %v2017_v7 = vpop.f32.mrf.mxu1 }
 0xb89   :  { %v2026_v31 = vmul.f32 0.35355338, %v2017_v7  ;;  %v4943_v40 = vadd.f32 %v1977_v12, %v4081_v0 }
 0xb8b   :  { %v4908_v63 = vadd.f32 %v2026_v31, %v4081_v0  ;;  %v2342_v49 = vsel %vm391_vm9, %v4943_v40, -inf }
 0xb8d   :  { %v2348_v29 = vsel %vm391_vm9, %v4908_v63, -inf }
 0xb8e   :  { %2349 = vmax.xlane.f32.xlu0 %v2348_v29 }
 0xb90   :  { %v2019_v44 = vpop.f32.mrf.mxu1 }
 0xb91   :  { %v2066_v37 = vpop.f32.mrf.mxu0  ;;  %v2027_v58 = vmul.f32 0.35355338, %v2019_v44 }
 0xb92   :  { %v2075_v48 = vmul.f32 0.35355338, %v2066_v37 }
 0xb93   :  { %v4933_v15 = vadd.f32 %v2027_v58, %v4081_v0 }
 0xb94   :  { %v4913_v61 = vadd.f32 %v2075_v48, %v4081_v0 }
 0xb95   :  { %v2351_v32 = vsel %vm391_vm9, %v4933_v15, -inf }
 0xb96   :  { %v1903_v30 = vpop.f32.mrf.mxu2  ;;  %v2357_v56 = vsel %vm391_vm9, %v4913_v61, -inf  ;;  %v1972_v6 = vpop.f32.mrf.mxu3 }
 0xb97   :  { %v1912_v38 = vmul.f32 0.35355338, %v1903_v30  ;;  %2358 = vmax.xlane.f32.xlu1 %v2357_v56  ;;  %v1978_v37 = vmul.f32 0.35355338, %v1972_v6 }
 0xb98   :  { %v2022_v43 = vpop.f32.mrf.mxu1 }
 0xb99   :  { %v4918_v62 = vadd.f32 %v1912_v38, %v4081_v0  ;;  %v2068_v14 = vpop.f32.mrf.mxu0  ;;  %v2028_v50 = vmul.f32 0.35355338, %v2022_v43 }
 0xb9a   :  { %v2076_v26 = vmul.f32 0.35355338, %v2068_v14  ;;  %v4978_v14 = vadd.f32 %v1978_v37, %v4081_v0 }
 0xb9b   :  { %v2330_v16 = vsel %vm391_vm9, %v4918_v62, -inf  ;;  %v4953_v54 = vadd.f32 %v2028_v50, %v4081_v0 }
 0xb9c   :  { %v4926_v2 = vadd.f32 %v2076_v26, %v4081_v0  ;;  %2331 = vmax.xlane.f32.xlu2 %v2330_v16 }
 0xb9d   :  { %v2354_v24 = vsel %vm391_vm9, %v4953_v54, -inf }
 0xb9e   :  { %v1905_v17 = vpop.f32.mrf.mxu2  ;;  %v1974_v8 = vpop.f32.mrf.mxu3  ;;  %v2360_v22 = vsel %vm391_vm9, %v4926_v2, -inf }
 0xb9f   :  { %v1913_v10 = vmul.f32 0.35355338, %v1905_v17  ;;  %2340 = vmax.xlane.f32.xlu1 %v2339_v45  ;;  %2361 = vmax.xlane.f32.xlu0 %v2360_v22  ;;  %v2345_v45 = vsel %vm391_vm9, %v4978_v14, -inf }
 0xba0   :  { %v2024_v25 = vpop.f32.mrf.mxu1 }
 0xba1   :  { %v2071_v11 = vpop.f32.mrf.mxu0  ;;  %v4936_v39 = vadd.f32 %v1913_v10, %v4081_v0 }
 0xba2   :  { %v2077_v21 = vmul.f32 0.35355338, %v2071_v11 }
 0xba3   :  { %v2333_v3 = vsel %vm391_vm9, %v4936_v39, -inf }
 0xba4   :  { %2352 = vmax.xlane.f32.xlu2 %v2351_v32  ;;  %v4963_v57 = vadd.f32 %v2077_v21, %v4081_v0 }
 0xba6   :  { %v1908_v23 = vpop.f32.mrf.mxu2  ;;  %v2363_v20 = vsel %vm391_vm9, %v4963_v57, -inf }
 0xba7   :  { %v1914_v36 = vmul.f32 0.35355338, %v1908_v23  ;;  %2334 = vmax.xlane.f32.xlu1 %v2333_v3 }
 0xba9   :  { %v4946_v52 = vadd.f32 %v1914_v36, %v4081_v0  ;;  %v2073_v9 = vpop.f32.mrf.mxu0 }
 0xbab   :  { %v2336_v59 = vsel %vm391_vm9, %v4946_v52, -inf }
 0xbac   :  { %2337 = vmax.xlane.f32.xlu0 %v2336_v59  ;;  %2343 = vmax.xlane.f32.xlu2 %v2342_v49 }
 0xbae   :  { %v1910_v19 = vpop.f32.mrf.mxu2 }
 0xbaf   :  { %v2196_v34 = vpop.f32.mrf.mxu3 }
 0xbb0   :  { %v2246_v41 = vpop.f32.mrf.mxu1  ;;  %v2205_v30 = vmul.f32 0.35355338, %v2196_v34 }
 0xbb1   :  { %v2255_v28 = vmul.f32 0.35355338, %v2246_v41  ;;  %v2295_v51 = vpop.f32.mrf.mxu0 }
 0xbb2   :  { %v2304_v35 = vmul.f32 0.35355338, %v2295_v51  ;;  %v4981_v58 = vadd.f32 %v2205_v30, %v4081_v0 }
 0xbb3   :  { %v4956_v53 = vadd.f32 %v2255_v28, %v4081_v0 }
 0xbb4   :  { %2355 = vmax.xlane.f32.xlu2 %v2354_v24  ;;  %v4966_v29 = vadd.f32 %v2304_v35, %v4081_v0  ;;  %v2375_v22 = vsel %vm391_vm9, %v4981_v58, -inf }
 0xbb5   :  { %v2384_v47 = vsel %vm391_vm9, %v4956_v53, -inf }
 0xbb6   :  { %2385 = vmax.xlane.f32.xlu1 %v2384_v47  ;;  %v2393_v43 = vsel %vm391_vm9, %v4966_v29, -inf }
 0xbb7   :  { %v2198_v7 = vpop.f32.mrf.mxu3 }
 0xbb8   :  { %v2248_v31 = vpop.f32.mrf.mxu1  ;;  %v2206_v8 = vmul.f32 0.35355338, %v2198_v7 }
 0xbb9   :  { %v2256_v60 = vmul.f32 0.35355338, %v2248_v31  ;;  %v2297_v44 = vpop.f32.mrf.mxu0 }
 0xbba   :  { %v2305_v56 = vmul.f32 0.35355338, %v2297_v44  ;;  %v4993_v23 = vadd.f32 %v2206_v8, %v4081_v0 }
 0xbbb   :  { %v4969_v48 = vadd.f32 %v2256_v60, %v4081_v0 }
 0xbbc   :  { %2364 = vmax.xlane.f32.xlu2 %v2363_v20  ;;  %v4984_v16 = vadd.f32 %v2305_v56, %v4081_v0  ;;  %v2378_v49 = vsel %vm391_vm9, %v4993_v23, -inf }
 0xbbd   :  { %v2387_v38 = vsel %vm391_vm9, %v4969_v48, -inf }
 0xbbe   :  { %2388 = vmax.xlane.f32.xlu0 %v2387_v38  ;;  %2394 = vmax.xlane.f32.xlu1 %v2393_v43  ;;  %v2396_v10 = vsel %vm391_vm9, %v4984_v16, -inf }
 0xbbf   :  { %v2201_v6 = vpop.f32.mrf.mxu3 }
 0xbc0   :  { %v2251_v26 = vpop.f32.mrf.mxu1  ;;  %v2207_v59 = vmul.f32 0.35355338, %v2201_v6 }
 0xbc1   :  { %v2300_v17 = vpop.f32.mrf.mxu0  ;;  %v2257_v9 = vmul.f32 0.35355338, %v2251_v26 }
 0xbc2   :  { %v5006_v28 = vadd.f32 %v2207_v59, %v4081_v0  ;;  %v2306_v21 = vmul.f32 0.35355338, %v2300_v17 }
 0xbc3   :  { %v5003_v34 = vadd.f32 %v2257_v9, %v4081_v0 }
 0xbc4   :  { %2346 = vmax.xlane.f32.xlu2 %v2345_v45  ;;  %v2381_v47 = vsel %vm391_vm9, %v5006_v28, -inf  ;;  %v5018_v31 = vadd.f32 %v2306_v21, %v4081_v0 }
 0xbc5   :  { %v2390_v24 = vsel %vm391_vm9, %v5003_v34, -inf }
 0xbc6   :  { %2376 = vmax.xlane.f32.xlu1 %v2375_v22  ;;  %2397 = vmax.xlane.f32.xlu0 %v2396_v10  ;;  %v2399_v37 = vsel %vm391_vm9, %v5018_v31, -inf }
 0xbc7   :  { %v2203_v25 = vpop.f32.mrf.mxu3  ;;  %v2132_v11 = vpop.f32.mrf.mxu2 }
 0xbc8   :  { %v2141_v12 = vmul.f32 0.35355338, %v2132_v11  ;;  %v2253_v32 = vpop.f32.mrf.mxu1 }
 0xbc9   :  { %v2302_v3 = vpop.f32.mrf.mxu0 }
 0xbca   :  { %v4996_v36 = vadd.f32 %v2141_v12, %v4081_v0 }
 0xbcc   :  { %v2366_v50 = vsel %vm391_vm9, %v4996_v36, -inf }
 0xbcd   :  { %2367 = vmax.xlane.f32.xlu2 %v2366_v50 }
 0xbce   :  { %2379 = vmax.xlane.f32.xlu0 %v2378_v49 }
 0xbcf   :  { %v2134_v19 = vpop.f32.mrf.mxu2 }
 0xbd0   :  { %v2142_v41 = vmul.f32 0.35355338, %v2134_v19 }
 0xbd2   :  { %v5009_v51 = vadd.f32 %v2142_v41, %v4081_v0 }
 0xbd4   :  { %v2369_v35 = vsel %vm391_vm9, %v5009_v51, -inf }
 0xbd5   :  { %2391 = vmax.xlane.f32.xlu2 %v2390_v24  ;;  %2370 = vmax.xlane.f32.xlu1 %v2369_v35 }
 0xbd6   :  { %2382 = vmax.xlane.f32.xlu0 %v2381_v47 }
 0xbd7   :  { %v2137_v7 = vpop.f32.mrf.mxu2 }
 0xbd8   :  { %v2143_v60 = vmul.f32 0.35355338, %v2137_v7 }
 0xbda   :  { %v5021_v44 = vadd.f32 %v2143_v60, %v4081_v0 }
 0xbdc   :  { %v2372_v20 = vsel %vm391_vm9, %v5021_v44, -inf }
 0xbdd   :  { %2400 = vmax.xlane.f32.xlu1 %v2399_v37 }
 0xbde   :  { %2373 = vmax.xlane.f32.xlu0 %v2372_v20 }
 0xbdf   :  { %v2139_v30 = vpop.f32.mrf.mxu2 }
 0xc01   :  { %v2350_v56 = vpop.xlane.xlu0 %2349 }
 0xc02   :  { %v2408_v38 = vsub.f32 %v4908_v63, %v2350_v56 }
 0xc04   :  { %v2438_v43 = vmul.f32 1.442695, %v2408_v38 }
 0xc06   :  { %3632 = vpow2.f32 %v2438_v43 }
 0xc0a   :  { %v2359_v6 = vpop.xlane.xlu1 %2358 }
 0xc0b   :  { %v2411_v26 = vsub.f32 %v4913_v61, %v2359_v6 }
 0xc0c   :  { %v5029_v17 = vpop.eup %3632 }
 0xc0d   :  { %v2444_v0 = vmul.f32 1.442695, %v2411_v26  ;;  %v2492_v45 = vsel %vm391_vm9, %v5029_v17, 0.0 }
 0xc0e   :  { %2493 = vadd.xlane.f32.xlu1 %v2492_v45 }
 0xc0f   :  { %3634 = vpow2.f32 %v2444_v0  ;;  %v2332_v8 = vpop.xlane.xlu2 %2331 }
 0xc10   :  { %v2402_v61 = vsub.f32 %v4918_v62, %v2332_v8 }
 0xc12   :  { %v2362_v22 = vpop.xlane.xlu0 %2361  ;;  %v2341_v10 = vpop.xlane.xlu1 %2340  ;;  %v2426_v50 = vmul.f32 1.442695, %v2402_v61 }
 0xc13   :  { %v2412_v25 = vsub.f32 %v4926_v2, %v2362_v22  ;;  %v2405_v63 = vsub.f32 %v4921_v13, %v2341_v10 }
 0xc15   :  { %v5035_v11 = vpop.eup %3634  ;;  %v2446_v12 = vmul.f32 1.442695, %v2412_v25  ;;  %v2432_v32 = vmul.f32 1.442695, %v2405_v63 }
 0xc16   :  { %v2501_v3 = vsel %vm391_vm9, %v5035_v11, 0.0 }
 0xc17   :  { %3636 = vpow2.f32 %v2446_v12  ;;  %2502 = vadd.xlane.f32.xlu2 %v2501_v3  ;;  %v2353_v9 = vpop.xlane.xlu2 %2352 }
 0xc18   :  { %3638 = vpow2.f32 %v2432_v32  ;;  %v2409_v13 = vsub.f32 %v4933_v15, %v2353_v9 }
 0xc19   :  { %3640 = vpow2.f32 %v2426_v50 }
 0xc1a   :  { %v2335_v35 = vpop.xlane.xlu1 %2334  ;;  %v2440_v47 = vmul.f32 1.442695, %v2409_v13 }
 0xc1b   :  { %v2403_v15 = vsub.f32 %v4936_v39, %v2335_v35 }
 0xc1d   :  { %v5040_v59 = vpop.eup %3636  ;;  %v2428_v56 = vmul.f32 1.442695, %v2403_v15 }
 0xc1e   :  { %v5042_v49 = vpop.eup %3638  ;;  %v2504_v2 = vsel %vm391_vm9, %v5040_v59, 0.0 }
 0xc1f   :  { %2505 = vadd.xlane.f32.xlu1 %v2504_v2  ;;  %v2483_v62 = vsel %vm391_vm9, %v5042_v49, 0.0  ;;  %v2338_v19 = vpop.xlane.xlu0 %2337  ;;  %v2344_v41 = vpop.xlane.xlu2 %2343 }
 0xc20   :  { %2484 = vadd.xlane.f32.xlu0 %v2483_v62  ;;  %v2404_v21 = vsub.f32 %v4946_v52, %v2338_v19  ;;  %v2406_v24 = vsub.f32 %v4943_v40, %v2344_v41  ;;  %v5051_v37 = vpop.eup %3640 }
 0xc21   :  { %v2474_v20 = vsel %vm391_vm9, %v5051_v37, 0.0 }
 0xc22   :  { %v2430_v7 = vmul.f32 1.442695, %v2404_v21  ;;  %v2434_v60 = vmul.f32 1.442695, %v2406_v24 }
 0xc24   :  { %3642 = vpow2.f32 %v2430_v7 }
 0xc25   :  { %3644 = vpow2.f32 %v2434_v60 }
 0xc26   :  { %3646 = vpow2.f32 %v2440_v47 }
 0xc27   :  { %v2356_v30 = vpop.xlane.xlu2 %2355  ;;  %3648 = vpow2.f32 %v2428_v56 }
 0xc28   :  { %2475 = vadd.xlane.f32.xlu0 %v2474_v20  ;;  %v2410_v45 = vsub.f32 %v4953_v54, %v2356_v30 }
 0xc29   :  { %v2386_v52 = vpop.xlane.xlu1 %2385 }
 0xc2a   :  { %v5056_v38 = vpop.eup %3642  ;;  %v2420_v40 = vsub.f32 %v4956_v53, %v2386_v52  ;;  %v2442_v22 = vmul.f32 1.442695, %v2410_v45 }
 0xc2b   :  { %v5059_v43 = vpop.eup %3644  ;;  %v2480_v6 = vsel %vm391_vm9, %v5056_v38, 0.0 }
 0xc2c   :  { %v5063_v26 = vpop.eup %3646  ;;  %v2462_v39 = vmul.f32 1.442695, %v2420_v40  ;;  %2481 = vadd.xlane.f32.xlu1 %v2480_v6  ;;  %v2486_v0 = vsel %vm391_vm9, %v5059_v43, 0.0 }
 0xc2d   :  { %2487 = vadd.xlane.f32.xlu2 %v2486_v0  ;;  %v2495_v53 = vsel %vm391_vm9, %v5063_v26, 0.0  ;;  %v5072_v32 = vpop.eup %3648 }
 0xc2e   :  { %3650 = vpow2.f32 %v2462_v39 }
 0xc2f   :  { %v2365_v8 = vpop.xlane.xlu2 %2364  ;;  %3652 = vpow2.f32 %v2442_v22 }
 0xc30   :  { %2496 = vadd.xlane.f32.xlu0 %v2495_v53  ;;  %v2413_v9 = vsub.f32 %v4963_v57, %v2365_v8 }
 0xc31   :  { %v2389_v10 = vpop.xlane.xlu0 %2388  ;;  %v2395_v25 = vpop.xlane.xlu1 %2394 }
 0xc32   :  { %v2421_v63 = vsub.f32 %v4969_v48, %v2389_v10  ;;  %v2423_v12 = vsub.f32 %v4966_v29, %v2395_v25  ;;  %v2477_v48 = vsel %vm391_vm9, %v5072_v32, 0.0  ;;  %v2448_v29 = vmul.f32 1.442695, %v2413_v9 }
 0xc34   :  { %v5074_v61 = vpop.eup %3650  ;;  %v2464_v3 = vmul.f32 1.442695, %v2421_v63  ;;  %v2468_v54 = vmul.f32 1.442695, %v2423_v12 }
 0xc35   :  { %v2528_v50 = vsel %vm391_vm9, %v5074_v61, 0.0  ;;  %v5083_v21 = vpop.eup %3652 }
 0xc36   :  { %3654 = vpow2.f32 %v2464_v3  ;;  %2529 = vadd.xlane.f32.xlu2 %v2528_v50 }
 0xc37   :  { %3656 = vpow2.f32 %v2468_v54  ;;  %v2347_v13 = vpop.xlane.xlu2 %2346 }
 0xc38   :  { %2478 = vadd.xlane.f32.xlu0 %v2477_v48  ;;  %3658 = vpow2.f32 %v2448_v29  ;;  %v2407_v7 = vsub.f32 %v4978_v14, %v2347_v13 }
 0xc39   :  { %v2398_v2 = vpop.xlane.xlu0 %2397  ;;  %v2377_v62 = vpop.xlane.xlu1 %2376 }
 0xc3a   :  { %v2424_v19 = vsub.f32 %v4984_v16, %v2398_v2  ;;  %v2417_v41 = vsub.f32 %v4981_v58, %v2377_v62  ;;  %v2498_v58 = vsel %vm391_vm9, %v5083_v21, 0.0  ;;  %v2436_v20 = vmul.f32 1.442695, %v2407_v7 }
 0xc3c   :  { %v5085_v57 = vpop.eup %3654  ;;  %v2470_v24 = vmul.f32 1.442695, %v2424_v19  ;;  %v2456_v35 = vmul.f32 1.442695, %v2417_v41 }
 0xc3d   :  { %v5087_v47 = vpop.eup %3656  ;;  %v2531_v60 = vsel %vm391_vm9, %v5085_v57, 0.0 }
 0xc3e   :  { %3660 = vpow2.f32 %v2470_v24  ;;  %2532 = vadd.xlane.f32.xlu1 %v2531_v60  ;;  %v2537_v16 = vsel %vm391_vm9, %v5087_v47, 0.0  ;;  %v5099_v56 = vpop.eup %3658 }
 0xc3f   :  { %3662 = vpow2.f32 %v2456_v35  ;;  %2538 = vadd.xlane.f32.xlu2 %v2537_v16  ;;  %v2507_v45 = vsel %vm391_vm9, %v5099_v56, 0.0 }
 0xc40   :  { %2499 = vadd.xlane.f32.xlu0 %v2498_v58  ;;  %v5096_v15 = vpop.xlane.xlu2 %2367  ;;  %3664 = vpow2.f32 %v2436_v20 }
 0xc41   :  { %v2380_v30 = vpop.xlane.xlu0 %2379 }
 0xc42   :  { %v2418_v14 = vsub.f32 %v4993_v23, %v2380_v30 }
 0xc44   :  { %v5101_v52 = vpop.eup %3660  ;;  %v2458_v40 = vmul.f32 1.442695, %v2418_v14 }
 0xc45   :  { %v5103_v6 = vpop.eup %3662  ;;  %v2540_v39 = vsel %vm391_vm9, %v5101_v52, 0.0 }
 0xc46   :  { %3666 = vpow2.f32 %v2458_v40  ;;  %2541 = vadd.xlane.f32.xlu1 %v2540_v39  ;;  %v2519_v0 = vsel %vm391_vm9, %v5103_v6, 0.0  ;;  %v5113_v25 = vpop.eup %3664 }
 0xc47   :  { %2520 = vadd.xlane.f32.xlu2 %v2519_v0  ;;  %v2489_v9 = vsel %vm391_vm9, %v5113_v25, 0.0 }
 0xc48   :  { %2508 = vadd.xlane.f32.xlu0 %v2507_v45  ;;  %v2392_v23 = vpop.xlane.xlu2 %2391  ;;  %v2371_v53 = vpop.xlane.xlu1 %2370 }
 0xc49   :  { %v2422_v8 = vsub.f32 %v5003_v34, %v2392_v23  ;;  %v2383_v22 = vpop.xlane.xlu0 %2382  ;;  %v2415_v48 = vsub.f32 %v5009_v51, %v2371_v53 }
 0xc4a   :  { %v2419_v10 = vsub.f32 %v5006_v28, %v2383_v22 }
 0xc4b   :  { %v2466_v63 = vmul.f32 1.442695, %v2422_v8  ;;  %v2452_v19 = vmul.f32 1.442695, %v2415_v48 }
 0xc4c   :  { %v5115_v12 = vpop.eup %3666  ;;  %v2460_v3 = vmul.f32 1.442695, %v2419_v10 }
 0xc4d   :  { %3668 = vpow2.f32 %v2466_v63  ;;  %v2522_v54 = vsel %vm391_vm9, %v5115_v12, 0.0 }
 0xc4e   :  { %2523 = vadd.xlane.f32.xlu1 %v2522_v54  ;;  %3670 = vpow2.f32 %v2460_v3 }
 0xc50   :  { %2490 = vadd.xlane.f32.xlu0 %v2489_v9  ;;  %v2401_v34 = vpop.xlane.xlu1 %2400 }
 0xc51   :  { %v2425_v50 = vsub.f32 %v5018_v31, %v2401_v34  ;;  %v2374_v41 = vpop.xlane.xlu0 %2373 }
 0xc52   :  { %v2416_v31 = vsub.f32 %v5021_v44, %v2374_v41 }
 0xc53   :  { %v5122_v28 = vpop.eup %3668  ;;  %v2472_v13 = vmul.f32 1.442695, %v2425_v50 }
 0xc54   :  { %v2534_v29 = vsel %vm391_vm9, %v5122_v28, 0.0  ;;  %v5127_v2 = vpop.eup %3670  ;;  %v2454_v35 = vmul.f32 1.442695, %v2416_v31 }
 0xc55   :  { %3672 = vpow2.f32 %v2472_v13  ;;  %2535 = vadd.xlane.f32.xlu2 %v2534_v29  ;;  %v2525_v62 = vsel %vm391_vm9, %v5127_v2, 0.0 }
 0xc56   :  { %3674 = vpow2.f32 %v2452_v19 }
 0xc57   :  { %3676 = vpow2.f32 %v2454_v35 }
 0xc58   :  { %2526 = vadd.xlane.f32.xlu0 %v2525_v62 }
 0xc5b   :  { %v5131_v24 = vpop.eup %3672 }
 0xc5c   :  { %v2543_v51 = vsel %vm391_vm9, %v5131_v24, 0.0  ;;  %v5136_v7 = vpop.eup %3674 }
 0xc5d   :  { %2544 = vadd.xlane.f32.xlu1 %v2543_v51  ;;  %v2513_v60 = vsel %vm391_vm9, %v5136_v7, 0.0  ;;  %v5140_v16 = vpop.eup %3676 }
 0xc5e   :  { %v2516_v58 = vsel %vm391_vm9, %v5140_v16, 0.0 }
 0xc65   :  { %2514 = vadd.xlane.f32.xlu1 %v2513_v60 }
 0xc6d   :  { %2517 = vadd.xlane.f32.xlu1 %v2516_v58 }
 0xc81   :  { %v2494_v20 = vpop.xlane.xlu1 %2493 }
 0xc8a   :  { %v2503_v44 = vpop.xlane.xlu2 %2502 }
 0xc8b   :  { %3678 = vrcp.f32 %v2503_v44 }
 0xc91   :  { %v3679_v14 = vpop.eup %3678 }
 0xc92   :  { %v2506_v30 = vpop.xlane.xlu1 %2505  ;;  %v2579_v39 = vmul.f32 %v3679_v14, %v5035_v11 }
 0xc93   :  { %v2485_v40 = vpop.xlane.xlu0 %2484  ;;  %3680 = vrcp.f32 %v2506_v30 }
 0xc94   :  { %v2603_v45 = vpack.c.bf16 %v2579_v39, %v2579_v39  ;;  %3682 = vrcp.f32 %v2485_v40 }
 0xc95   :  { %3684 = vrcp.f32 %v2494_v20 }
 0xc96   :  { %v2653_v22 = vunpack.c.l.b16 %v2603_v45 }
 0xc99   :  { %v3681_v0 = vpop.eup %3680 }
 0xc9a   :  { %v2580_v23 = vmul.f32 %v3681_v0, %v5040_v59  ;;  %v3683_v54 = vpop.eup %3682 }
 0xc9b   :  { %v2476_v53 = vpop.xlane.xlu0 %2475  ;;  %v3685_v34 = vpop.eup %3684  ;;  %v2573_v11 = vmul.f32 %v3683_v54, %v5042_v49 }
 0xc9c   :  { %v2604_v8 = vpack.c.bf16 %v2580_v23, %v2580_v23  ;;  %v2576_v59 = vmul.f32 %v3685_v34, %v5029_v17 }
 0xc9d   :  { %v2597_v48 = vpack.c.bf16 %v2573_v11, %v2573_v11 }
 0xc9e   :  { %v2654_v10 = vunpack.c.l.b16 %v2604_v8  ;;  %v2600_v31 = vpack.c.bf16 %v2576_v59, %v2576_v59 }
 0xc9f   :  { %v5150_v29 = vpop.xlane.xlu1 %2481  ;;  %v2629_v58 = vunpack.c.l.b16 %v2597_v48 }
 0xca0   :  { %v2488_v63 = vpop.xlane.xlu2 %2487  ;;  %v2656_v3 = vpack.c.b16 %v2654_v10, %v2653_v22  ;;  %v2641_v30 = vunpack.c.l.b16 %v2600_v31  ;;  %v2414_v31 = vsub.f32 %v4996_v36, %v5096_v15 }
 0xca1   :  { %3686 = vrcp.f32 %v2488_v63 }
 0xca2   :  { %2658 = vrot.lane.b32.xlu0 %v2656_v3, %s3784_s15 }
 0xca3   :  { %v2497_v9 = vpop.xlane.xlu0 %2496 }
 0xca4   :  { %3688 = vrcp.f32 %v2497_v9 }
 0xca5   :  { %3690 = vrcp.f32 %v2476_v53 }
 0xca7   :  { %v3687_v50 = vpop.eup %3686 }
 0xca8   :  { %v2574_v13 = vmul.f32 %v3687_v50, %v5059_v43 }
 0xca9   :  { %v2530_v62 = vpop.xlane.xlu2 %2529 }
 0xcaa   :  { %v3689_v19 = vpop.eup %3688  ;;  %v2598_v41 = vpack.c.bf16 %v2574_v13, %v2574_v13 }
 0xcab   :  { %v2577_v51 = vmul.f32 %v3689_v19, %v5063_v26  ;;  %v2479_v35 = vpop.xlane.xlu0 %2478  ;;  %v3691_v60 = vpop.eup %3690 }
 0xcac   :  { %v2630_v49 = vunpack.c.l.b16 %v2598_v41  ;;  %3692 = vrcp.f32 %v2479_v35  ;;  %v2570_v17 = vmul.f32 %v3691_v60, %v5051_v37 }
 0xcad   :  { %v2601_v20 = vpack.c.bf16 %v2577_v51, %v2577_v51 }
 0xcae   :  { %v2632_v44 = vpack.c.b16 %v2630_v49, %v2629_v58  ;;  %v2594_v45 = vpack.c.bf16 %v2570_v17, %v2570_v17  ;;  %v2450_v17 = vmul.f32 1.442695, %v2414_v31 }
 0xcaf   :  { %v2642_v14 = vunpack.c.l.b16 %v2601_v20 }
 0xcb0   :  { %2634 = vrot.lane.b32.xlu0 %v2632_v44, %s3793_s23  ;;  %v5157_v8 = vunpack.c.l.b16 %v2594_v45 }
 0xcb1   :  { %v2644_v43 = vpack.c.b16 %v2642_v14, %v2641_v30  ;;  %v2533_v40 = vpop.xlane.xlu1 %2532 }
 0xcb2   :  { %v3693_v39 = vpop.eup %3692  ;;  %v2539_v0 = vpop.xlane.xlu2 %2538 }
 0xcb3   :  { %v2571_v26 = vmul.f32 %v3693_v39, %v5072_v32  ;;  %v2500_v23 = vpop.xlane.xlu0 %2499  ;;  %2646 = vrot.lane.b32.xlu2 %v2644_v43, %s3792_s22 }
 0xcb4   :  { %3694 = vrcp.f32 %v2500_v23 }
 0xcb5   :  { %v2595_v53 = vpack.c.bf16 %v2571_v26, %v2571_v26 }
 0xcb7   :  { %v5159_v22 = vunpack.c.l.b16 %v2595_v53 }
 0xcb9   :  { %v2542_v37 = vpop.xlane.xlu1 %2541  ;;  %v2624_v10 = vpack.c.b16 %v5159_v22, %v5157_v8 }
 0xcba   :  { %v3695_v63 = vpop.eup %3694  ;;  %v2521_v3 = vpop.xlane.xlu2 %2520 }
 0xcbb   :  { %v2578_v54 = vmul.f32 %v3695_v63, %v5083_v21  ;;  %v2509_v9 = vpop.xlane.xlu0 %2508  ;;  %3696 = vrcp.f32 %v2521_v3 }
 0xcbc   :  { %3698 = vrcp.f32 %v2533_v40 }
 0xcbd   :  { %v2602_v32 = vpack.c.bf16 %v2578_v54, %v2578_v54  ;;  %3700 = vrcp.f32 %v2542_v37 }
 0xcbf   :  { %v2643_v34 = vunpack.c.l.b16 %v2602_v32 }
 0xcc1   :  { %v2645_v11 = vpack.c.b16 %v2643_v34, %v2643_v34  ;;  %v2524_v50 = vpop.xlane.xlu1 %2523  ;;  %v3697_v59 = vpop.eup %3696 }
 0xcc2   :  { %3702 = vrcp.f32 %v2524_v50  ;;  %v2585_v13 = vmul.f32 %v3697_v59, %v5103_v6  ;;  %v3699_v19 = vpop.eup %3698 }
 0xcc3   :  { %3704 = vrcp.f32 %v2539_v0  ;;  %v2491_v48 = vpop.xlane.xlu0 %2490  ;;  %2648 = vrot.lane.b32.xlu2 %v2645_v11, %s3792_s22  ;;  %v3701_v21 = vpop.eup %3700  ;;  %v2589_v6 = vmul.f32 %v3699_v19, %v5085_v57 }
 0xcc4   :  { %3706 = vrcp.f32 %v2491_v48  ;;  %v2609_v35 = vpack.c.bf16 %v2585_v13, %v2585_v13  ;;  %v2592_v49 = vmul.f32 %v3701_v21, %v5101_v52 }
 0xcc5   :  { %3708 = vrcp.f32 %v2530_v62 }
 0xcc6   :  { %3710 = vrcp.f32 %v2509_v9  ;;  %v2709_v14 = vunpack.c.l.b16 %v2609_v35  ;;  %v2616_v40 = vpack.c.bf16 %v2592_v49, %v2592_v49 }
 0xcc7   :  { %3712 = vpow2.f32 %v2450_v17 }
 0xcc8   :  { %v3703_v41 = vpop.eup %3702  ;;  %v2536_v45 = vpop.xlane.xlu2 %2535 }
 0xcc9   :  { %v3705_v51 = vpop.eup %3704  ;;  %v2586_v60 = vmul.f32 %v3703_v41, %v5115_v12 }
 0xcca   :  { %v3707_v58 = vpop.eup %3706  ;;  %v2591_v62 = vmul.f32 %v3705_v51, %v5087_v47  ;;  %v2734_v47 = vunpack.c.l.b16 %v2616_v40 }
 0xccb   :  { %v2575_v20 = vmul.f32 %v3707_v58, %v5113_v25  ;;  %v2610_v44 = vpack.c.bf16 %v2586_v60, %v2586_v60  ;;  %v3709_v30 = vpop.eup %3708  ;;  %v2613_v25 = vpack.c.bf16 %v2589_v6, %v2589_v6  ;;  %v2527_v53 = vpop.xlane.xlu0 %2526 }
 0xccc   :  { %v2588_v15 = vmul.f32 %v3709_v30, %v5074_v61  ;;  %v2615_v0 = vpack.c.bf16 %v2591_v62, %v2591_v62  ;;  %v3711_v57 = vpop.eup %3710 }
 0xccd   :  { %v2599_v43 = vpack.c.bf16 %v2575_v20, %v2575_v20  ;;  %v2710_v36 = vunpack.c.l.b16 %v2610_v44  ;;  %v2722_v37 = vunpack.c.l.b16 %v2613_v25  ;;  %v2581_v63 = vmul.f32 %v3711_v57, %v5099_v56  ;;  %v5177_v3 = vpop.eup %3712 }
 0xcce   :  { %v2612_v23 = vpack.c.bf16 %v2588_v15, %v2588_v15  ;;  %v2733_v61 = vunpack.c.l.b16 %v2615_v0  ;;  %v2510_v50 = vsel %vm391_vm9, %v5177_v3, 0.0 }
 0xccf   :  { %v2631_v12 = vunpack.c.l.b16 %v2599_v43  ;;  %v2712_v39 = vpack.c.b16 %v2710_v36, %v2709_v14  ;;  %v2605_v11 = vpack.c.bf16 %v2581_v63, %v2581_v63 }
 0xcd0   :  { %v2545_v52 = vpop.xlane.xlu1 %2544  ;;  %v2721_v9 = vunpack.c.l.b16 %v2612_v23  ;;  %v2736_v32 = vpack.c.b16 %v2734_v47, %v2733_v61 }
 0xcd1   :  { %3714 = vrcp.f32 %v2545_v52  ;;  %v2633_v26 = vpack.c.b16 %v2631_v12, %v2631_v12  ;;  %2714 = vrot.lane.b32.xlu1 %v2712_v39, %s3793_s23  ;;  %v2655_v41 = vunpack.c.l.b16 %v2605_v11 }
 0xcd2   :  { %3716 = vrcp.f32 %v2536_v45  ;;  %v2724_v59 = vpack.c.b16 %v2722_v37, %v2721_v9 }
 0xcd3   :  { %2636 = vrot.lane.b32.xlu2 %v2633_v26, %s3793_s23  ;;  %3718 = vrcp.f32 %v2527_v53  ;;  %v2657_v35 = vpack.c.b16 %v2655_v41, %v2655_v41  ;;  %v3457_v41 = vld [vmem:[%s5360_s1 + $0xa0] sm:$0xff] }
 0xcd4   :  { %3720 = vrcp.f32 %v5150_v29  ;;  %2808 = vmatpush.bf16.msra.mxu1 %v3457_v41 }
 0xcd7   :  { %v3715_v54 = vpop.eup %3714 }
 0xcd8   :  { %v2593_v34 = vmul.f32 %v3715_v54, %v5131_v24  ;;  %v3717_v48 = vpop.eup %3716  ;;  %v2515_v52 = vpop.xlane.xlu1 %2514 }
 0xcd9   :  { %2738 = vrot.lane.b32.xlu1 %v2736_v32, %s3784_s15  ;;  %v3719_v19 = vpop.eup %3718  ;;  %v2590_v21 = vmul.f32 %v3717_v48, %v5122_v28  ;;  %3722 = vrcp.f32 %v2515_v52 }
 0xcda   :  { %v2617_v13 = vpack.c.bf16 %v2593_v34, %v2593_v34  ;;  %2511 = vadd.xlane.f32.xlu0 %v2510_v50  ;;  %v2587_v24 = vmul.f32 %v3719_v19, %v5127_v2  ;;  %v3721_v43 = vpop.eup %3720 }
 0xcdb   :  { %2726 = vrot.lane.b32.xlu2 %v2724_v59, %s3792_s22  ;;  %v2614_v51 = vpack.c.bf16 %v2590_v21, %v2590_v21 }
 0xcdc   :  { %v2735_v56 = vunpack.c.l.b16 %v2617_v13  ;;  %v2611_v60 = vpack.c.bf16 %v2587_v24, %v2587_v24 }
 0xcdd   :  { %v2723_v58 = vunpack.c.l.b16 %v2614_v51 }
 0xcde   :  { %v2737_v31 = vpack.c.b16 %v2735_v56, %v2735_v56  ;;  %v2711_v49 = vunpack.c.l.b16 %v2611_v60 }
 0xcdf   :  { %v2725_v20 = vpack.c.b16 %v2723_v58, %v2723_v58  ;;  %v3723_v45 = vpop.eup %3722 }
 0xce0   :  { %v2713_v44 = vpack.c.b16 %v2711_v49, %v2711_v49  ;;  %v2518_v0 = vpop.xlane.xlu1 %2517 }
 0xce1   :  { %2740 = vrot.lane.b32.xlu1 %v2737_v31, %s3784_s15  ;;  %v3456_v31 = vld [vmem:[%s5360_s1 + $0x98] sm:$0xff] }
 0xce2   :  { %2809 = vmatpush.bf16.msra.mxu1 %v3456_v31 }
 0xce3   :  { %2660 = vrot.lane.b32.xlu2 %v2657_v35, %s3784_s15 }
 0xceb   :  { %2728 = vrot.lane.b32.xlu2 %v2725_v20, %s3792_s22 }
 0xcee   :  { %2716 = vrot.lane.b32.xlu0 %v2713_v44, %s3793_s23 }
 0xcf3   :  { %2833 = vrot.lane.b32.xlu2 %v4749_v1, %s3794_s24  ;;  %v2572_v1 = vmul.f32 %v3721_v43, %v5056_v38  ;;  %v2583_v38 = vmul.f32 %v3723_v45, %v5136_v7 }
 0xcf5   :  { %v2596_v15 = vpack.c.bf16 %v2572_v1, %v2572_v1  ;;  %v2607_v23 = vpack.c.bf16 %v2583_v38, %v2583_v38 }
 0xcf7   :  { %v2623_v40 = vunpack.c.l.b16 %v2596_v15  ;;  %v2702_v37 = vunpack.c.l.b16 %v2607_v23 }
 0xcf9   :  { %v2625_v29 = vpack.c.b16 %v2623_v40, %v2623_v40 }
 0xd0d   :  { %v2647_v2 = vpop.permute.xlu2 %2646 }
 0xd14   :  { %v2659_v28 = vpop.permute.xlu0 %2658 }
 0xd1d   :  { %v2649_v62 = vpop.permute.xlu2 %2648 }
 0xd22   :  { %v2635_v30 = vpop.permute.xlu0 %2634 }
 0xd23   :  { %v2664_v17 = vsel %vm391_vm9, %v2624_v10, %v2635_v30 }
 0xd24   :  { %v2669_v6 = vsel %vm52_vm0, %v2664_v17, %v2647_v2 }
 0xd25   :  { %v2673_v14 = vsel %vm1132_vm12, %v2669_v6, %v2659_v28 }
 0xd26   :  { %3370 = vmatmul.msk.bf16.vlgmr.msra.gmra.mxu2 %vm1137_vm13, %v2673_v14 }
 0xd2d   :  { %v2637_v36 = vpop.permute.xlu2 %2636 }
 0xd2e   :  { %v2667_v39 = vsel %vm391_vm9, %v2625_v29, %v2637_v36 }
 0xd2f   :  { %v2671_v8 = vsel %vm52_vm0, %v2667_v39, %v2649_v62 }
 0xd35   :  { %v2727_v12 = vpop.permute.xlu2 %2726 }
 0xd3d   :  { %v2661_v22 = vpop.permute.xlu2 %2660 }
 0xd3e   :  { %v2675_v10 = vsel %vm1132_vm12, %v2671_v8, %v2661_v22 }
 0xd3f   :  { %3371 = vmatmul.msk.bf16.gmra.mxu2 %vm1137_vm13, %v2675_v10 }
 0xd43   :  { %v2715_v57 = vpop.permute.xlu1 %2714 }
 0xd45   :  { %v2729_v56 = vpop.permute.xlu2 %2728 }
 0xd4b   :  { %v2739_v34 = vpop.permute.xlu1 %2738 }
 0xd4d   :  { %v2512_v25 = vpop.xlane.xlu0 %2511  ;;  %v2834_v6 = vpop.permute.xlu2 %2833 }
 0xd4e   :  { %3724 = vrcp.f32 %v2512_v25 }
 0xd4f   :  { %3726 = vrcp.f32 %v2518_v0 }
 0xd54   :  { %v3725_v26 = vpop.eup %3724 }
 0xd55   :  { %v2582_v47 = vmul.f32 %v3725_v26, %v5177_v3  ;;  %v3727_v61 = vpop.eup %3726 }
 0xd56   :  { %v2584_v54 = vmul.f32 %v3727_v61, %v5140_v16  ;;  %v2741_v16 = vpop.permute.xlu1 %2740 }
 0xd57   :  { %v2606_v53 = vpack.c.bf16 %v2582_v47, %v2582_v47 }
 0xd58   :  { %v2608_v50 = vpack.c.bf16 %v2584_v54, %v2584_v54 }
 0xd59   :  { %v2701_v63 = vunpack.c.l.b16 %v2606_v53 }
 0xd5a   :  { %v2703_v59 = vunpack.c.l.b16 %v2608_v50 }
 0xd5b   :  { %v2704_v9 = vpack.c.b16 %v2702_v37, %v2701_v63 }
 0xd5c   :  { %v2705_v3 = vpack.c.b16 %v2703_v59, %v2703_v59 }
 0xd5d   :  { %v2744_v32 = vsel %vm391_vm9, %v2704_v9, %v2715_v57 }
 0xd5e   :  { %v2749_v11 = vsel %vm52_vm0, %v2744_v32, %v2727_v12 }
 0xd5f   :  { %v2753_v7 = vsel %vm1132_vm12, %v2749_v11, %v2739_v34 }
 0xd60   :  { %3372 = vmatmul.msk.bf16.vlgmr.msrb.gmra.mxu3 %vm1137_vm13, %v2753_v7  ;;  %v2717_v48 = vpop.permute.xlu0 %2716 }
 0xd61   :  { %v2747_v13 = vsel %vm391_vm9, %v2705_v3, %v2717_v48 }
 0xd62   :  { %v2751_v19 = vsel %vm52_vm0, %v2747_v13, %v2729_v56 }
 0xd63   :  { %v2755_v21 = vsel %vm1132_vm12, %v2751_v19, %v2741_v16 }
 0xd70   :  { %3373 = vmatmul.msk.bf16.gmra.mxu3 %vm1137_vm13, %v2755_v21 }
 0xda9   :  { %v2689_v24 = vpop.f32.mrf.mxu2 }
 0xdb1   :  { %v2691_v51 = vpop.f32.mrf.mxu2 }
 0xdb2   :  { %v2778_v35 = vpack.c.bf16 %v2691_v51, %v2689_v24 }
 0xdb4   :  { %3382 = vmatmul.msk.bf16.vlgmr.msra.gmra.mxu1 %vm119_vm1, %v2778_v35 }
 0xdc2   :  { %v2694_v60 = vpop.f32.mrf.mxu2 }
 0xdca   :  { %v2696_v58 = vpop.f32.mrf.mxu2 }
 0xde3   :  { %v2769_v49 = vpop.f32.mrf.mxu3 }
 0xde4   :  { %v2779_v20 = vpack.c.bf16 %v2769_v49, %v2694_v60 }
 0xde6   :  { %3383 = vmatmul.msk.bf16.gmra.mxu1 %vm119_vm1, %v2779_v20 }
 0xdeb   :  { %v2771_v44 = vpop.f32.mrf.mxu3 }
 0xdf3   :  { %v2774_v28 = vpop.f32.mrf.mxu3 }
 0xdf4   :  { %v2780_v2 = vpack.c.bf16 %v2774_v28, %v2771_v44 }
 0xdf6   :  { %3384 = vmatmul.msk.bf16.gmra.mxu1 %vm119_vm1, %v2780_v2 }
 0xdfb   :  { %v2776_v30 = vpop.f32.mrf.mxu3 }
 0xe31   :  { %v2811_v17 = vpop.f32.mrf.mxu1 }
 0xe32   :  { %v2826_v62 = vadd.f32 %v2811_v17, %v4632_v27  ;;  %v3458_v17 = vld [vmem:[%s5360_s1 + $0xa8] sm:$0xff] }
 0xe34   :  { %v2836_v14 = vadd.f32 %v2834_v6, %v2826_v62 }
 0xe36   :  { %v2842_v43 = vsel %vm119_vm1, %v2836_v14, 0.0 }
 0xe37   :  { %2843 = vadd.xlane.f32.xlu1 %v2842_v43 }
 0xe39   :  { %v2813_v1 = vpop.f32.mrf.mxu1 }
 0xe3a   :  { %v2827_v36 = vadd.f32 %v2813_v1, %v4637_v42 }
 0xe3c   :  { %v2837_v15 = vadd.f32 %v2834_v6, %v2827_v36 }
 0xe3e   :  { %v2845_v40 = vsel %vm119_vm1, %v2837_v15, 0.0 }
 0xe3f   :  { %2846 = vadd.xlane.f32.xlu2 %v2845_v40 }
 0xe63   :  { %v2816_v12 = vpop.f32.mrf.mxu1 }
 0xe64   :  { %v2828_v29 = vadd.f32 %v2816_v12, %v4642_v46 }
 0xe66   :  { %v5230_v39 = vadd.f32 %v2834_v6, %v2828_v29 }
 0xe68   :  { %v2848_v8 = vsel %vm119_vm1, %v5230_v39, 0.0 }
 0xe69   :  { %2849 = vadd.xlane.f32.xlu0 %v2848_v8 }
 0xe6b   :  { %v2818_v27 = vpop.f32.mrf.mxu1 }
 0xe6c   :  { %v2829_v22 = vadd.f32 %v2818_v27, %v4647_v55 }
 0xe6e   :  { %v2839_v10 = vadd.f32 %v2834_v6, %v2829_v22 }
 0xe70   :  { %v2851_v52 = vsel %vm119_vm1, %v2839_v10, 0.0 }
 0xe71   :  { %2852 = vadd.xlane.f32.xlu1 %v2851_v52 }
 0xe73   :  { %v2821_v42 = vpop.f32.mrf.mxu1 }
 0xe74   :  { %v2830_v0 = vadd.f32 %v2821_v42, %v4652_v5 }
 0xe76   :  { %v2840_v25 = vadd.f32 %v2834_v6, %v2830_v0 }
 0xe78   :  { %v2854_v45 = vsel %vm119_vm1, %v2840_v25, 0.0 }
 0xe79   :  { %2855 = vadd.xlane.f32.xlu2 %v2854_v45 }
 0xe7b   :  { %v2823_v46 = vpop.f32.mrf.mxu1 }
 0xe7c   :  { %v2831_v38 = vadd.f32 %v2823_v46, %v4657_v18 }
 0xe7e   :  { %v5239_v26 = vadd.f32 %v2834_v6, %v2831_v38 }
 0xe80   :  { %v2857_v57 = vsel %vm119_vm1, %v5239_v26, 0.0 }
 0xe81   :  { %2858 = vadd.xlane.f32.xlu0 %v2857_v57 }
 0xeaa   :  { %v2844_v55 = vpop.xlane.xlu1 %2843 }
 0xeab   :  { %v2860_v23 = vmul.f32 %v2844_v55, %v3871_v33 }
 0xead   :  { %v5244_v47 = vsub.f32 %v2836_v14, %v2860_v23 }
 0xeaf   :  { %v2872_v5 = vmul.f32 %v5244_v47, %v5244_v47 }
 0xeb1   :  { %v2878_v53 = vsel %vm119_vm1, %v2872_v5, 0.0 }
 0xeb2   :  { %v2847_v61 = vpop.xlane.xlu2 %2846  ;;  %2879 = vadd.xlane.f32.xlu1 %v2878_v53 }
 0xeb3   :  { %v2861_v18 = vmul.f32 %v2847_v61, %v3871_v33 }
 0xeb5   :  { %v5250_v37 = vsub.f32 %v2837_v15, %v2861_v18 }
 0xeb7   :  { %v2873_v63 = vmul.f32 %v5250_v37, %v5250_v37 }
 0xeb9   :  { %v2881_v54 = vsel %vm119_vm1, %v2873_v63, 0.0 }
 0xeba   :  { %2882 = vadd.xlane.f32.xlu2 %v2881_v54 }
 0xed2   :  { %2974 = vrot.lane.b32.xlu2 %v4701_v4, %s3790_s21 }
 0xedc   :  { %v2850_v9 = vpop.xlane.xlu0 %2849 }
 0xedd   :  { %v2862_v32 = vmul.f32 %v2850_v9, %v3871_v33 }
 0xedf   :  { %v5259_v34 = vsub.f32 %v5230_v39, %v2862_v32 }
 0xee1   :  { %v2874_v11 = vmul.f32 %v5259_v34, %v5259_v34 }
 0xee3   :  { %v2884_v50 = vsel %vm119_vm1, %v2874_v11, 0.0 }
 0xee4   :  { %2885 = vadd.xlane.f32.xlu0 %v2884_v50  ;;  %v2853_v7 = vpop.xlane.xlu1 %2852 }
 0xee5   :  { %v2863_v59 = vmul.f32 %v2853_v7, %v3871_v33 }
 0xee7   :  { %v5265_v48 = vsub.f32 %v2839_v10, %v2863_v59 }
 0xee9   :  { %v2875_v3 = vmul.f32 %v5265_v48, %v5265_v48 }
 0xeeb   :  { %v2887_v13 = vsel %vm119_vm1, %v2875_v3, 0.0 }
 0xeec   :  { %v2856_v56 = vpop.xlane.xlu2 %2855  ;;  %2888 = vadd.xlane.f32.xlu1 %v2887_v13 }
 0xeed   :  { %v2864_v19 = vmul.f32 %v2856_v56, %v3871_v33 }
 0xeef   :  { %v5271_v16 = vsub.f32 %v2840_v25, %v2864_v19 }
 0xef1   :  { %v2876_v21 = vmul.f32 %v5271_v16, %v5271_v16 }
 0xef3   :  { %v2890_v41 = vsel %vm119_vm1, %v2876_v21, 0.0 }
 0xef4   :  { %v2859_v31 = vpop.xlane.xlu0 %2858  ;;  %2891 = vadd.xlane.f32.xlu1 %v2890_v41 }
 0xef5   :  { %v2865_v24 = vmul.f32 %v2859_v31, %v3871_v33 }
 0xef7   :  { %v5278_v51 = vsub.f32 %v5239_v26, %v2865_v24 }
 0xef8   :  { %2983 = vrot.lane.b32.xlu0 %v4701_v4, %s3794_s24  ;;  %v3459_v4 = vld [vmem:[%s5360_s1 + $0xb0] sm:$0xff] }
 0xef9   :  { %v2877_v35 = vmul.f32 %v5278_v51, %v5278_v51  ;;  %3023 = vmatpush.bf16.msra.mxu0 %v3459_v4 }
 0xefb   :  { %v2893_v60 = vsel %vm119_vm1, %v2877_v35, 0.0 }
 0xefc   :  { %2894 = vadd.xlane.f32.xlu1 %v2893_v60 }
 0xefd   :  { %3024 = vmatpush.bf16.msra.mxu0 %v3458_v17 }
 0xf25   :  { %v2880_v58 = vpop.xlane.xlu1 %2879 }
 0xf26   :  { %v2896_v20 = vmul.f32 %v2880_v58, %v3871_v33 }
 0xf28   :  { %v2902_v28 = vadd.f32 1e-05, %v2896_v20 }
 0xf2a   :  { %3728 = vrsqrt.f32 %v2902_v28  ;;  %vm2914_vm9 = vweird.f32 %v2902_v28 }
 0xf2d   :  { %v2883_v49 = vpop.xlane.xlu2 %2882 }
 0xf2e   :  { %v2897_v44 = vmul.f32 %v2883_v49, %v3871_v33 }
 0xf30   :  { %v2903_v2 = vadd.f32 1e-05, %v2897_v44  ;;  %v3729_v30 = vpop.eup %3728 }
 0xf31   :  { %v2909_v62 = vmul.f32 %v3729_v30, %v2902_v28  ;;  %vm2915_vm0 = vweird.f32 %v3729_v30 }
 0xf32   :  { %3730 = vrsqrt.f32 %v2903_v2  ;;  %vm2916_vm10 = vmor %vm2914_vm9, %vm2915_vm0  ;;  %vm2924_vm11 = vweird.f32 %v2903_v2 }
 0xf33   :  { %v2910_v43 = vmul.f32 %v3729_v30, %v2909_v62 }
 0xf35   :  { %v2911_v36 = vmul.f32 0.5, %v2910_v43  ;;  %v5297_v5 = vpop.permute.xlu2 %2974 }
 0xf37   :  { %v2912_v29 = vsub.f32 1.5, %v2911_v36 }
 0xf38   :  { %v3731_v6 = vpop.eup %3730 }
 0xf39   :  { %v2919_v14 = vmul.f32 %v3731_v6, %v2903_v2  ;;  %v2913_v22 = vmul.f32 %v3729_v30, %v2912_v29  ;;  %vm2925_vm7 = vweird.f32 %v3731_v6 }
 0xf3a   :  { %vm2926_vm12 = vmor %vm2924_vm11, %vm2925_vm7  ;;  %vm3210_vm11 = vcmask 123904  }
 0xf3b   :  { %v2920_v1 = vmul.f32 %v3731_v6, %v2919_v14  ;;  %v2917_v25 = vsel %vm2916_vm10, %v3729_v30, %v2913_v22  ;;  %vm3178_vm10 = vcmask 1040384  }
 0xf3c   :  { %v2968_v57 = vmul.f32 %v2917_v25, %v5244_v47  ;;  %v3464_v25 = vld [vmem:[%s5360_s1 + $0xd8] sm:$0xff] }
 0xf3d   :  { %v2921_v15 = vmul.f32 0.5, %v2920_v1 }
 0xf3e   :  { %v2977_v63 = vmul.f32 %v5297_v5, %v2968_v57  ;;  %v5338_v57 = vld [vmem:[%s5361_s2 + $0x20] sm:$0xff] }
 0xf3f   :  { %v2922_v27 = vsub.f32 1.5, %v2921_v15 }
 0xf41   :  { %v2923_v10 = vmul.f32 %v3731_v6, %v2922_v27 }
 0xf43   :  { %v2927_v46 = vsel %vm2926_vm12, %v3731_v6, %v2923_v10 }
 0xf44   :  { %v2969_v23 = vmul.f32 %v2927_v46, %v5250_v37  ;;  %v3462_v46 = vld [vmem:[%s5360_s1 + $0xc8] sm:$0xff] }
 0xf46   :  { %v2978_v32 = vmul.f32 %v5297_v5, %v2969_v23  ;;  %v3460_v23 = vld [vmem:[%s5360_s1 + $0xb8] sm:$0xff] }
 0xf57   :  { %v2886_v40 = vpop.xlane.xlu0 %2885 }
 0xf58   :  { %v2898_v12 = vmul.f32 %v2886_v40, %v3871_v33 }
 0xf5a   :  { %v2904_v8 = vadd.f32 1e-05, %v2898_v12 }
 0xf5c   :  { %3732 = vrsqrt.f32 %v2904_v8  ;;  %vm2934_vm4 = vweird.f32 %v2904_v8 }
 0xf5f   :  { %v2889_v52 = vpop.xlane.xlu1 %2888 }
 0xf60   :  { %v2899_v42 = vmul.f32 %v2889_v52, %v3871_v33 }
 0xf62   :  { %v3733_v0 = vpop.eup %3732  ;;  %v2905_v45 = vadd.f32 1e-05, %v2899_v42 }
 0xf63   :  { %v2929_v38 = vmul.f32 %v3733_v0, %v2904_v8  ;;  %vm2935_vm13 = vweird.f32 %v3733_v0 }
 0xf64   :  { %3734 = vrsqrt.f32 %v2905_v45  ;;  %vm2936_vm5 = vmor %vm2934_vm4, %vm2935_vm13  ;;  %vm2944_vm8 = vweird.f32 %v2905_v45 }
 0xf65   :  { %v2930_v55 = vmul.f32 %v3733_v0, %v2929_v38  ;;  %v3461_v38 = vld [vmem:[%s5360_s1 + $0xc0] sm:$0xff] }
 0xf67   :  { %v2931_v53 = vmul.f32 0.5, %v2930_v55  ;;  %v2892_v61 = vpop.xlane.xlu1 %2891  ;;  %v2995_v55 = vperm.slane %v5338_v57, 2 }
 0xf68   :  { %v2900_v18 = vmul.f32 %v2892_v61, %v3871_v33 }
 0xf69   :  { %v2932_v54 = vsub.f32 1.5, %v2931_v53 }
 0xf6a   :  { %v3735_v9 = vpop.eup %3734  ;;  %v2906_v11 = vadd.f32 1e-05, %v2900_v18  ;;  %v2984_v50 = vpop.permute.xlu0 %2983 }
 0xf6b   :  { %v2933_v7 = vmul.f32 %v3733_v0, %v2932_v54  ;;  %v2939_v47 = vmul.f32 %v3735_v9, %v2905_v45  ;;  %v2986_v59 = vadd.f32 %v2984_v50, %v2977_v63  ;;  %v2987_v37 = vadd.f32 %v2984_v50, %v2978_v32  ;;  %v3463_v45 = vld [vmem:[%s5360_s1 + $0xd0] sm:$0xff] }
 0xf6c   :  { %3736 = vrsqrt.f32 %v2906_v11  ;;  %vm2945_vm6 = vweird.f32 %v3735_v9  ;;  %vm2954_vm2 = vweird.f32 %v2906_v11 }
 0xf6d   :  { %v2940_v3 = vmul.f32 %v3735_v9, %v2939_v47  ;;  %v2992_v13 = vpack.c.bf16 %v2987_v37, %v2986_v59  ;;  %v2937_v56 = vsel %vm2936_vm5, %v3733_v0, %v2933_v7  ;;  %vm2946_vm14 = vmor %vm2944_vm8, %vm2945_vm6  ;;  %v3467_v0 = vld [vmem:[%s5360_s1 + $0xf0] sm:$0xff] }
 0xf6e   :  { %v2970_v35 = vmul.f32 %v2937_v56, %v5259_v34  ;;  %3146 = vmatpush.bf16.msrb.mxu2 %v3467_v0 }
 0xf6f   :  { %v2941_v19 = vmul.f32 0.5, %v2940_v3  ;;  %v2895_v21 = vpop.xlane.xlu1 %2894  ;;  %3393 = vmatmul.msk.bf16.vlgmr.msra.gmra.mxu0 %vm119_vm1, %v2992_v13 }
 0xf70   :  { %v2901_v41 = vmul.f32 %v2895_v21, %v3871_v33  ;;  %v2979_v2 = vmul.f32 %v5297_v5, %v2970_v35 }
 0xf71   :  { %v2942_v31 = vsub.f32 1.5, %v2941_v19 }
 0xf72   :  { %v3737_v24 = vpop.eup %3736  ;;  %v2907_v60 = vadd.f32 1e-05, %v2901_v41  ;;  %v2988_v6 = vadd.f32 %v2984_v50, %v2979_v2 }
 0xf73   :  { %v2943_v58 = vmul.f32 %v3735_v9, %v2942_v31  ;;  %v2949_v49 = vmul.f32 %v3737_v24, %v2906_v11  ;;  %vm2955_vm15 = vweird.f32 %v3737_v24 }
 0xf74   :  { %3738 = vrsqrt.f32 %v2907_v60  ;;  %vm2956_vm3 = vmor %vm2954_vm2, %vm2955_vm15  ;;  %vm2964_vm7 = vweird.f32 %v2907_v60 }
 0xf75   :  { %v2947_v20 = vsel %vm2946_vm14, %v3735_v9, %v2943_v58  ;;  %v2950_v44 = vmul.f32 %v3737_v24, %v2949_v49 }
 0xf76   :  { %v2971_v28 = vmul.f32 %v2947_v20, %v5265_v48 }
 0xf77   :  { %v2951_v4 = vmul.f32 0.5, %v2950_v44 }
 0xf78   :  { %v2980_v33 = vmul.f32 %v5297_v5, %v2971_v28 }
 0xf79   :  { %v2952_v30 = vsub.f32 1.5, %v2951_v4 }
 0xf7a   :  { %v3739_v17 = vpop.eup %3738  ;;  %v2989_v62 = vadd.f32 %v2984_v50, %v2980_v33 }
 0xf7b   :  { %v2953_v34 = vmul.f32 %v3737_v24, %v2952_v30  ;;  %v2959_v14 = vmul.f32 %v3739_v17, %v2907_v60  ;;  %vm2965_vm0 = vweird.f32 %v3739_v17 }
 0xf7c   :  { %v2993_v43 = vpack.c.bf16 %v2989_v62, %v2988_v6  ;;  %vm2966_vm9 = vmor %vm2964_vm7, %vm2965_vm0 }
 0xf7d   :  { %v2960_v1 = vmul.f32 %v3739_v17, %v2959_v14  ;;  %v2957_v36 = vsel %vm2956_vm3, %v3737_v24, %v2953_v34 }
 0xf7e   :  { %v2972_v40 = vmul.f32 %v2957_v36, %v5271_v16  ;;  %v3466_v16 = vld [vmem:[%s5360_s1 + $0xe8] sm:$0xff] }
 0xf7f   :  { %v2961_v15 = vmul.f32 0.5, %v2960_v1  ;;  %3394 = vmatmul.msk.bf16.gmra.mxu0 %vm119_vm1, %v2993_v43  ;;  %3147 = vmatpush.bf16.msrb.mxu2 %v3466_v16 }
 0xf80   :  { %v2981_v8 = vmul.f32 %v5297_v5, %v2972_v40 }
 0xf81   :  { %v2962_v48 = vsub.f32 1.5, %v2961_v15 }
 0xf82   :  { %v2990_v10 = vadd.f32 %v2984_v50, %v2981_v8 }
 0xf83   :  { %v2963_v12 = vmul.f32 %v3739_v17, %v2962_v48 }
 0xf85   :  { %v2967_v29 = vsel %vm2966_vm9, %v3739_v17, %v2963_v12 }
 0xf86   :  { %v2973_v27 = vmul.f32 %v2967_v29, %v5278_v51  ;;  %v3465_v51 = vld [vmem:[%s5360_s1 + $0xe0] sm:$0xff] }
 0xf87   :  { %3148 = vmatpush.bf16.msrb.mxu2 %v3465_v51 }
 0xf88   :  { %v2982_v22 = vmul.f32 %v5297_v5, %v2973_v27 }
 0xf8a   :  { %v2991_v52 = vadd.f32 %v2984_v50, %v2982_v22 }
 0xf8b   :  { %3149 = vmatpush.bf16.msrb.mxu2 %v3464_v25 }
 0xf8c   :  { %v2994_v42 = vpack.c.bf16 %v2991_v52, %v2990_v10 }
 0xf8f   :  { %3395 = vmatmul.msk.bf16.gmra.mxu0 %vm119_vm1, %v2994_v42  ;;  %3150 = vmatpush.bf16.msrb.mxu2 %v3463_v45 }
 0xf93   :  { %3151 = vmatpush.bf16.msrb.mxu2 %v3462_v46 }
 0xf97   :  { %3152 = vmatpush.bf16.msrb.mxu2 %v3461_v38 }
 0xf9b   :  { %3153 = vmatpush.bf16.msrb.mxu2 %v3460_v23 }
 0xfec   :  { %v3026_v5 = vpop.f32.mrf.mxu0 }
 0xfed   :  { %v3027_v53 = vadd.f32 %v3026_v5, %v2995_v55 }
 0xfef   :  { %v3047_v61 = vmul.f32 0.044715, %v3027_v53  ;;  %v3041_v20 = vmul.f32 0.5, %v3027_v53 }
 0xff1   :  { %v3053_v18 = vmul.f32 %v3047_v61, %v3027_v53 }
 0xff3   :  { %v3059_v63 = vmul.f32 %v3053_v18, %v3027_v53 }
 0xff4   :  { %v3028_v54 = vpop.f32.mrf.mxu0 }
 0xff5   :  { %v3065_v9 = vadd.f32 %v3059_v63, %v3027_v53  ;;  %v3029_v32 = vadd.f32 %v3028_v54, %v2995_v55 }
 0xff7   :  { %v3048_v11 = vmul.f32 0.044715, %v3029_v32  ;;  %v3071_v50 = vmul.f32 0.7978846, %v3065_v9  ;;  %v3042_v44 = vmul.f32 0.5, %v3029_v32 }
 0xff9   :  { %v3054_v7 = vmul.f32 %v3048_v11, %v3029_v32  ;;  %3740 = vtanh.f32 %v3071_v50 }
 0xffb   :  { %v3060_v47 = vmul.f32 %v3054_v7, %v3029_v32  ;;  %v3469_v7 = vld [vmem:[%s5360_s1 + $0x100] sm:$0xff] }
 0xffc   :  { %v3031_v59 = vpop.f32.mrf.mxu0  ;;  %3202 = vmatpush.bf16.msra.mxu3 %v3469_v7 }
 0xffd   :  { %v3066_v37 = vadd.f32 %v3060_v47, %v3029_v32  ;;  %v3032_v3 = vadd.f32 %v3031_v59, %v2995_v55  ;;  %v3468_v47 = vld [vmem:[%s5360_s1 + $0xf8] sm:$0xff]  ;;  %s3795_s1 = smov [#allocation2]  }
 0xffe   :  { %s3232_s15 = sshll.u32 %s3795_s1, 4  ;;  %s3233_s15 = int_to_ptr.vmem [resolvable:$true] %s3232_s15 }
 0xfff   :  { %v3072_v13 = vmul.f32 0.7978846, %v3066_v37  ;;  %v3049_v56 = vmul.f32 0.044715, %v3032_v3  ;;  %v3741_v21 = vpop.eup %3740  ;;  %v3043_v10 = vmul.f32 0.5, %v3032_v3 }
0x1000   :  { %v3083_v60 = vadd.f32 1.0, %v3741_v21  ;;  %3203 = vmatpush.bf16.msra.mxu3 %v3468_v47 }
0x1001   :  { %3742 = vtanh.f32 %v3072_v13  ;;  %v3055_v19 = vmul.f32 %v3049_v56, %v3032_v3 }
0x1002   :  { %v3089_v33 = vmul.f32 %v3083_v60, %v3041_v20 }
0x1003   :  { %v3061_v41 = vmul.f32 %v3055_v19, %v3032_v3  ;;  %v3168_v19 = vperm.slane %v5338_v57, 3 }
0x1004   :  { %v3033_v31 = vpop.f32.mrf.mxu0 }
0x1005   :  { %v3034_v24 = vadd.f32 %v3033_v31, %v2995_v55  ;;  %v3067_v35 = vadd.f32 %v3061_v41, %v3032_v3 }
0x1007   :  { %v3743_v58 = vpop.eup %3742  ;;  %v3050_v49 = vmul.f32 0.044715, %v3034_v24  ;;  %v3073_v4 = vmul.f32 0.7978846, %v3067_v35  ;;  %v3044_v52 = vmul.f32 0.5, %v3034_v24 }
0x1008   :  { %v3084_v28 = vadd.f32 1.0, %v3743_v58 }
0x1009   :  { %v3056_v2 = vmul.f32 %v3050_v49, %v3034_v24  ;;  %3744 = vtanh.f32 %v3073_v4 }
0x100a   :  { %v3090_v30 = vmul.f32 %v3084_v28, %v3042_v44 }
0x100b   :  { %v3062_v17 = vmul.f32 %v3056_v2, %v3034_v24 }
0x100c   :  { %v3036_v6 = vpop.f32.mrf.mxu0  ;;  %v3095_v62 = vpack.c.bf16 %v3090_v30, %v3089_v33 }
0x100d   :  { %v3037_v34 = vadd.f32 %v3036_v6, %v2995_v55  ;;  %v3068_v14 = vadd.f32 %v3062_v17, %v3034_v24 }
0x100e   :  { %3154 = vmatmul.bf16.vlgmr.msrb.gmra.mxu2 %v3095_v62 }
0x100f   :  { %v3051_v43 = vmul.f32 0.044715, %v3037_v34  ;;  %v3074_v1 = vmul.f32 0.7978846, %v3068_v14  ;;  %v3745_v15 = vpop.eup %3744  ;;  %v3045_v61 = vmul.f32 0.5, %v3037_v34 }
0x1010   :  { %v3085_v8 = vadd.f32 1.0, %v3745_v15 }
0x1011   :  { %v3057_v36 = vmul.f32 %v3051_v43, %v3037_v34  ;;  %3746 = vtanh.f32 %v3074_v1 }
0x1012   :  { %v3091_v51 = vmul.f32 %v3085_v8, %v3043_v10 }
0x1013   :  { %v3063_v48 = vmul.f32 %v3057_v36, %v3037_v34 }
0x1014   :  { %v3038_v40 = vpop.f32.mrf.mxu0 }
0x1015   :  { %v3039_v12 = vadd.f32 %v3038_v40, %v2995_v55  ;;  %v3069_v29 = vadd.f32 %v3063_v48, %v3037_v34 }
0x1017   :  { %v3747_v27 = vpop.eup %3746  ;;  %v3052_v22 = vmul.f32 0.044715, %v3039_v12  ;;  %v3075_v16 = vmul.f32 0.7978846, %v3069_v29  ;;  %v3046_v18 = vmul.f32 0.5, %v3039_v12 }
0x1018   :  { %v3086_v42 = vadd.f32 1.0, %v3747_v27 }
0x1019   :  { %v3058_v0 = vmul.f32 %v3052_v22, %v3039_v12  ;;  %3748 = vtanh.f32 %v3075_v16 }
0x101a   :  { %v3092_v25 = vmul.f32 %v3086_v42, %v3044_v52 }
0x101b   :  { %v3064_v45 = vmul.f32 %v3058_v0, %v3039_v12 }
0x101c   :  { %v3096_v46 = vpack.c.bf16 %v3092_v25, %v3091_v51 }
0x101d   :  { %v3070_v38 = vadd.f32 %v3064_v45, %v3039_v12 }
0x101e   :  { %3157 = vmatmul.bf16.gmra.mxu2 %v3096_v46 }
0x101f   :  { %v3076_v23 = vmul.f32 0.7978846, %v3070_v38  ;;  %v3749_v5 = vpop.eup %3748 }
0x1020   :  { %v3087_v55 = vadd.f32 1.0, %v3749_v5 }
0x1021   :  { %3750 = vtanh.f32 %v3076_v23 }
0x1022   :  { %v3093_v54 = vmul.f32 %v3087_v55, %v3045_v61 }
0x1027   :  { %v3751_v53 = vpop.eup %3750 }
0x1028   :  { %v3088_v63 = vadd.f32 1.0, %v3751_v53 }
0x102a   :  { %v3094_v9 = vmul.f32 %v3088_v63, %v3046_v18 }
0x102c   :  { %v3097_v32 = vpack.c.bf16 %v3094_v9, %v3093_v54 }
0x102e   :  { %3161 = vmatmul.bf16.gmra.mxu2 %v3097_v32 }
0x1091   :  { %v3155_v11 = vpop.f32.mrf.mxu2 }
0x1099   :  { %v3156_v50 = vpop.f32.mrf.mxu2 }
0x10a1   :  { %v3158_v59 = vpop.f32.mrf.mxu2 }
0x10a2   :  { %v3166_v56 = vadd.f32 %v3158_v59, %v5230_v39 }
0x10a4   :  { %v3169_v31 = vadd.f32 %v3168_v19, %v3166_v56 }
0x10a9   :  { %v3160_v37 = vpop.f32.mrf.mxu2 }
0x10b1   :  { %v3162_v3 = vpop.f32.mrf.mxu2 }
0x10b9   :  { %v3163_v13 = vpop.f32.mrf.mxu2 }
0x10ba   :  { %v3167_v21 = vadd.f32 %v3163_v13, %v5239_v26 }
0x10bc   :  { %v3170_v41 = vadd.f32 %v3168_v19, %v3167_v21 }
0x10be   :  { %v3176_v24 = vrot.slane %v3170_v41, 7 }
0x10c0   :  { %v3179_v35 = vsel %vm3178_vm10, %v3169_v31, %v3176_v24 }
0x10c1   :  { %v3180_v60 = vpack.c.bf16 %v3179_v35, %v3179_v35 }
0x10c3   :  { %3436 = vmatmul.msk.bf16.vlgmr.msra.gmra.mxu3 %vm119_vm1, %v3180_v60 }
0x1146   :  { %v3205_v58 = vpop.f32.mrf.mxu3 }
0x1147   :  { %v3209_v49 = vmul.f32 %v3205_v58, %v3205_v58 }
0x1149   :  { %v3211_v20 = vsel %vm3210_vm11, %v3209_v49, 0.0 }
0x114a   :  { %3212 = vadd.xlane.f32.xlu1 %v3211_v20 }
0x114e   :  { %v3207_v44 = vpop.f32.mrf.mxu3 }
0x11bd   :  { %v3213_v39 = vpop.xlane.xlu1 %3212 }
0x11be   :  { %v3214_v28 = vadd.f32 1e-12, %v3213_v39 }
0x11c0   :  { %3752 = vrsqrt.f32 %v3214_v28  ;;  %vm3221_vm13 = vweird.f32 %v3214_v28 }
0x11c6   :  { %v3753_v57 = vpop.eup %3752 }
0x11c7   :  { %v3216_v26 = vmul.f32 %v3753_v57, %v3214_v28  ;;  %vm3222_vm12 = vweird.f32 %v3753_v57 }
0x11c8   :  { %vm3223_vm1 = vmor %vm3221_vm13, %vm3222_vm12 }
0x11c9   :  { %v3217_v2 = vmul.f32 %v3753_v57, %v3216_v26 }
0x11cb   :  { %v3218_v4 = vmul.f32 0.5, %v3217_v2 }
0x11cd   :  { %v3219_v33 = vsub.f32 1.5, %v3218_v4 }
0x11cf   :  { %v3220_v30 = vmul.f32 %v3753_v57, %v3219_v33 }
0x11d1   :  { %v3224_v17 = vsel %vm3223_vm1, %v3753_v57, %v3220_v30 }
0x11d2   :  { %v3225_v6 = vmul.f32 %v3224_v17, %v3205_v58 }
0x11d4   :  { %3226 = vst.msk [vmem:[#allocation2] sm:$0x3] %vm3210_vm11, %v3225_v6 }
0x11d5   :  { %3237 = dma.vmem_to_hbm [thread:$0]  %s3233_s15, 32, %s3235_s18, [#allocation3]  }
0x11d6   :  { %3780 = dma.done.wait [#allocation3], 32  }
0x11d7   :  { %3781 = vsyncadd [#allocation3], 4294967264 }
0x11d8   :  { %3242 = vsyncpa [#allocation3], 1 }

</bundles_post_ra>
